<compile_context>
chip_gen: v7x
topology: tpu7x:2x2x1
jax: 0.10.0
libtpu: 0.0.40
codegen_flags: <defaults>
</compile_context>

<pallas_src>
import functools
import math
import re

import jax
import jax.numpy as jnp
from jax.experimental import pallas as pl
from jax.experimental.pallas import tpu as pltpu

LN_EPS = 1e-5        # PyTorch nn.LayerNorm default
NEG_BIG = -9e15      # module's fill value for exactly-zero logits (applied even with mask=None)


def _layer_norm(x, gamma, beta):
    mu = jnp.mean(x, axis=-1, keepdims=True)
    var = jnp.mean((x - mu) ** 2, axis=-1, keepdims=True)
    return (x - mu) * jax.lax.rsqrt(var + LN_EPS) * gamma + beta


def transformer_block_kernel(
    q_ref,                                  # (bb, N, D) f32 input block (all rows of this batch block)
    wqkv_ref,                               # (D, 3D) bf16 : [wq.T | wk.T | wv.T]
    wlast_ref,                              # (D, D)  bf16
    ln1_g_ref, ln1_b_ref,                   # (1, D) f32
    w1_ref, b1_ref,                         # (D, 2D) bf16, (1, 2D) f32
    w2_ref, b2_ref,                         # (2D, D) bf16, (1, D) f32
    ln2_g_ref, ln2_b_ref,                   # (1, D) f32
    h_ref,                                  # (bb, tq, D) f32 output
    atten_ref,                              # (bb, tq, N) output
    qkv_sc,                                 # (3, bb, N, D) bf16 scratch, persists across qi
    *, scale, exp_bf16,
):
    bb, n, d = q_ref.shape
    tq = h_ref.shape[1]
    qi = pl.program_id(1)

    # ---- fused Q/K/V projection, once per batch block (qi == 0), cached in VMEM ----
    @pl.when(qi == 0)
    def _project_qkv():
        xb = q_ref[...].reshape(bb * n, d).astype(jnp.bfloat16)
        proj = jnp.dot(xb, wqkv_ref[...], preferred_element_type=jnp.float32)  # (bb*n, 3d)
        # 1/sqrt(source_len) folded into Q here: N*D multiplies instead of N^2 on logits.
        qkv_sc[0] = (proj[:, :d] * scale).astype(jnp.bfloat16).reshape(bb, n, d)
        qkv_sc[1] = proj[:, d:2 * d].astype(jnp.bfloat16).reshape(bb, n, d)
        qkv_sc[2] = proj[:, 2 * d:].astype(jnp.bfloat16).reshape(bb, n, d)

    row0 = pl.multiple_of(qi * tq, tq)
    q3 = qkv_sc[0, :, pl.ds(row0, tq), :]        # (bb, tq, d) bf16, pre-scaled
    k3 = qkv_sc[1]                               # (bb, n, d) bf16
    v3 = qkv_sc[2]                               # (bb, n, d) bf16

    # ---- attention core (num_head=1, matmul attention, mask=None, dropout=0) ----
    # TODO(synk): for very large N add flash-style KV blocking; here full K/V stay in VMEM.
    logits = jnp.einsum("bqd,bkd->bqk", q3, k3, preferred_element_type=jnp.float32)
    # The module replaces exactly-zero logits with -9e15 even on the mask=None path.
    logits = jnp.where(logits != 0.0, logits, jnp.float32(NEG_BIG))

    m = jnp.max(logits, axis=-1, keepdims=True)
    z = logits - m
    if exp_bf16:                                  # v6e/v7x: bf16 EUP ~2x f32 rate
        e = jnp.exp(z.astype(jnp.bfloat16)).astype(jnp.float32)
    else:                                         # v5e: no bf16 EUP, keep f32
        e = jnp.exp(z)
    denom = jnp.sum(e, axis=-1, keepdims=True)
    atten = e * pl.reciprocal(denom, approx=True)  # EUP slot, off the VPU path

    attentioned = jnp.einsum("bqk,bkd->bqd", atten.astype(jnp.bfloat16), v3,
                             preferred_element_type=jnp.float32)
    h1 = jnp.dot(attentioned.reshape(bb * tq, d).astype(jnp.bfloat16), wlast_ref[...],
                 preferred_element_type=jnp.float32)

    # ---- post-norm residual: h1 = LN1(attn_out + q) ----
    x_rows = q_ref[:, pl.ds(row0, tq), :].reshape(bb * tq, d)
    h1 = _layer_norm(h1 + x_rows, ln1_g_ref[...], ln1_b_ref[...])

    # ---- FF(emb, emb, 2*emb): Linear -> ReLU -> Linear ----
    # TODO(synk): FF class source not provided; standard 2-layer MLP with bias + ReLU assumed.
    # TODO(synk): on v7x with D >= ~2048 add hidden-dim (K) tiling for w1/w2 (weights are 16*D^2 B).
    hid = jnp.dot(h1.astype(jnp.bfloat16), w1_ref[...],
                  preferred_element_type=jnp.float32) + b1_ref[...]
    hid = jnp.maximum(hid, 0.0)
    h2 = jnp.dot(hid.astype(jnp.bfloat16), w2_ref[...],
                 preferred_element_type=jnp.float32) + b2_ref[...]

    # ---- h = LN2(ff + h1) ----
    h = _layer_norm(h2 + h1, ln2_g_ref[...], ln2_b_ref[...])

    h_ref[...] = h.reshape(bb, tq, d)
    atten_ref[...] = atten.astype(atten_ref.dtype)


# ----------------------------------------------------------------------------------------
# Wrapper helpers
# ----------------------------------------------------------------------------------------
_BUFFERED_SINGLE_OK = None


def _single_buffer_supported():
    """One-time cached probe: can this jax/libtpu lower pl.Buffered(1) BlockSpecs?"""
    global _BUFFERED_SINGLE_OK
    if _BUFFERED_SINGLE_OK is not None:
        return _BUFFERED_SINGLE_OK
    if not hasattr(pl, "Buffered"):
        _BUFFERED_SINGLE_OK = False
        return False
    try:
        def _probe(x_ref, o_ref):
            o_ref[...] = x_ref[...]
        x = jnp.zeros((8, 128), jnp.float32)
        out = pl.pallas_call(
            _probe,
            grid=(1,),
            in_specs=[pl.BlockSpec((8, 128), lambda i: (0, 0),
                                   pipeline_mode=pl.Buffered(1))],
            out_specs=pl.BlockSpec((8, 128), lambda i: (0, 0)),
            out_shape=jax.ShapeDtypeStruct((8, 128), jnp.float32),
        )(x)
        jax.block_until_ready(out)
        _BUFFERED_SINGLE_OK = True
    except Exception:
        _BUFFERED_SINGLE_OK = False
    return _BUFFERED_SINGLE_OK


def _tpu_generation():
    try:
        kind = jax.devices()[0].device_kind.lower()
        m = re.search(r"v(\d+)", kind)
        return int(m.group(1)) if m else 0
    except Exception:
        return 0


def _vmem_limit_bytes(gen):
    # v7x: 64 MiB physical VMEM per TensorCore -> leave headroom; v5e/v6e: 128 MiB physical.
    base = (100 << 20) if gen in (5, 6) else (48 << 20)
    try:
        cap = getattr(pltpu.get_tpu_info(), "vmem_capacity_bytes", None)
        if cap:  # only ever shrink based on the reported capacity, never grow
            base = max(32 << 20, min(base, int(cap) - (12 << 20)))
    except Exception:
        pass
    return int(base)


def _choose_batch_block(B, N, multi_core):
    # ~256 rows of work per grid step (full v6e/v7x MXU height).
    bb = min(B, max(1, 256 // max(N, 1)))
    while B % bb:
        bb -= 1
    # Only multi-TensorCore chips (v7x) benefit from forcing >=2 grid steps on the parallel
    # batch axis; on single-TC v5e/v6e the grid is a sequential loop (bigger bb is better).
    if multi_core and B >= 2 and B // bb < 2:
        for cand in range(bb - 1, 0, -1):
            if B % cand == 0 and B // cand >= 2:
                bb = cand
                break
    return bb


def _fixed_vmem_bytes(bb, N, D):
    weights = 16 * D * D + 40 * D          # bf16 matmul weights + f32 LN/bias rows
    q_in = 2 * bb * N * D * 4              # double-buffered f32 input block
    scratch = 3 * bb * N * D * 2           # bf16 Q/K/V scratch
    return weights + q_in + scratch


def _tile_vmem_bytes(bb, tq, N, D, atten_bytes):
    # per-step attention temporaries + double-buffered outputs (rough upper bound)
    return bb * tq * (N * (14 + 2 * atten_bytes) + D * 40)


def _q_block_candidates(N):
    cands = [t for t in range(8, N + 1, 8) if N % t == 0]
    return cands or [N]


def _choose_q_block(bb, N, D, atten_bytes, rem_bytes):
    cands = _q_block_candidates(N)
    for t in sorted(cands, reverse=True):
        if _tile_vmem_bytes(bb, t, N, D, atten_bytes) <= rem_bytes:
            return t
    return cands[0]


def prepare_params(params):
    """Hoisted, call-shape-independent weight prep: transpose PyTorch (out,in) Linear
    weights to contraction-major (in,out), fuse wq|wk|wv into one (D,3D) matrix, cast
    matmul weights to bf16.  No-op if `params` was already prepared."""
    if "wqkv" in params:
        return params
    t = lambda w: jnp.asarray(w, jnp.float32).T
    row = lambda v: jnp.asarray(v, jnp.float32).reshape(1, -1)
    wqkv = jnp.concatenate([t(params["wq"]), t(params["wk"]), t(params["wv"])],
                           axis=1).astype(jnp.bfloat16)
    return {
        "wqkv": wqkv,
        "wlast": t(params["wlast"]).astype(jnp.bfloat16),
        "ln1_g": row(params["ln1_g"]), "ln1_b": row(params["ln1_b"]),
        "w1": t(params["w1"]).astype(jnp.bfloat16), "b1": row(params["b1"]),
        "w2": t(params["w2"]).astype(jnp.bfloat16), "b2": row(params["b2"]),
        "ln2_g": row(params["ln2_g"]), "ln2_b": row(params["ln2_b"]),
    }


def transformer_block(q, params, *, batch_block=None, q_block=None,
                      atten_dtype=jnp.float32):
    """q: (B, N, D) float32.  Returns (h, atten): (B, N, D) f32, (B, N, N) atten_dtype."""
    params = prepare_params(params)
    B, N, D = q.shape
    if D % 128 != 0 or N % 8 != 0:
        raise ValueError(f"kernel requires D % 128 == 0 and N % 8 == 0 (got N={N}, D={D})")

    gen = _tpu_generation()
    vmem_limit = _vmem_limit_bytes(gen)
    exp_bf16 = gen >= 6                    # v5e has no bf16 EUP path
    abytes = jnp.dtype(atten_dtype).itemsize

    bb = batch_block if batch_block is not None else _choose_batch_block(B, N, gen >= 7)
    budget = int(0.8 * vmem_limit)
    if q_block is not None:
        tq = q_block
    else:
        while True:
            rem = budget - _fixed_vmem_bytes(bb, N, D)
            tq = _choose_q_block(bb, N, D, abytes, rem)
            if bb == 1 or _tile_vmem_bytes(bb, tq, N, D, abytes) <= rem:
                break
            nb = bb - 1
            while nb > 1 and B % nb:
                nb -= 1
            bb = max(1, nb)
    assert B % bb == 0 and N % tq == 0

    grid = (B // bb, N // tq)
    weight_args = (
        params["wqkv"], params["wlast"],
        params["ln1_g"], params["ln1_b"],
        params["w1"], params["b1"],
        params["w2"], params["b2"],
        params["ln2_g"], params["ln2_b"],
    )

    single_buf = _single_buffer_supported()

    def w_spec(shape):
        nd = len(shape)
        idx = lambda b, qi, _nd=nd: (0,) * _nd
        if single_buf:
            # Constant-index weight blocks never change across the grid; a single buffer
            # halves their VMEM footprint (matters most for v7x's 64 MiB VMEM).
            return pl.BlockSpec(shape, idx, pipeline_mode=pl.Buffered(1))
        return pl.BlockSpec(shape, idx)

    in_specs = [pl.BlockSpec((bb, N, D), lambda b, qi: (b, 0, 0))]
    in_specs += [w_spec(w.shape) for w in weight_args]
    out_specs = [
        pl.BlockSpec((bb, tq, D), lambda b, qi: (b, qi, 0)),
        pl.BlockSpec((bb, tq, N), lambda b, qi: (b, qi, 0)),
    ]
    out_shape = (
        jax.ShapeDtypeStruct((B, N, D), jnp.float32),
        jax.ShapeDtypeStruct((B, N, N), atten_dtype),
    )

    kernel = functools.partial(transformer_block_kernel,
                               scale=1.0 / math.sqrt(float(N)),
                               exp_bf16=exp_bf16)

    return pl.pallas_call(
        kernel,
        grid_spec=pltpu.PrefetchScalarGridSpec(
            num_scalar_prefetch=0,
            grid=grid,
            in_specs=in_specs,
            out_specs=out_specs,
            scratch_shapes=[pltpu.VMEM((3, bb, N, D), jnp.bfloat16)],
        ),
        out_shape=out_shape,
        compiler_params=pltpu.CompilerParams(
            dimension_semantics=("parallel", "arbitrary"),
            vmem_limit_bytes=vmem_limit,
        ),
    )(q, *weight_args)


# ----------------------------------------------------------------------------------------
# Pure-JAX f32 reference (mirrors the PyTorch module) + deterministic synthetic params
# ----------------------------------------------------------------------------------------
def _layer_norm_ref(x, g, b):
    mu = jnp.mean(x, axis=-1, keepdims=True)
    var = jnp.mean((x - mu) ** 2, axis=-1, keepdims=True)
    return (x - mu) / jnp.sqrt(var + LN_EPS) * g + b


def transformer_block_reference(q, params):
    N = q.shape[-2]
    in_q = q @ params["wq"].T
    in_k = q @ params["wk"].T
    in_v = q @ params["wv"].T
    logits = jnp.einsum("bqd,bkd->bqk", in_q, in_k) / math.sqrt(float(N))
    logits = jnp.where(logits != 0.0, logits, jnp.float32(NEG_BIG))
    atten = jax.nn.softmax(logits, axis=-1)
    h1 = jnp.einsum("bqk,bkd->bqd", atten, in_v) @ params["wlast"].T
    h1 = _layer_norm_ref(h1 + q, params["ln1_g"].reshape(-1), params["ln1_b"].reshape(-1))
    hid = jnp.maximum(h1 @ params["w1"].T + params["b1"].reshape(-1), 0.0)
    h2 = hid @ params["w2"].T + params["b2"].reshape(-1)
    h = _layer_norm_ref(h2 + h1, params["ln2_g"].reshape(-1), params["ln2_b"].reshape(-1))
    return h, atten


def init_params(key, emb_dim):
    """Deterministic synthetic parameters matching TransformerBlock(emb_dim), PyTorch layout."""
    D, H = emb_dim, emb_dim * 2
    ks = jax.random.split(key, 8)

    def linear_w(k, out_f, in_f):
        bound = 1.0 / math.sqrt(in_f)
        return jax.random.uniform(k, (out_f, in_f), jnp.float32, -bound, bound)

    return {
        # MultiHeadAttention (num_head=1, bias=False)
        "wq": linear_w(ks[0], D, D), "wk": linear_w(ks[1], D, D),
        "wv": linear_w(ks[2], D, D), "wlast": linear_w(ks[3], D, D),
        # LayerNorm1 / LayerNorm2 (PyTorch default init)
        "ln1_g": jnp.ones((D,), jnp.float32), "ln1_b": jnp.zeros((D,), jnp.float32),
        "ln2_g": jnp.ones((D,), jnp.float32), "ln2_b": jnp.zeros((D,), jnp.float32),
        # FF: Linear(D, 2D) -> ReLU -> Linear(2D, D)
        "w1": linear_w(ks[4], H, D),
        "b1": jax.random.uniform(ks[5], (H,), jnp.float32,
                                 -1.0 / math.sqrt(D), 1.0 / math.sqrt(D)),
        "w2": linear_w(ks[6], D, H),
        "b2": jax.random.uniform(ks[7], (D,), jnp.float32,
                                 -1.0 / math.sqrt(H), 1.0 / math.sqrt(H)),
    }


if __name__ == "__main__":
    # Small lane-dense demo shape: N and D multiples of 128 so all stores are full vst and
    # MXU tiles are aligned (use 256-aligned production shapes on v6e/v7x).
    B, N, D = 2, 128, 128
    key = jax.random.PRNGKey(0)
    k_x, k_p = jax.random.split(key)

    q = jax.random.normal(k_x, (B, N, D), jnp.float32)
    params = init_params(k_p, D)
    prepared = prepare_params(params)   # hoisted weight layout/cast work: do once, reuse

    h, atten = transformer_block(q, prepared)
    jax.block_until_ready((h, atten))

    assert h.shape == (B, N, D) and atten.shape == (B, N, N)
    assert bool(jnp.all(jnp.isfinite(h))) and bool(jnp.all(jnp.isfinite(atten)))

    h_ref, atten_ref = transformer_block_reference(q, params)
    err_h = float(jnp.max(jnp.abs(h - h_ref)))
    err_a = float(jnp.max(jnp.abs(atten.astype(jnp.float32) - atten_ref)))
    assert err_h < 1e-1 and err_a < 2e-2, (err_h, err_a)

    print("KERNEL_OK")
</pallas_src>

<mosaic_0001>
module attributes {stable_mosaic.version = 11 : i64} {
  func.func @_probe(%arg0: i32, %arg1: memref<8x128xf32, #tpu.memory_space<vmem>>, %arg2: memref<8x128xf32, #tpu.memory_space<vmem>>) attributes {dimension_semantics = [#tpu.dimension_semantics<arbitrary>], iteration_bounds = array<i64: 1>, scalar_prefetch = 0 : i64, scratch_operands = 0 : i64, tpu.core_type = #tpu.core_type<tc>, window_params = [{pipeline_mode = #tpu.pipeline_mode<synchronous>, transform_indices = @transform_0, window_bounds = array<i64: 8, 128>}, {pipeline_mode = #tpu.pipeline_mode<synchronous>, transform_indices = @transform_1, window_bounds = array<i64: 8, 128>}]} {
    %c0 = arith.constant 0 : index
    %c0_0 = arith.constant 0 : index
    %0 = vector.load %arg1[%c0, %c0_0] : memref<8x128xf32, #tpu.memory_space<vmem>>, vector<8x128xf32>
    %c0_1 = arith.constant 0 : index
    %c0_2 = arith.constant 0 : index
    %1 = vector.load %arg2[%c0_1, %c0_2] : memref<8x128xf32, #tpu.memory_space<vmem>>, vector<8x128xf32>
    tpu.vector_store %arg2[%c0_1, %c0_2], %0 {strides = array<i32>} : memref<8x128xf32, #tpu.memory_space<vmem>>, vector<8x128xf32>,
    return
  }
  func.func @transform_0(%arg0: i32) -> (i32, i32) {
    %c0_i32 = arith.constant 0 : i32
    %c0_i32_0 = arith.constant 0 : i32
    %c0_i32_1 = arith.constant 0 : i32
    return %c0_i32, %c0_i32_0 : i32, i32
  }
  func.func @transform_1(%arg0: i32) -> (i32, i32) {
    %c0_i32 = arith.constant 0 : i32
    %c0_i32_0 = arith.constant 0 : i32
    %c0_i32_1 = arith.constant 0 : i32
    return %c0_i32, %c0_i32_0 : i32, i32
  }
}

module attributes {stable_mosaic.version = 11 : i64} {
  func.func @transformer_block_kernel(%arg0: i32, %arg1: i32, %arg2: memref<2x128x128xf32, #tpu.memory_space<vmem>>, %arg3: memref<128x384xbf16, #tpu.memory_space<vmem>>, %arg4: memref<128x128xbf16, #tpu.memory_space<vmem>>, %arg5: memref<1x128xf32, #tpu.memory_space<vmem>>, %arg6: memref<1x128xf32, #tpu.memory_space<vmem>>, %arg7: memref<128x256xbf16, #tpu.memory_space<vmem>>, %arg8: memref<1x256xf32, #tpu.memory_space<vmem>>, %arg9: memref<256x128xbf16, #tpu.memory_space<vmem>>, %arg10: memref<1x128xf32, #tpu.memory_space<vmem>>, %arg11: memref<1x128xf32, #tpu.memory_space<vmem>>, %arg12: memref<1x128xf32, #tpu.memory_space<vmem>>, %arg13: memref<2x128x128xf32, #tpu.memory_space<vmem>>, %arg14: memref<2x128x128xf32, #tpu.memory_space<vmem>>, %arg15: memref<3x2x128x128xbf16, #tpu.memory_space<vmem>>) attributes {dimension_semantics = [#tpu.dimension_semantics<parallel>, #tpu.dimension_semantics<arbitrary>], iteration_bounds = array<i64: 1, 1>, scalar_prefetch = 0 : i64, scratch_operands = 1 : i64, tpu.core_type = #tpu.core_type<tc>, window_params = [{transform_indices = @transform_0, window_bounds = array<i64: 2, 128, 128>}, {pipeline_mode = #tpu.pipeline_mode<synchronous>, transform_indices = @transform_1, window_bounds = array<i64: 128, 384>}, {pipeline_mode = #tpu.pipeline_mode<synchronous>, transform_indices = @transform_2, window_bounds = array<i64: 128, 128>}, {pipeline_mode = #tpu.pipeline_mode<synchronous>, transform_indices = @transform_3, window_bounds = array<i64: 1, 128>}, {pipeline_mode = #tpu.pipeline_mode<synchronous>, transform_indices = @transform_4, window_bounds = array<i64: 1, 128>}, {pipeline_mode = #tpu.pipeline_mode<synchronous>, transform_indices = @transform_5, window_bounds = array<i64: 128, 256>}, {pipeline_mode = #tpu.pipeline_mode<synchronous>, transform_indices = @transform_6, window_bounds = array<i64: 1, 256>}, {pipeline_mode = #tpu.pipeline_mode<synchronous>, transform_indices = @transform_7, window_bounds = array<i64: 256, 128>}, {pipeline_mode = #tpu.pipeline_mode<synchronous>, transform_indices = @transform_8, window_bounds = array<i64: 1, 128>}, {pipeline_mode = #tpu.pipeline_mode<synchronous>, transform_indices = @transform_9, window_bounds = array<i64: 1, 128>}, {pipeline_mode = #tpu.pipeline_mode<synchronous>, transform_indices = @transform_10, window_bounds = array<i64: 1, 128>}, {transform_indices = @transform_11, window_bounds = array<i64: 2, 128, 128>}, {transform_indices = @transform_12, window_bounds = array<i64: 2, 128, 128>}]} {
    %c0_i32 = arith.constant 0 : i32
    %0 = arith.cmpi eq, %arg1, %c0_i32 : i32
    %1 = arith.extui %0 : i1 to i32
    %c0_i32_0 = arith.constant 0 : i32
    %2 = arith.cmpi ne, %1, %c0_i32_0 : i32
    scf.if %2 {
      %c0_54 = arith.constant 0 : index
      %c0_55 = arith.constant 0 : index
      %c0_56 = arith.constant 0 : index
      %103 = vector.load %arg2[%c0_54, %c0_55, %c0_56] : memref<2x128x128xf32, #tpu.memory_space<vmem>>, vector<2x128x128xf32>
      %104 = vector.shape_cast %103 : vector<2x128x128xf32> to vector<256x128xf32>
      %105 = arith.truncf %104 : vector<256x128xf32> to vector<256x128xbf16>
      %c0_57 = arith.constant 0 : index
      %c0_58 = arith.constant 0 : index
      %106 = vector.load %arg3[%c0_57, %c0_58] : memref<128x384xbf16, #tpu.memory_space<vmem>>, vector<128x384xbf16>
      %cst_59 = arith.constant dense<0.000000e+00> : vector<256x384xf32>
      %107 = tpu.matmul %105, %106, %cst_59 {dimension_numbers = #tpu.dot_dimension_numbers<[1], [0], [0], [1], [0, 0, 1, 1], [], []>} : vector<256x128xbf16>, vector<128x384xbf16>, vector<256x384xf32> -> vector<256x384xf32>
      %108 = vector.extract_strided_slice %107 {offsets = [0, 0], sizes = [256, 128], strides = [1, 1]} : vector<256x384xf32> to vector<256x128xf32>
      %cst_60 = arith.constant 0.0883883461 : f32
      %109 = vector.broadcast %cst_60 : f32 to vector<256x128xf32>
      %110 = arith.mulf %108, %109 : vector<256x128xf32>
      %111 = arith.truncf %110 : vector<256x128xf32> to vector<256x128xbf16>
      %112 = vector.shape_cast %111 : vector<256x128xbf16> to vector<2x128x128xbf16>
      %c0_61 = arith.constant 0 : index
      %c0_62 = arith.constant 0 : index
      %c0_63 = arith.constant 0 : index
      %c0_64 = arith.constant 0 : index
      %113 = vector.load %arg15[%c0_61, %c0_62, %c0_63, %c0_64] : memref<3x2x128x128xbf16, #tpu.memory_space<vmem>>, vector<1x2x128x128xbf16>
      %114 = vector.shape_cast %113 : vector<1x2x128x128xbf16> to vector<2x128x128xbf16>
      %115 = vector.shape_cast %112 : vector<2x128x128xbf16> to vector<1x2x128x128xbf16>
      tpu.vector_store %arg15[%c0_61, %c0_62, %c0_63, %c0_64], %115 {strides = array<i32>} : memref<3x2x128x128xbf16, #tpu.memory_space<vmem>>, vector<1x2x128x128xbf16>,
      %116 = vector.extract_strided_slice %107 {offsets = [0, 128], sizes = [256, 128], strides = [1, 1]} : vector<256x384xf32> to vector<256x128xf32>
      %117 = arith.truncf %116 : vector<256x128xf32> to vector<256x128xbf16>
      %118 = vector.shape_cast %117 : vector<256x128xbf16> to vector<2x128x128xbf16>
      %c1_65 = arith.constant 1 : index
      %c0_66 = arith.constant 0 : index
      %c0_67 = arith.constant 0 : index
      %c0_68 = arith.constant 0 : index
      %119 = vector.load %arg15[%c1_65, %c0_66, %c0_67, %c0_68] : memref<3x2x128x128xbf16, #tpu.memory_space<vmem>>, vector<1x2x128x128xbf16>
      %120 = vector.shape_cast %119 : vector<1x2x128x128xbf16> to vector<2x128x128xbf16>
      %121 = vector.shape_cast %118 : vector<2x128x128xbf16> to vector<1x2x128x128xbf16>
      tpu.vector_store %arg15[%c1_65, %c0_66, %c0_67, %c0_68], %121 {strides = array<i32>} : memref<3x2x128x128xbf16, #tpu.memory_space<vmem>>, vector<1x2x128x128xbf16>,
      %122 = vector.extract_strided_slice %107 {offsets = [0, 256], sizes = [256, 128], strides = [1, 1]} : vector<256x384xf32> to vector<256x128xf32>
      %123 = arith.truncf %122 : vector<256x128xf32> to vector<256x128xbf16>
      %124 = vector.shape_cast %123 : vector<256x128xbf16> to vector<2x128x128xbf16>
      %c2_69 = arith.constant 2 : index
      %c0_70 = arith.constant 0 : index
      %c0_71 = arith.constant 0 : index
      %c0_72 = arith.constant 0 : index
      %125 = vector.load %arg15[%c2_69, %c0_70, %c0_71, %c0_72] : memref<3x2x128x128xbf16, #tpu.memory_space<vmem>>, vector<1x2x128x128xbf16>
      %126 = vector.shape_cast %125 : vector<1x2x128x128xbf16> to vector<2x128x128xbf16>
      %127 = vector.shape_cast %124 : vector<2x128x128xbf16> to vector<1x2x128x128xbf16>
      tpu.vector_store %arg15[%c2_69, %c0_70, %c0_71, %c0_72], %127 {strides = array<i32>} : memref<3x2x128x128xbf16, #tpu.memory_space<vmem>>, vector<1x2x128x128xbf16>,
    } else {
    }
    %c128_i32 = arith.constant 128 : i32
    %3 = arith.muli %arg1, %c128_i32 : i32
    %4 = tpu.assume_multiple %3, 128 : i32
    %c0 = arith.constant 0 : index
    %c0_1 = arith.constant 0 : index
    %5 = arith.index_cast %4 : i32 to index
    %c0_2 = arith.constant 0 : index
    %6 = vector.load %arg15[%c0, %c0_1, %5, %c0_2] : memref<3x2x128x128xbf16, #tpu.memory_space<vmem>>, vector<1x2x128x128xbf16>
    %7 = vector.shape_cast %6 : vector<1x2x128x128xbf16> to vector<2x128x128xbf16>
    %c1 = arith.constant 1 : index
    %c0_3 = arith.constant 0 : index
    %c0_4 = arith.constant 0 : index
    %c0_5 = arith.constant 0 : index
    %8 = vector.load %arg15[%c1, %c0_3, %c0_4, %c0_5] : memref<3x2x128x128xbf16, #tpu.memory_space<vmem>>, vector<1x2x128x128xbf16>
    %9 = vector.shape_cast %8 : vector<1x2x128x128xbf16> to vector<2x128x128xbf16>
    %c2 = arith.constant 2 : index
    %c0_6 = arith.constant 0 : index
    %c0_7 = arith.constant 0 : index
    %c0_8 = arith.constant 0 : index
    %10 = vector.load %arg15[%c2, %c0_6, %c0_7, %c0_8] : memref<3x2x128x128xbf16, #tpu.memory_space<vmem>>, vector<1x2x128x128xbf16>
    %11 = vector.shape_cast %10 : vector<1x2x128x128xbf16> to vector<2x128x128xbf16>
    "tpu.trace_start"() <{level = 10 : i32, message = "bqd,bkd->bqk"}> : () -> ()
    %cst = arith.constant dense<0.000000e+00> : vector<2x128x128xf32>
    %12 = tpu.matmul %7, %9, %cst {dimension_numbers = #tpu.dot_dimension_numbers<[2], [2], [1], [1], [0, 0, 0, 1, 1, 1], [0], [0]>} : vector<2x128x128xbf16>, vector<2x128x128xbf16>, vector<2x128x128xf32> -> vector<2x128x128xf32>
    %cst_9 = arith.constant 0.000000e+00 : f32
    "tpu.trace_stop"() : () -> ()
    %13 = vector.broadcast %cst_9 : f32 to vector<2x128x128xf32>
    %14 = arith.cmpf one, %12, %13 : vector<2x128x128xf32>
    %cst_10 = arith.constant -9.000000e+15 : f32
    %15 = vector.broadcast %cst_10 : f32 to vector<2x128x128xf32>
    %16 = arith.select %14, %12, %15 : vector<2x128x128xi1>, vector<2x128x128xf32>
    %cst_11 = arith.constant dense<0xFF800000> : vector<2x128xf32>
    %17 = vector.multi_reduction <maximumf>, %16, %cst_11 [2] : vector<2x128x128xf32> to vector<2x128xf32>
    %18 = vector.shape_cast %17 : vector<2x128xf32> to vector<2x128x1xf32>
    %19 = vector.broadcast %18 : vector<2x128x1xf32> to vector<2x128x128xf32>
    %20 = arith.subf %16, %19 : vector<2x128x128xf32>
    %21 = math.exp %20 : vector<2x128x128xf32>
    %cst_12 = arith.constant dense<0.000000e+00> : vector<2x128xf32>
    %22 = vector.multi_reduction <add>, %21, %cst_12 [2] : vector<2x128x128xf32> to vector<2x128xf32>
    %23 = vector.shape_cast %22 : vector<2x128xf32> to vector<2x128x1xf32>
    %24 = tpu.reciprocal %23 {approx = true} : vector<2x128x1xf32> -> vector<2x128x1xf32>
    %25 = vector.broadcast %24 : vector<2x128x1xf32> to vector<2x128x128xf32>
    %26 = arith.mulf %21, %25 : vector<2x128x128xf32>
    %27 = arith.truncf %26 : vector<2x128x128xf32> to vector<2x128x128xbf16>
    "tpu.trace_start"() <{level = 10 : i32, message = "bqk,bkd->bqd"}> : () -> ()
    %cst_13 = arith.constant dense<0.000000e+00> : vector<2x128x128xf32>
    %28 = tpu.matmul %27, %11, %cst_13 {dimension_numbers = #tpu.dot_dimension_numbers<[2], [1], [1], [2], [0, 0, 0, 1, 1, 2], [0], [0]>} : vector<2x128x128xbf16>, vector<2x128x128xbf16>, vector<2x128x128xf32> -> vector<2x128x128xf32>
    "tpu.trace_stop"() : () -> ()
    %29 = vector.shape_cast %28 : vector<2x128x128xf32> to vector<256x128xf32>
    %30 = arith.truncf %29 : vector<256x128xf32> to vector<256x128xbf16>
    %c0_14 = arith.constant 0 : index
    %c0_15 = arith.constant 0 : index
    %31 = vector.load %arg4[%c0_14, %c0_15] : memref<128x128xbf16, #tpu.memory_space<vmem>>, vector<128x128xbf16>
    %cst_16 = arith.constant dense<0.000000e+00> : vector<256x128xf32>
    %32 = tpu.matmul %30, %31, %cst_16 {dimension_numbers = #tpu.dot_dimension_numbers<[1], [0], [0], [1], [0, 0, 1, 1], [], []>} : vector<256x128xbf16>, vector<128x128xbf16>, vector<256x128xf32> -> vector<256x128xf32>
    %c0_17 = arith.constant 0 : index
    %33 = arith.index_cast %4 : i32 to index
    %c0_18 = arith.constant 0 : index
    %34 = vector.load %arg2[%c0_17, %33, %c0_18] : memref<2x128x128xf32, #tpu.memory_space<vmem>>, vector<2x128x128xf32>
    %35 = vector.shape_cast %34 : vector<2x128x128xf32> to vector<256x128xf32>
    %36 = arith.addf %32, %35 : vector<256x128xf32>
    %c0_19 = arith.constant 0 : index
    %c0_20 = arith.constant 0 : index
    %37 = vector.load %arg5[%c0_19, %c0_20] : memref<1x128xf32, #tpu.memory_space<vmem>>, vector<1x128xf32>
    %c0_21 = arith.constant 0 : index
    %c0_22 = arith.constant 0 : index
    %38 = vector.load %arg6[%c0_21, %c0_22] : memref<1x128xf32, #tpu.memory_space<vmem>>, vector<1x128xf32>
    %cst_23 = arith.constant dense<0.000000e+00> : vector<256xf32>
    %39 = vector.multi_reduction <add>, %36, %cst_23 [1] : vector<256x128xf32> to vector<256xf32>
    %40 = vector.shape_cast %39 : vector<256xf32> to vector<256x1xf32>
    %cst_24 = arith.constant 1.280000e+02 : f32
    %41 = vector.broadcast %cst_24 : f32 to vector<256x1xf32>
    %42 = arith.divf %40, %41 : vector<256x1xf32>
    %43 = vector.broadcast %42 : vector<256x1xf32> to vector<256x128xf32>
    %44 = arith.subf %36, %43 : vector<256x128xf32>
    %45 = arith.mulf %44, %44 : vector<256x128xf32>
    %cst_25 = arith.constant dense<0.000000e+00> : vector<256xf32>
    %46 = vector.multi_reduction <add>, %45, %cst_25 [1] : vector<256x128xf32> to vector<256xf32>
    %47 = vector.shape_cast %46 : vector<256xf32> to vector<256x1xf32>
    %cst_26 = arith.constant 1.280000e+02 : f32
    %48 = vector.broadcast %cst_26 : f32 to vector<256x1xf32>
    %49 = arith.divf %47, %48 : vector<256x1xf32>
    %50 = vector.broadcast %42 : vector<256x1xf32> to vector<256x128xf32>
    %51 = arith.subf %36, %50 : vector<256x128xf32>
    %cst_27 = arith.constant 9.99999974E-6 : f32
    %52 = vector.broadcast %cst_27 : f32 to vector<256x1xf32>
    %53 = arith.addf %49, %52 : vector<256x1xf32>
    %54 = math.rsqrt %53 : vector<256x1xf32>
    %55 = vector.broadcast %54 : vector<256x1xf32> to vector<256x128xf32>
    %56 = arith.mulf %51, %55 : vector<256x128xf32>
    %57 = vector.broadcast %37 : vector<1x128xf32> to vector<256x128xf32>
    %58 = arith.mulf %56, %57 : vector<256x128xf32>
    %59 = vector.broadcast %38 : vector<1x128xf32> to vector<256x128xf32>
    %60 = arith.addf %58, %59 : vector<256x128xf32>
    %61 = arith.truncf %60 : vector<256x128xf32> to vector<256x128xbf16>
    %c0_28 = arith.constant 0 : index
    %c0_29 = arith.constant 0 : index
    %62 = vector.load %arg7[%c0_28, %c0_29] : memref<128x256xbf16, #tpu.memory_space<vmem>>, vector<128x256xbf16>
    %cst_30 = arith.constant dense<0.000000e+00> : vector<256x256xf32>
    %63 = tpu.matmul %61, %62, %cst_30 {dimension_numbers = #tpu.dot_dimension_numbers<[1], [0], [0], [1], [0, 0, 1, 1], [], []>} : vector<256x128xbf16>, vector<128x256xbf16>, vector<256x256xf32> -> vector<256x256xf32>
    %c0_31 = arith.constant 0 : index
    %c0_32 = arith.constant 0 : index
    %64 = vector.load %arg8[%c0_31, %c0_32] : memref<1x256xf32, #tpu.memory_space<vmem>>, vector<1x256xf32>
    %65 = vector.broadcast %64 : vector<1x256xf32> to vector<256x256xf32>
    %66 = arith.addf %63, %65 : vector<256x256xf32>
    %cst_33 = arith.constant 0.000000e+00 : f32
    %67 = vector.broadcast %cst_33 : f32 to vector<256x256xf32>
    %68 = arith.maximumf %66, %67 : vector<256x256xf32>
    %69 = arith.truncf %68 : vector<256x256xf32> to vector<256x256xbf16>
    %c0_34 = arith.constant 0 : index
    %c0_35 = arith.constant 0 : index
    %70 = vector.load %arg9[%c0_34, %c0_35] : memref<256x128xbf16, #tpu.memory_space<vmem>>, vector<256x128xbf16>
    %cst_36 = arith.constant dense<0.000000e+00> : vector<256x128xf32>
    %71 = tpu.matmul %69, %70, %cst_36 {dimension_numbers = #tpu.dot_dimension_numbers<[1], [0], [0], [1], [0, 0, 1, 1], [], []>} : vector<256x256xbf16>, vector<256x128xbf16>, vector<256x128xf32> -> vector<256x128xf32>
    %c0_37 = arith.constant 0 : index
    %c0_38 = arith.constant 0 : index
    %72 = vector.load %arg10[%c0_37, %c0_38] : memref<1x128xf32, #tpu.memory_space<vmem>>, vector<1x128xf32>
    %73 = vector.broadcast %72 : vector<1x128xf32> to vector<256x128xf32>
    %74 = arith.addf %71, %73 : vector<256x128xf32>
    %75 = arith.addf %74, %60 : vector<256x128xf32>
    %c0_39 = arith.constant 0 : index
    %c0_40 = arith.constant 0 : index
    %76 = vector.load %arg11[%c0_39, %c0_40] : memref<1x128xf32, #tpu.memory_space<vmem>>, vector<1x128xf32>
    %c0_41 = arith.constant 0 : index
    %c0_42 = arith.constant 0 : index
    %77 = vector.load %arg12[%c0_41, %c0_42] : memref<1x128xf32, #tpu.memory_space<vmem>>, vector<1x128xf32>
    %cst_43 = arith.constant dense<0.000000e+00> : vector<256xf32>
    %78 = vector.multi_reduction <add>, %75, %cst_43 [1] : vector<256x128xf32> to vector<256xf32>
    %79 = vector.shape_cast %78 : vector<256xf32> to vector<256x1xf32>
    %cst_44 = arith.constant 1.280000e+02 : f32
    %80 = vector.broadcast %cst_44 : f32 to vector<256x1xf32>
    %81 = arith.divf %79, %80 : vector<256x1xf32>
    %82 = vector.broadcast %81 : vector<256x1xf32> to vector<256x128xf32>
    %83 = arith.subf %75, %82 : vector<256x128xf32>
    %84 = arith.mulf %83, %83 : vector<256x128xf32>
    %cst_45 = arith.constant dense<0.000000e+00> : vector<256xf32>
    %85 = vector.multi_reduction <add>, %84, %cst_45 [1] : vector<256x128xf32> to vector<256xf32>
    %86 = vector.shape_cast %85 : vector<256xf32> to vector<256x1xf32>
    %cst_46 = arith.constant 1.280000e+02 : f32
    %87 = vector.broadcast %cst_46 : f32 to vector<256x1xf32>
    %88 = arith.divf %86, %87 : vector<256x1xf32>
    %89 = vector.broadcast %81 : vector<256x1xf32> to vector<256x128xf32>
    %90 = arith.subf %75, %89 : vector<256x128xf32>
    %cst_47 = arith.constant 9.99999974E-6 : f32
    %91 = vector.broadcast %cst_47 : f32 to vector<256x1xf32>
    %92 = arith.addf %88, %91 : vector<256x1xf32>
    %93 = math.rsqrt %92 : vector<256x1xf32>
    %94 = vector.broadcast %93 : vector<256x1xf32> to vector<256x128xf32>
    %95 = arith.mulf %90, %94 : vector<256x128xf32>
    %96 = vector.broadcast %76 : vector<1x128xf32> to vector<256x128xf32>
    %97 = arith.mulf %95, %96 : vector<256x128xf32>
    %98 = vector.broadcast %77 : vector<1x128xf32> to vector<256x128xf32>
    %99 = arith.addf %97, %98 : vector<256x128xf32>
    %100 = vector.shape_cast %99 : vector<256x128xf32> to vector<2x128x128xf32>
    %c0_48 = arith.constant 0 : index
    %c0_49 = arith.constant 0 : index
    %c0_50 = arith.constant 0 : index
    %101 = vector.load %arg13[%c0_48, %c0_49, %c0_50] : memref<2x128x128xf32, #tpu.memory_space<vmem>>, vector<2x128x128xf32>
    tpu.vector_store %arg13[%c0_48, %c0_49, %c0_50], %100 {strides = array<i32>} : memref<2x128x128xf32, #tpu.memory_space<vmem>>, vector<2x128x128xf32>,
    %c0_51 = arith.constant 0 : index
    %c0_52 = arith.constant 0 : index
    %c0_53 = arith.constant 0 : index
    %102 = vector.load %arg14[%c0_51, %c0_52, %c0_53] : memref<2x128x128xf32, #tpu.memory_space<vmem>>, vector<2x128x128xf32>
    tpu.vector_store %arg14[%c0_51, %c0_52, %c0_53], %26 {strides = array<i32>} : memref<2x128x128xf32, #tpu.memory_space<vmem>>, vector<2x128x128xf32>,
    return
  }
  func.func @transform_0(%arg0: i32, %arg1: i32) -> (i32, i32, i32) {
    %c0_i32 = arith.constant 0 : i32
    %c0_i32_0 = arith.constant 0 : i32
    %c0_i32_1 = arith.constant 0 : i32
    return %arg0, %c0_i32, %c0_i32_0 : i32, i32, i32
  }
  func.func @transform_1(%arg0: i32, %arg1: i32) -> (i32, i32) {
    %c0_i32 = arith.constant 0 : i32
    %c0_i32_0 = arith.constant 0 : i32
    %c0_i32_1 = arith.constant 0 : i32
    return %c0_i32, %c0_i32_0 : i32, i32
  }
  func.func @transform_2(%arg0: i32, %arg1: i32) -> (i32, i32) {
    %c0_i32 = arith.constant 0 : i32
    %c0_i32_0 = arith.constant 0 : i32
    %c0_i32_1 = arith.constant 0 : i32
    return %c0_i32, %c0_i32_0 : i32, i32
  }
  func.func @transform_3(%arg0: i32, %arg1: i32) -> (i32, i32) {
    %c0_i32 = arith.constant 0 : i32
    %c0_i32_0 = arith.constant 0 : i32
    %c0_i32_1 = arith.constant 0 : i32
    return %c0_i32, %c0_i32_0 : i32, i32
  }
  func.func @transform_4(%arg0: i32, %arg1: i32) -> (i32, i32) {
    %c0_i32 = arith.constant 0 : i32
    %c0_i32_0 = arith.constant 0 : i32
    %c0_i32_1 = arith.constant 0 : i32
    return %c0_i32, %c0_i32_0 : i32, i32
  }
  func.func @transform_5(%arg0: i32, %arg1: i32) -> (i32, i32) {
    %c0_i32 = arith.constant 0 : i32
    %c0_i32_0 = arith.constant 0 : i32
    %c0_i32_1 = arith.constant 0 : i32
    return %c0_i32, %c0_i32_0 : i32, i32
  }
  func.func @transform_6(%arg0: i32, %arg1: i32) -> (i32, i32) {
    %c0_i32 = arith.constant 0 : i32
    %c0_i32_0 = arith.constant 0 : i32
    %c0_i32_1 = arith.constant 0 : i32
    return %c0_i32, %c0_i32_0 : i32, i32
  }
  func.func @transform_7(%arg0: i32, %arg1: i32) -> (i32, i32) {
    %c0_i32 = arith.constant 0 : i32
    %c0_i32_0 = arith.constant 0 : i32
    %c0_i32_1 = arith.constant 0 : i32
    return %c0_i32, %c0_i32_0 : i32, i32
  }
  func.func @transform_8(%arg0: i32, %arg1: i32) -> (i32, i32) {
    %c0_i32 = arith.constant 0 : i32
    %c0_i32_0 = arith.constant 0 : i32
    %c0_i32_1 = arith.constant 0 : i32
    return %c0_i32, %c0_i32_0 : i32, i32
  }
  func.func @transform_9(%arg0: i32, %arg1: i32) -> (i32, i32) {
    %c0_i32 = arith.constant 0 : i32
    %c0_i32_0 = arith.constant 0 : i32
    %c0_i32_1 = arith.constant 0 : i32
    return %c0_i32, %c0_i32_0 : i32, i32
  }
  func.func @transform_10(%arg0: i32, %arg1: i32) -> (i32, i32) {
    %c0_i32 = arith.constant 0 : i32
    %c0_i32_0 = arith.constant 0 : i32
    %c0_i32_1 = arith.constant 0 : i32
    return %c0_i32, %c0_i32_0 : i32, i32
  }
  func.func @transform_11(%arg0: i32, %arg1: i32) -> (i32, i32, i32) {
    %c0_i32 = arith.constant 0 : i32
    %c0_i32_0 = arith.constant 0 : i32
    return %arg0, %arg1, %c0_i32 : i32, i32, i32
  }
  func.func @transform_12(%arg0: i32, %arg1: i32) -> (i32, i32, i32) {
    %c0_i32 = arith.constant 0 : i32
    %c0_i32_0 = arith.constant 0 : i32
    return %arg0, %arg1, %c0_i32 : i32, i32, i32
  }
}

</mosaic_0001>

<bundles_post_ra>
// kernel: tpu_custom_call.1
= control target key start
LH: loop header
LB: loop body
LE: loop exit
PB: predicated region body
PF: predicated region fallthrough
CT: control target
= control target key end

     0   :  { %6 = vsyncpa [#allocation3], 0  ;;  %s124_s0 = inlined_call_operand.hbm [shape: f32[8,128], index: 0, kind: input, shape index: {}]   ;;  %s125_s1 = inlined_call_operand.hbm [shape: f32[8,128], index: 1, kind: output, shape index: {}]  }
   0x1   :  { %7 = vsyncpa [#allocation4], 0  ;;  %s88_s6 = smov [#allocation2]   ;;  %s40_s10 = scalar_lea.hbm %s124_s0, 128 }
   0x2   :  { %s14_s7 = sshll.u32 %s88_s6, 4  ;;  %p41_p0 = scmp.ne.s32.totalorder %s124_s0, %s40_s10  ;;  %s15_s7 = int_to_ptr.vmem [resolvable:$true] %s14_s7 }
   0x3   :  { %p44_p1 = scmp.lt.u32.totalorder %s40_s10, %s124_s0 }
   0x5   :  { %p46_p2 = pnand %p44_p1, %p41_p0 }
   0x7   :  { %49 = shalt.err (!%p46_p2)
}
   0x8   :  { %s50_s15 = scalar_lea.vmem %s15_s7, 128  ;;  %p55_p4 = scmp.lt.s32.totalorder %s15_s7, %s15_s7 }
   0x9   :  { %p51_p3 = scmp.ne.s32.totalorder %s15_s7, %s50_s15  ;;  %p56_p5 = scmp.lt.s32.totalorder %s50_s15, %s50_s15 }
   0xb   :  { %p57_p6 = por %p56_p5, %p55_p4 }
   0xd   :  { %p58_p7 = pnand %p57_p6, %p51_p3 }
   0xf   :  { %61 = shalt.err (!%p58_p7)
}
  0x10   :  { %17 = dma.hbm_to_vmem [thread:$0]  %s124_s0, 128, %s15_s7, [#allocation3]  }
  0x11   :  { %84 = dma.done.wait [#allocation3], 128  }
  0x12   :  { %85 = vsyncadd [#allocation3], 4294967168  ;;  %s89_s18 = smov [#allocation5]   ;;  %v21_v0 = vld [vmem:[#allocation2] sm:$0xff] }
  0x13   :  { %s29_s19 = sshll.u32 %s89_s18, 4  ;;  %22 = vst [vmem:[#allocation5] sm:$0xff] %v21_v0  ;;  %s30_s19 = int_to_ptr.vmem [resolvable:$true] %s29_s19 }
  0x14   :  { %s62_s20 = scalar_lea.vmem %s30_s19, 128  ;;  %p67_p9 = scmp.lt.s32.totalorder %s30_s19, %s30_s19 }
  0x15   :  { %p63_p8 = scmp.ne.s32.totalorder %s30_s19, %s62_s20  ;;  %p68_p10 = scmp.lt.s32.totalorder %s62_s20, %s62_s20 }
  0x17   :  { %p69_p11 = por %p68_p10, %p67_p9 }
  0x19   :  { %p70_p12 = pnand %p69_p11, %p63_p8 }
  0x1b   :  { %73 = shalt.err (!%p70_p12)
}
  0x1c   :  { %s74_s23 = scalar_lea.hbm %s125_s1, 128 }
  0x1d   :  { %p75_p13 = scmp.ne.s32.totalorder %s125_s1, %s74_s23  ;;  %p78_p0 = scmp.lt.u32.totalorder %s74_s23, %s125_s1 }
  0x1f   :  { %p80_p1 = pnand %p78_p0, %p75_p13 }
  0x21   :  { %83 = shalt.err (!%p80_p1)
}
  0x22   :  { %32 = dma.vmem_to_hbm [thread:$0]  %s30_s19, 128, %s125_s1, [#allocation4]  }
  0x23   :  { %86 = dma.done.wait [#allocation4], 128  }
  0x24   :  { %87 = vsyncadd [#allocation4], 4294967168 }
  0x25   :  { %36 = vsyncpa [#allocation3], 1 }
  0x26   :  { %37 = vsyncpa [#allocation4], 1 }

// kernel: tpu_custom_call.1
= control target key start
LH: loop header
LB: loop body
LE: loop exit
PB: predicated region body
PF: predicated region fallthrough
CT: control target
= control target key end

     0   :  { %18 = vsyncpa [#allocation4], 0  ;;  %s6282_s0 = inlined_call_operand.hbm [shape: f32[2,128,128], index: 0, kind: input, shape index: {}]   ;;  %s6283_s1 = inlined_call_operand.hbm [shape: bf16[128,384], index: 1, kind: input, shape index: {}]   ;;  %s6284_s2 = inlined_call_operand.hbm [shape: bf16[128,128], index: 2, kind: input, shape index: {}]   ;;  %s6285_s3 = inlined_call_operand.vmem [shape: f32[1,128], index: 3, kind: input, shape index: {}]   ;;  %s6286_s4 = inlined_call_operand.vmem [shape: f32[1,128], index: 4, kind: input, shape index: {}]   ;;  %s6287_s5 = inlined_call_operand.hbm [shape: bf16[128,256], index: 5, kind: input, shape index: {}]   ;;  %s6288_s6 = inlined_call_operand.vmem [shape: f32[1,256], index: 6, kind: input, shape index: {}]   ;;  %s6289_s7 = inlined_call_operand.hbm [shape: bf16[256,128], index: 7, kind: input, shape index: {}]   ;;  %s6290_s8 = inlined_call_operand.vmem [shape: f32[1,128], index: 8, kind: input, shape index: {}]   ;;  %s6291_s9 = inlined_call_operand.vmem [shape: f32[1,128], index: 9, kind: input, shape index: {}]   ;;  %s6292_s10 = inlined_call_operand.vmem [shape: f32[1,128], index: 10, kind: input, shape index: {}]   ;;  %s6293_s11 = inlined_call_operand.hbm [shape: f32[2,128,128], index: 11, kind: output, shape index: {0}]   ;;  %s6294_s12 = inlined_call_operand.hbm [shape: f32[2,128,128], index: 12, kind: output, shape index: {1}]  }
   0x1   :  { %19 = vsyncpa [#allocation7], 0 }
   0x2   :  { %20 = vsyncpa [#allocation10], 0 }
   0x3   :  { %21 = vsyncpa [#allocation5], 0 }
   0x4   :  { %22 = vsyncpa [#allocation14], 0  ;;  %s4642_s21 = smov [#allocation6]   ;;  %s4478_s25 = scalar_lea.hbm %s6283_s1, 3072 }
   0x5   :  { %s40_s22 = sshll.u32 %s4642_s21, 4  ;;  %p4479_p0 = scmp.ne.s32.totalorder %s6283_s1, %s4478_s25  ;;  %s41_s22 = int_to_ptr.vmem [resolvable:$true] %s40_s22 }
   0x6   :  { %p4482_p1 = scmp.lt.u32.totalorder %s4478_s25, %s6283_s1 }
   0x8   :  { %p4484_p2 = pnand %p4482_p1, %p4479_p0 }
   0xa   :  { %4487 = shalt.err (!%p4484_p2)
}
   0xb   :  { %s4488_s30 = scalar_lea.vmem %s41_s22, 3072  ;;  %p4493_p4 = scmp.lt.s32.totalorder %s41_s22, %s41_s22 }
   0xc   :  { %p4489_p3 = scmp.ne.s32.totalorder %s41_s22, %s4488_s30  ;;  %p4494_p5 = scmp.lt.s32.totalorder %s4488_s30, %s4488_s30 }
   0xe   :  { %p4495_p6 = por %p4494_p5, %p4493_p4 }
  0x10   :  { %p4496_p7 = pnand %p4495_p6, %p4489_p3 }
  0x12   :  { %4499 = shalt.err (!%p4496_p7)
}
  0x13   :  { %s4643_s13 = smov 192   ;;  %s4644_s14 = smov 12  }
  0x14   :  { %46 = dma.hbm_to_vmem [thread:$0]  %s6283_s1, 3072, %s41_s22, [#allocation7], %s4643_s13, %s4643_s13, %s4644_s14  }
  0x15   :  { %s4645_s17 = smov [#allocation9]   ;;  %s4646_s19 = smov [#allocation3]  }
  0x16   :  { %s68_s18 = sshll.u32 %s4645_s17, 4  ;;  %s28_s20 = sshll.u32 %s4646_s19, 4  ;;  %s69_s18 = int_to_ptr.vmem [resolvable:$true] %s68_s18  ;;  %s29_s20 = int_to_ptr.vmem [resolvable:$true] %s28_s20 }
  0x17   :  { %s4500_s24 = scalar_lea.hbm %s6287_s5, 2048 }
  0x18   :  { %p4501_p8 = scmp.ne.s32.totalorder %s6287_s5, %s4500_s24  ;;  %p4504_p9 = scmp.lt.u32.totalorder %s4500_s24, %s6287_s5 }
  0x1a   :  { %p4506_p10 = pnand %p4504_p9, %p4501_p8 }
  0x1c   :  { %4509 = shalt.err (!%p4506_p10)
}
  0x1d   :  { %s4510_s1 = scalar_lea.vmem %s69_s18, 2048  ;;  %p4515_p12 = scmp.lt.s32.totalorder %s69_s18, %s69_s18 }
  0x1e   :  { %p4511_p11 = scmp.ne.s32.totalorder %s69_s18, %s4510_s1  ;;  %p4516_p13 = scmp.lt.s32.totalorder %s4510_s1, %s4510_s1 }
  0x20   :  { %p4517_p0 = por %p4516_p13, %p4515_p12 }
  0x22   :  { %p4518_p1 = pnand %p4517_p0, %p4511_p11 }
  0x24   :  { %4521 = shalt.err (!%p4518_p1)
}
  0x25   :  { %s4647_s22 = smov 128   ;;  %s4648_s29 = smov 8  }
  0x26   :  { %74 = dma.hbm_to_vmem [thread:$0]  %s6287_s5, 2048, %s69_s18, [#allocation10], %s4647_s22, %s4647_s22, %s4648_s29  }
  0x27   :  { %s4522_s16 = scalar_lea.hbm %s6282_s0, 4096 }
  0x28   :  { %p4523_p2 = scmp.ne.s32.totalorder %s6282_s0, %s4522_s16  ;;  %p4526_p3 = scmp.lt.u32.totalorder %s4522_s16, %s6282_s0 }
  0x2a   :  { %p4528_p4 = pnand %p4526_p3, %p4523_p2 }
  0x2c   :  { %4531 = shalt.err (!%p4528_p4)
}
  0x2d   :  { %s4532_s24 = scalar_lea.vmem %s29_s20, 4096  ;;  %p4537_p6 = scmp.lt.s32.totalorder %s29_s20, %s29_s20 }
  0x2e   :  { %p4533_p5 = scmp.ne.s32.totalorder %s29_s20, %s4532_s24  ;;  %p4538_p7 = scmp.lt.s32.totalorder %s4532_s24, %s4532_s24 }
  0x30   :  { %p4539_p8 = por %p4538_p7, %p4537_p6 }
  0x32   :  { %p4540_p9 = pnand %p4539_p8, %p4533_p5 }
  0x34   :  { %4543 = shalt.err (!%p4540_p9)
}
  0x35   :  { %34 = dma.hbm_to_vmem [thread:$0]  %s6282_s0, 4096, %s29_s20, [#allocation4], %s4647_s22, %s4647_s22, %s4648_s29  }
  0x36   :  { %s4649_s25 = smov [#allocation8]   ;;  %s4544_s1 = scalar_lea.hbm %s6284_s2, 1024 }
  0x37   :  { %s52_s26 = sshll.u32 %s4649_s25, 4  ;;  %p4545_p10 = scmp.ne.s32.totalorder %s6284_s2, %s4544_s1  ;;  %s53_s26 = int_to_ptr.vmem [resolvable:$true] %s52_s26 }
  0x38   :  { %p4548_p11 = scmp.lt.u32.totalorder %s4544_s1, %s6284_s2 }
  0x3a   :  { %p4550_p12 = pnand %p4548_p11, %p4545_p10 }
  0x3c   :  { %4553 = shalt.err (!%p4550_p12)
}
  0x3d   :  { %s4554_s16 = scalar_lea.vmem %s53_s26, 1024  ;;  %p4559_p0 = scmp.lt.s32.totalorder %s53_s26, %s53_s26 }
  0x3e   :  { %p4555_p13 = scmp.ne.s32.totalorder %s53_s26, %s4554_s16  ;;  %p4560_p1 = scmp.lt.s32.totalorder %s4554_s16, %s4554_s16 }
  0x40   :  { %p4561_p2 = por %p4560_p1, %p4559_p0 }
  0x42   :  { %p4562_p3 = pnand %p4561_p2, %p4555_p13 }
  0x44   :  { %4565 = shalt.err (!%p4562_p3)
}
  0x45   :  { %s4650_s0 = smov 64   ;;  %s4651_s20 = smov 4  }
  0x46   :  { %58 = dma.hbm_to_vmem [thread:$0]  %s6284_s2, 1024, %s53_s26, [#allocation7], %s4650_s0, %s4650_s0, %s4651_s20  }
  0x47   :  { %s4652_s21 = smov [#allocation11]   ;;  %s4566_s18 = scalar_lea.hbm %s6289_s7, 2048 }
  0x48   :  { %s82_s23 = sshll.u32 %s4652_s21, 4  ;;  %p4567_p4 = scmp.ne.s32.totalorder %s6289_s7, %s4566_s18  ;;  %s83_s23 = int_to_ptr.vmem [resolvable:$true] %s82_s23 }
  0x49   :  { %p4570_p5 = scmp.lt.u32.totalorder %s4566_s18, %s6289_s7 }
  0x4b   :  { %p4572_p6 = pnand %p4570_p5, %p4567_p4 }
  0x4d   :  { %4575 = shalt.err (!%p4572_p6)
}
  0x4e   :  { %s4576_s30 = scalar_lea.vmem %s83_s23, 2048  ;;  %p4581_p8 = scmp.lt.s32.totalorder %s83_s23, %s83_s23 }
  0x4f   :  { %p4577_p7 = scmp.ne.s32.totalorder %s83_s23, %s4576_s30  ;;  %p4582_p9 = scmp.lt.s32.totalorder %s4576_s30, %s4576_s30 }
  0x51   :  { %p4583_p10 = por %p4582_p9, %p4581_p8 }
  0x53   :  { %p4584_p11 = pnand %p4583_p10, %p4577_p7 }
  0x55   :  { %4587 = shalt.err (!%p4584_p11)
}
  0x56   :  { %88 = dma.hbm_to_vmem [thread:$0]  %s6289_s7, 2048, %s83_s23, [#allocation10], %s4650_s0, %s4650_s0, %s4651_s20  }
  0x57   :  { %4632 = dma.done.wait [#allocation4], 4096  }
  0x58   :  { %4633 = vsyncadd [#allocation4], 4294963200 }
  0x59   :  { %4634 = dma.done.wait [#allocation7], 4096  }
  0x5a   :  { %4635 = vsyncadd [#allocation7], 4294963200 }
  0x5b   :  { %4636 = dma.done.wait [#allocation10], 4096  }
  0x5c   :  { %4637 = vsyncadd [#allocation10], 4294963200  ;;  %v4653_v0 = vmov 0   ;;  %v4142_v1 = vld [vmem:[#allocation6 + $0x4] ss:$12 sps:$4 sm:$0xff]   ;;  %v116_v18 = vld [vmem:[#allocation3 + $0x8] sm:$0xff] }
  0x5d   :  { %355 = vmatprep.mubr.bf16.mxu0 %v4653_v0  ;;  %475 = vmatprep.mubr.bf16.mxu1 %v4653_v0  ;;  %v4144_v2 = vld [vmem:[#allocation6] ss:$12 sps:$4 sm:$0xff]   ;;  %v4145_v3 = vld [vmem:[#allocation6 + $0x1c] ss:$12 sps:$4 sm:$0xff]   ;;  %v4147_v4 = vld [vmem:[#allocation6 + $0x18] ss:$12 sps:$4 sm:$0xff]  }
  0x5e   :  { %323 = vmatprep.subr.bf16.mxu0 %v4142_v1  ;;  %4112 = vmatprep.subr.bf16.mxu1 %v4142_v1  ;;  %v4148_v5 = vld [vmem:[#allocation6 + $0x34] ss:$12 sps:$4 sm:$0xff]   ;;  %v4150_v6 = vld [vmem:[#allocation6 + $0x30] ss:$12 sps:$4 sm:$0xff]   ;;  %v4151_v7 = vld [vmem:[#allocation6 + $0x4c] ss:$12 sps:$4 sm:$0xff]  }
  0x5f   :  { %324 = vmatpush1.bf16.msra.mxu0 %v4144_v2  ;;  %4120 = vmatpush1.bf16.msra.mxu1 %v4144_v2  ;;  %v4153_v8 = vld [vmem:[#allocation6 + $0x48] ss:$12 sps:$4 sm:$0xff]   ;;  %v4154_v9 = vld [vmem:[#allocation6 + $0x64] ss:$12 sps:$4 sm:$0xff]   ;;  %v4156_v10 = vld [vmem:[#allocation6 + $0x60] ss:$12 sps:$4 sm:$0xff]  }
  0x60   :  { %325 = vmatprep.subr.bf16.mxu0 %v4145_v3  ;;  %4113 = vmatprep.subr.bf16.mxu1 %v4145_v3  ;;  %v4157_v11 = vld [vmem:[#allocation6 + $0x7c] ss:$12 sps:$4 sm:$0xff]   ;;  %v4159_v12 = vld [vmem:[#allocation6 + $0x78] ss:$12 sps:$4 sm:$0xff]   ;;  %v4160_v13 = vld [vmem:[#allocation6 + $0x94] ss:$12 sps:$4 sm:$0xff]  }
  0x61   :  { %v4162_v14 = vld [vmem:[#allocation6 + $0x90] ss:$12 sps:$4 sm:$0xff]   ;;  %v4163_v15 = vld [vmem:[#allocation6 + $0xac] ss:$12 sps:$4 sm:$0xff]   ;;  %v4165_v16 = vld [vmem:[#allocation6 + $0xa8] ss:$12 sps:$4 sm:$0xff]  }
  0x62   :  { %v115_v17 = vld [vmem:[#allocation3] sm:$0xff]  ;;  %v140_v20 = vld [vmem:[#allocation3 + $0xc8] sm:$0xff]  ;;  %v117_v25 = vld [vmem:[#allocation3 + $0x10] sm:$0xff] }
  0x63   :  { %326 = vmatpush1.bf16.msra.mxu0 %v4147_v4  ;;  %4121 = vmatpush1.bf16.msra.mxu1 %v4147_v4  ;;  %v139_v19 = vld [vmem:[#allocation3 + $0xc0] sm:$0xff]  ;;  %v4166_v21 = vld [vmem:[#allocation6 + $0x8] ss:$12 sps:$4 sm:$0xff]   ;;  %v147_v22 = vpack.c.bf16 %v116_v18, %v115_v17  ;;  %v118_v26 = vld [vmem:[#allocation3 + $0x18] sm:$0xff] }
  0x64   :  { %327 = vmatprep.subr.bf16.mxu0 %v4148_v5  ;;  %4114 = vmatprep.subr.bf16.mxu1 %v4148_v5  ;;  %v4789_v23 = vpack.c.bf16 %v140_v20, %v139_v19  ;;  %v4167_v24 = vld [vmem:[#allocation6 + $0x20] ss:$12 sps:$4 sm:$0xff]   ;;  %v141_v27 = vld [vmem:[#allocation3 + $0xd0] sm:$0xff]  ;;  %v142_v28 = vld [vmem:[#allocation3 + $0xd8] sm:$0xff]  ;;  %v148_v30 = vpack.c.bf16 %v118_v26, %v117_v25 }
  0x65   :  { %v4168_v29 = vld [vmem:[#allocation6 + $0x38] ss:$12 sps:$4 sm:$0xff]   ;;  %v4794_v31 = vpack.c.bf16 %v142_v28, %v141_v27  ;;  %v4169_v32 = vld [vmem:[#allocation6 + $0x50] ss:$12 sps:$4 sm:$0xff]   ;;  %v120_v34 = vld [vmem:[#allocation3 + $0x28] sm:$0xff] }
  0x66   :  { %v119_v33 = vld [vmem:[#allocation3 + $0x20] sm:$0xff]  ;;  %v144_v36 = vld [vmem:[#allocation3 + $0xe8] sm:$0xff]  ;;  %v121_v41 = vld [vmem:[#allocation3 + $0x30] sm:$0xff] }
  0x67   :  { %328 = vmatpush1.bf16.msra.mxu0 %v4150_v6  ;;  %4122 = vmatpush1.bf16.msra.mxu1 %v4150_v6  ;;  %v143_v35 = vld [vmem:[#allocation3 + $0xe0] sm:$0xff]  ;;  %v4170_v37 = vld [vmem:[#allocation6 + $0x68] ss:$12 sps:$4 sm:$0xff]   ;;  %v149_v38 = vpack.c.bf16 %v120_v34, %v119_v33  ;;  %v122_v42 = vld [vmem:[#allocation3 + $0x38] sm:$0xff] }
  0x68   :  { %329 = vmatprep.subr.bf16.mxu0 %v4151_v7  ;;  %4115 = vmatprep.subr.bf16.mxu1 %v4151_v7  ;;  %v4799_v39 = vpack.c.bf16 %v144_v36, %v143_v35  ;;  %v4171_v40 = vld [vmem:[#allocation6 + $0x80] ss:$12 sps:$4 sm:$0xff]   ;;  %v145_v43 = vld [vmem:[#allocation3 + $0xf0] sm:$0xff]  ;;  %v146_v44 = vld [vmem:[#allocation3 + $0xf8] sm:$0xff]  ;;  %v150_v46 = vpack.c.bf16 %v122_v42, %v121_v41 }
  0x69   :  { %v4172_v45 = vld [vmem:[#allocation6 + $0x98] ss:$12 sps:$4 sm:$0xff]   ;;  %v4804_v47 = vpack.c.bf16 %v146_v44, %v145_v43  ;;  %v4173_v48 = vld [vmem:[#allocation6 + $0xb0] ss:$12 sps:$4 sm:$0xff]   ;;  %v124_v50 = vld [vmem:[#allocation3 + $0x48] sm:$0xff] }
  0x6a   :  { %v123_v49 = vld [vmem:[#allocation3 + $0x40] sm:$0xff]  ;;  %v125_v52 = vld [vmem:[#allocation3 + $0x50] sm:$0xff]  ;;  %v126_v53 = vld [vmem:[#allocation3 + $0x58] sm:$0xff] }
  0x6b   :  { %330 = vmatpush1.bf16.msra.mxu0 %v4153_v8  ;;  %4123 = vmatpush1.bf16.msra.mxu1 %v4153_v8  ;;  %v151_v51 = vpack.c.bf16 %v124_v50, %v123_v49  ;;  %v152_v54 = vpack.c.bf16 %v126_v53, %v125_v52  ;;  %v127_v55 = vld [vmem:[#allocation3 + $0x60] sm:$0xff]  ;;  %v128_v56 = vld [vmem:[#allocation3 + $0x68] sm:$0xff]  ;;  %v129_v58 = vld [vmem:[#allocation3 + $0x70] sm:$0xff] }
  0x6c   :  { %331 = vmatprep.subr.bf16.mxu0 %v4154_v9  ;;  %4116 = vmatprep.subr.bf16.mxu1 %v4154_v9  ;;  %v153_v57 = vpack.c.bf16 %v128_v56, %v127_v55  ;;  %v130_v59 = vld [vmem:[#allocation3 + $0x78] sm:$0xff]  ;;  %v131_v61 = vld [vmem:[#allocation3 + $0x80] sm:$0xff]  ;;  %v132_v62 = vld [vmem:[#allocation3 + $0x88] sm:$0xff] }
  0x6d   :  { %v154_v60 = vpack.c.bf16 %v130_v59, %v129_v58  ;;  %v155_v63 = vpack.c.bf16 %v132_v62, %v131_v61  ;;  %v133_v1 = vld [vmem:[#allocation3 + $0x90] sm:$0xff]  ;;  %v134_v2 = vld [vmem:[#allocation3 + $0x98] sm:$0xff]  ;;  %v135_v3 = vld [vmem:[#allocation3 + $0xa0] sm:$0xff] }
  0x6e   :  { %v136_v4 = vld [vmem:[#allocation3 + $0xa8] sm:$0xff]  ;;  %v156_v5 = vpack.c.bf16 %v134_v2, %v133_v1  ;;  %v137_v7 = vld [vmem:[#allocation3 + $0xb0] sm:$0xff]  ;;  %v138_v8 = vld [vmem:[#allocation3 + $0xb8] sm:$0xff] }
  0x6f   :  { %332 = vmatpush1.bf16.msra.mxu0 %v4156_v10  ;;  %4124 = vmatpush1.bf16.msra.mxu1 %v4156_v10  ;;  %v157_v6 = vpack.c.bf16 %v136_v4, %v135_v3  ;;  %v158_v9 = vpack.c.bf16 %v138_v8, %v137_v7 }
  0x70   :  { %333 = vmatprep.subr.bf16.mxu0 %v4157_v11  ;;  %4117 = vmatprep.subr.bf16.mxu1 %v4157_v11 }
  0x73   :  { %334 = vmatpush1.bf16.msra.mxu0 %v4159_v12  ;;  %4125 = vmatpush1.bf16.msra.mxu1 %v4159_v12 }
  0x74   :  { %335 = vmatprep.subr.bf16.mxu0 %v4160_v13  ;;  %4118 = vmatprep.subr.bf16.mxu1 %v4160_v13 }
  0x77   :  { %336 = vmatpush1.bf16.msra.mxu0 %v4162_v14  ;;  %4126 = vmatpush1.bf16.msra.mxu1 %v4162_v14 }
  0x78   :  { %337 = vmatprep.subr.bf16.mxu0 %v4163_v15  ;;  %4119 = vmatprep.subr.bf16.mxu1 %v4163_v15 }
  0x7b   :  { %338 = vmatpush1.bf16.msra.mxu0 %v4165_v16  ;;  %4127 = vmatpush1.bf16.msra.mxu1 %v4165_v16 }
  0x7c   :  { %3888 = vmatprep.subr.bf16.mxu1 %v4166_v21 }
  0x7e   :  { %356 = vmatmul.mubr.bf16.vlgmr.msra.gmra.mrb[0].mxu0 %v147_v22  ;;  %476 = vmatmul.mubr.bf16.vlgmr.msra.gmra.mrb[0].mxu1 %v4789_v23 }
  0x7f   :  { %365 = vmatprep.mubr.bf16.mxu0 %v4653_v0  ;;  %485 = vmatprep.mubr.bf16.mxu1 %v4653_v0 }
  0x80   :  { %3889 = vmatpush3.bf16.msra.mxu1 %v4166_v21 }
  0x81   :  { %3890 = vmatprep.subr.bf16.mxu1 %v4167_v24 }
  0x84   :  { %3891 = vmatpush3.bf16.msra.mxu1 %v4167_v24 }
  0x85   :  { %3892 = vmatprep.subr.bf16.mxu1 %v4168_v29 }
  0x86   :  { %366 = vmatmul.mubr.bf16.gmra.mrb[4].mxu0 %v148_v30  ;;  %486 = vmatmul.mubr.bf16.gmra.mrb[4].mxu1 %v4794_v31 }
  0x87   :  { %375 = vmatprep.mubr.bf16.mxu0 %v4653_v0  ;;  %495 = vmatprep.mubr.bf16.mxu1 %v4653_v0 }
  0x88   :  { %3893 = vmatpush3.bf16.msra.mxu1 %v4168_v29 }
  0x89   :  { %3894 = vmatprep.subr.bf16.mxu1 %v4169_v32 }
  0x8c   :  { %3895 = vmatpush3.bf16.msra.mxu1 %v4169_v32 }
  0x8d   :  { %3896 = vmatprep.subr.bf16.mxu1 %v4170_v37 }
  0x8e   :  { %376 = vmatmul.mubr.bf16.gmra.mrb[8].mxu0 %v149_v38  ;;  %496 = vmatmul.mubr.bf16.gmra.mrb[8].mxu1 %v4799_v39 }
  0x8f   :  { %385 = vmatprep.mubr.bf16.mxu0 %v4653_v0  ;;  %505 = vmatprep.mubr.bf16.mxu1 %v4653_v0 }
  0x90   :  { %3897 = vmatpush3.bf16.msra.mxu1 %v4170_v37 }
  0x91   :  { %3898 = vmatprep.subr.bf16.mxu1 %v4171_v40 }
  0x94   :  { %3899 = vmatpush3.bf16.msra.mxu1 %v4171_v40 }
  0x95   :  { %3900 = vmatprep.subr.bf16.mxu1 %v4172_v45 }
  0x96   :  { %386 = vmatmul.mubr.bf16.gmra.mrb[12].mxu0 %v150_v46  ;;  %506 = vmatmul.mubr.bf16.gmra.mrb[12].mxu1 %v4804_v47 }
  0x97   :  { %395 = vmatprep.mubr.bf16.mxu0 %v4653_v0  ;;  %3904 = vmatprep.mubr.bf16.mxu1 %v147_v22 }
  0x98   :  { %3901 = vmatpush3.bf16.msra.mxu1 %v4172_v45 }
  0x99   :  { %3902 = vmatprep.subr.bf16.mxu1 %v4173_v48 }
  0x9c   :  { %3903 = vmatpush3.bf16.msra.mxu1 %v4173_v48 }
  0x9e   :  { %396 = vmatmul.mubr.bf16.gmra.mrb[16].mxu0 %v151_v51 }
  0x9f   :  { %405 = vmatprep.mubr.bf16.mxu0 %v4653_v0  ;;  %3905 = vmatmul.mubr.bf16.vlgmr.msra.gmra.mrb[16].mxu1 %v148_v30 }
  0xa0   :  { %3908 = vmatprep.mubr.bf16.mxu1 %v149_v38 }
  0xa6   :  { %406 = vmatmul.mubr.bf16.gmra.mrb[20].mxu0 %v152_v54 }
  0xa7   :  { %415 = vmatprep.mubr.bf16.mxu0 %v4653_v0  ;;  %3909 = vmatmul.mubr.bf16.gmra.mrb[20].mxu1 %v150_v46 }
  0xa8   :  { %3912 = vmatprep.mubr.bf16.mxu1 %v151_v51 }
  0xae   :  { %416 = vmatmul.mubr.bf16.gmra.mrb[24].mxu0 %v153_v57 }
  0xaf   :  { %425 = vmatprep.mubr.bf16.mxu0 %v4653_v0  ;;  %3913 = vmatmul.mubr.bf16.gmra.mrb[24].mxu1 %v152_v54 }
  0xb0   :  { %3916 = vmatprep.mubr.bf16.mxu1 %v153_v57 }
  0xb6   :  { %426 = vmatmul.mubr.bf16.gmra.mrb[28].mxu0 %v154_v60 }
  0xb7   :  { %435 = vmatprep.mubr.bf16.mxu0 %v4653_v0  ;;  %3917 = vmatmul.mubr.bf16.gmra.mrb[28].mxu1 %v154_v60 }
  0xb8   :  { %3920 = vmatprep.mubr.bf16.mxu1 %v155_v63 }
  0xbe   :  { %436 = vmatmul.mubr.bf16.gmra.mrb[32].mxu0 %v155_v63 }
  0xbf   :  { %445 = vmatprep.mubr.bf16.mxu0 %v4653_v0  ;;  %3921 = vmatmul.mubr.bf16.gmra.mrb[32].mxu1 %v156_v5 }
  0xc0   :  { %3924 = vmatprep.mubr.bf16.mxu1 %v157_v6 }
  0xc6   :  { %446 = vmatmul.mubr.bf16.gmra.mrb[36].mxu0 %v156_v5 }
  0xc7   :  { %455 = vmatprep.mubr.bf16.mxu0 %v4653_v0  ;;  %3925 = vmatmul.mubr.bf16.gmra.mrb[36].mxu1 %v158_v9 }
  0xc8   :  { %3928 = vmatprep.mubr.bf16.mxu1 %v4789_v23 }
  0xce   :  { %456 = vmatmul.mubr.bf16.gmra.mrb[40].mxu0 %v157_v6 }
  0xcf   :  { %465 = vmatprep.mubr.bf16.mxu0 %v4653_v0  ;;  %3929 = vmatmul.mubr.bf16.gmra.mrb[40].mxu1 %v4794_v31 }
  0xd0   :  { %3932 = vmatprep.mubr.bf16.mxu1 %v4799_v39 }
  0xd6   :  { %466 = vmatmul.mubr.bf16.gmra.mrb[44].mxu0 %v158_v9 }
  0xd7   :  { %3933 = vmatmul.mubr.bf16.gmra.mrb[44].mxu1 %v4804_v47 }
 0x151   :  { %v357_v10 = vpop.f32.mrb[0].mxu0  ;;  %v477_v11 = vpop.f32.mrb[0].mxu1 }
 0x152   :  { %v359_v12 = vpop.f32.mrb[1].mxu0  ;;  %v4819_v13 = vmul.f32 0.088388346, %v477_v11  ;;  %v479_v14 = vpop.f32.mrb[1].mxu1  ;;  %v677_v15 = vmul.f32 0.088388346, %v357_v10 }
 0x153   :  { %v361_v16 = vpop.f32.mrb[2].mxu0  ;;  %v481_v17 = vpop.f32.mrb[2].mxu1 }
 0x154   :  { %v678_v18 = vmul.f32 0.088388346, %v361_v16  ;;  %v363_v19 = vpop.f32.mrb[3].mxu0  ;;  %v4821_v20 = vmul.f32 0.088388346, %v481_v17  ;;  %v483_v21 = vpop.f32.mrb[3].mxu1 }
 0x155   :  { %v741_v22 = vpack.c.bf16 %v363_v19, %v359_v12  ;;  %v4823_v23 = vpack.c.bf16 %v483_v21, %v479_v14 }
 0x156   :  { %v709_v24 = vpack.c.bf16 %v678_v18, %v677_v15  ;;  %v721_v25 = vpack.c.bf16 %v4821_v20, %v4819_v13 }
 0x157   :  { %3936 = vmatprep.subr.bf16.mxu1 %v741_v22 }
 0x158   :  { %3937 = vmatpush3.bf16.xpose.msra.mxu1 %v741_v22  ;;  %3952 = vmatprep.mubr.bf16.mxu1 %v709_v24 }
 0x159   :  { %v367_v26 = vpop.f32.mrb[4].mxu0  ;;  %v487_v27 = vpop.f32.mrb[4].mxu1 }
 0x15a   :  { %v369_v28 = vpop.f32.mrb[5].mxu0  ;;  %v4827_v29 = vmul.f32 0.088388346, %v487_v27  ;;  %v489_v30 = vpop.f32.mrb[5].mxu1  ;;  %v4829_v31 = vmul.f32 0.088388346, %v367_v26 }
 0x15b   :  { %v371_v32 = vpop.f32.mrb[6].mxu0  ;;  %v491_v33 = vpop.f32.mrb[6].mxu1 }
 0x15c   :  { %v4831_v34 = vmul.f32 0.088388346, %v371_v32  ;;  %v373_v35 = vpop.f32.mrb[7].mxu0  ;;  %v4833_v36 = vmul.f32 0.088388346, %v491_v33  ;;  %v493_v37 = vpop.f32.mrb[7].mxu1 }
 0x15d   :  { %v742_v38 = vpack.c.bf16 %v373_v35, %v369_v28  ;;  %v4835_v39 = vpack.c.bf16 %v493_v37, %v489_v30 }
 0x15e   :  { %v710_v40 = vpack.c.bf16 %v4831_v34, %v4829_v31  ;;  %v722_v41 = vpack.c.bf16 %v4833_v36, %v4827_v29 }
 0x15f   :  { %3938 = vmatprep.subr.bf16.mxu1 %v742_v38 }
 0x160   :  { %3939 = vmatpush3.bf16.xpose.msra.mxu1 %v742_v38 }
 0x161   :  { %v377_v42 = vpop.f32.mrb[8].mxu0  ;;  %v497_v43 = vpop.f32.mrb[8].mxu1 }
 0x162   :  { %v379_v44 = vpop.f32.mrb[9].mxu0  ;;  %v4841_v45 = vmul.f32 0.088388346, %v497_v43  ;;  %v499_v46 = vpop.f32.mrb[9].mxu1  ;;  %v4843_v47 = vmul.f32 0.088388346, %v377_v42 }
 0x163   :  { %v381_v48 = vpop.f32.mrb[10].mxu0  ;;  %v501_v49 = vpop.f32.mrb[10].mxu1 }
 0x164   :  { %v4845_v50 = vmul.f32 0.088388346, %v381_v48  ;;  %v383_v51 = vpop.f32.mrb[11].mxu0  ;;  %v4847_v52 = vmul.f32 0.088388346, %v501_v49  ;;  %v503_v53 = vpop.f32.mrb[11].mxu1 }
 0x165   :  { %v743_v54 = vpack.c.bf16 %v383_v51, %v379_v44  ;;  %v4849_v55 = vpack.c.bf16 %v503_v53, %v499_v46 }
 0x166   :  { %v711_v56 = vpack.c.bf16 %v4845_v50, %v4843_v47  ;;  %v723_v57 = vpack.c.bf16 %v4847_v52, %v4841_v45 }
 0x167   :  { %3940 = vmatprep.subr.bf16.mxu1 %v743_v54 }
 0x168   :  { %3941 = vmatpush3.bf16.xpose.msra.mxu1 %v743_v54 }
 0x169   :  { %v387_v58 = vpop.f32.mrb[12].mxu0  ;;  %v507_v59 = vpop.f32.mrb[12].mxu1 }
 0x16a   :  { %v389_v60 = vpop.f32.mrb[13].mxu0  ;;  %v4855_v61 = vmul.f32 0.088388346, %v507_v59  ;;  %v509_v62 = vpop.f32.mrb[13].mxu1  ;;  %v4857_v63 = vmul.f32 0.088388346, %v387_v58 }
 0x16b   :  { %v391_v1 = vpop.f32.mrb[14].mxu0  ;;  %v511_v2 = vpop.f32.mrb[14].mxu1 }
 0x16c   :  { %v4859_v3 = vmul.f32 0.088388346, %v391_v1  ;;  %v393_v4 = vpop.f32.mrb[15].mxu0  ;;  %v4861_v5 = vmul.f32 0.088388346, %v511_v2  ;;  %v513_v6 = vpop.f32.mrb[15].mxu1 }
 0x16d   :  { %v744_v7 = vpack.c.bf16 %v393_v4, %v389_v60  ;;  %v4863_v8 = vpack.c.bf16 %v513_v6, %v509_v62 }
 0x16e   :  { %v712_v9 = vpack.c.bf16 %v4859_v3, %v4857_v63  ;;  %v724_v10 = vpack.c.bf16 %v4861_v5, %v4855_v61 }
 0x16f   :  { %3942 = vmatprep.subr.bf16.mxu1 %v744_v7 }
 0x170   :  { %3943 = vmatpush3.bf16.xpose.msra.mxu1 %v744_v7 }
 0x171   :  { %v397_v11 = vpop.f32.mrb[16].mxu0 }
 0x172   :  { %v399_v12 = vpop.f32.mrb[17].mxu0  ;;  %v3906_v14 = vpop.f32.mrb[16].mxu1  ;;  %v4869_v17 = vmul.f32 0.088388346, %v397_v11 }
 0x173   :  { %v401_v15 = vpop.f32.mrb[18].mxu0  ;;  %v550_v16 = vpop.f32.mrb[17].mxu1 }
 0x174   :  { %v4871_v18 = vmul.f32 0.088388346, %v401_v15  ;;  %v403_v19 = vpop.f32.mrb[19].mxu0  ;;  %v3907_v21 = vpop.f32.mrb[18].mxu1 }
 0x175   :  { %v745_v22 = vpack.c.bf16 %v403_v19, %v399_v12  ;;  %v4873_v24 = vpack.c.bf16 %v3907_v21, %v3906_v14  ;;  %v553_v26 = vpop.f32.mrb[19].mxu1 }
 0x176   :  { %v713_v27 = vpack.c.bf16 %v4871_v18, %v4869_v17  ;;  %v4877_v28 = vpack.c.bf16 %v553_v26, %v550_v16 }
 0x177   :  { %3944 = vmatprep.subr.bf16.mxu1 %v745_v22 }
 0x178   :  { %3945 = vmatpush3.bf16.xpose.msra.mxu1 %v745_v22 }
 0x179   :  { %v407_v30 = vpop.f32.mrb[20].mxu0 }
 0x17a   :  { %v409_v32 = vpop.f32.mrb[21].mxu0  ;;  %v3910_v33 = vpop.f32.mrb[20].mxu1  ;;  %v4879_v38 = vmul.f32 0.088388346, %v407_v30 }
 0x17b   :  { %v411_v35 = vpop.f32.mrb[22].mxu0  ;;  %v566_v37 = vpop.f32.mrb[21].mxu1 }
 0x17c   :  { %v4881_v42 = vmul.f32 0.088388346, %v411_v35  ;;  %v413_v43 = vpop.f32.mrb[23].mxu0  ;;  %v3911_v44 = vpop.f32.mrb[22].mxu1 }
 0x17d   :  { %v746_v46 = vpack.c.bf16 %v413_v43, %v409_v32  ;;  %v4883_v48 = vpack.c.bf16 %v3911_v44, %v3910_v33  ;;  %v569_v49 = vpop.f32.mrb[23].mxu1 }
 0x17e   :  { %v714_v51 = vpack.c.bf16 %v4881_v42, %v4879_v38  ;;  %v4887_v53 = vpack.c.bf16 %v569_v49, %v566_v37 }
 0x17f   :  { %3946 = vmatprep.subr.bf16.mxu1 %v746_v46 }
 0x180   :  { %3947 = vmatpush3.bf16.xpose.msra.mxu1 %v746_v46 }
 0x181   :  { %v417_v54 = vpop.f32.mrb[24].mxu0 }
 0x182   :  { %v419_v58 = vpop.f32.mrb[25].mxu0  ;;  %v3914_v59 = vpop.f32.mrb[24].mxu1  ;;  %v4889_v1 = vmul.f32 0.088388346, %v417_v54 }
 0x183   :  { %v421_v60 = vpop.f32.mrb[26].mxu0  ;;  %v582_v62 = vpop.f32.mrb[25].mxu1 }
 0x184   :  { %v4891_v2 = vmul.f32 0.088388346, %v421_v60  ;;  %v423_v4 = vpop.f32.mrb[27].mxu0  ;;  %v3915_v6 = vpop.f32.mrb[26].mxu1 }
 0x185   :  { %v747_v7 = vpack.c.bf16 %v423_v4, %v419_v58  ;;  %v4893_v11 = vpack.c.bf16 %v3915_v6, %v3914_v59  ;;  %v585_v12 = vpop.f32.mrb[27].mxu1 }
 0x186   :  { %v715_v14 = vpack.c.bf16 %v4891_v2, %v4889_v1  ;;  %v4897_v15 = vpack.c.bf16 %v585_v12, %v582_v62 }
 0x187   :  { %3948 = vmatprep.subr.bf16.mxu1 %v747_v7 }
 0x188   :  { %3949 = vmatpush3.bf16.xpose.msra.mxu1 %v747_v7 }
 0x189   :  { %v427_v16 = vpop.f32.mrb[28].mxu0 }
 0x18a   :  { %v429_v19 = vpop.f32.mrb[29].mxu0  ;;  %v3918_v21 = vpop.f32.mrb[28].mxu1  ;;  %v4899_v30 = vmul.f32 0.088388346, %v427_v16 }
 0x18b   :  { %v431_v22 = vpop.f32.mrb[30].mxu0  ;;  %v598_v26 = vpop.f32.mrb[29].mxu1 }
 0x18c   :  { %v4901_v32 = vmul.f32 0.088388346, %v431_v22  ;;  %v433_v33 = vpop.f32.mrb[31].mxu0  ;;  %v3919_v35 = vpop.f32.mrb[30].mxu1 }
 0x18d   :  { %v748_v37 = vpack.c.bf16 %v433_v33, %v429_v19  ;;  %v4903_v43 = vpack.c.bf16 %v3919_v35, %v3918_v21  ;;  %v601_v44 = vpop.f32.mrb[31].mxu1 }
 0x18e   :  { %v716_v46 = vpack.c.bf16 %v4901_v32, %v4899_v30  ;;  %v4907_v49 = vpack.c.bf16 %v601_v44, %v598_v26 }
 0x18f   :  { %3950 = vmatprep.subr.bf16.mxu1 %v748_v37 }
 0x190   :  { %3951 = vmatpush3.bf16.xpose.msra.mxu1 %v748_v37 }
 0x191   :  { %v437_v54 = vpop.f32.mrb[32].mxu0  ;;  %4000 = vmatprep.subr.bf16.mxu1 %v4877_v28 }
 0x192   :  { %v693_v58 = vmul.f32 0.088388346, %v437_v54  ;;  %v439_v59 = vpop.f32.mrb[33].mxu0  ;;  %v3922_v60 = vpop.f32.mrb[32].mxu1 }
 0x193   :  { %v441_v62 = vpop.f32.mrb[34].mxu0  ;;  %v614_v4 = vpop.f32.mrb[33].mxu1 }
 0x194   :  { %v694_v6 = vmul.f32 0.088388346, %v441_v62  ;;  %v443_v7 = vpop.f32.mrb[35].mxu0  ;;  %v3923_v12 = vpop.f32.mrb[34].mxu1 }
 0x195   :  { %v749_v16 = vpack.c.bf16 %v443_v7, %v439_v59  ;;  %v4910_v19 = vpack.c.bf16 %v3923_v12, %v3922_v60  ;;  %v617_v21 = vpop.f32.mrb[35].mxu1 }
 0x196   :  { %v717_v22 = vpack.c.bf16 %v694_v6, %v693_v58  ;;  %v4912_v26 = vpack.c.bf16 %v617_v21, %v614_v4 }
 0x197   :  { %3953 = vmatmul.mubr.bf16.vlgmr.msra.gmra.mrb[48].mxu1 %v710_v40  ;;  %3968 = vmatprep.subr.bf16.mxu0 %v749_v16 }
 0x198   :  { %3956 = vmatprep.mubr.bf16.mxu1 %v711_v56  ;;  %3969 = vmatpush3.bf16.xpose.msra.mxu0 %v749_v16 }
 0x199   :  { %v447_v33 = vpop.f32.mrb[36].mxu0  ;;  %3984 = vmatprep.mubr.bf16.mxu0 %v717_v22  ;;  %4001 = vmatpush3.bf16.msra.mxu1 %v4877_v28 }
 0x19a   :  { %v4921_v35 = vmul.f32 0.088388346, %v447_v33  ;;  %v449_v37 = vpop.f32.mrb[37].mxu0  ;;  %4002 = vmatprep.subr.bf16.mxu1 %v4873_v24  ;;  %v3926_v44 = vpop.f32.mrb[36].mxu1 }
 0x19b   :  { %v451_v54 = vpop.f32.mrb[38].mxu0  ;;  %v630_v58 = vpop.f32.mrb[37].mxu1 }
 0x19c   :  { %v4924_v31 = vmul.f32 0.088388346, %v451_v54  ;;  %v453_v34 = vpop.f32.mrb[39].mxu0  ;;  %v3927_v40 = vpop.f32.mrb[38].mxu1 }
 0x19d   :  { %v750_v59 = vpack.c.bf16 %v453_v34, %v449_v37  ;;  %4003 = vmatpush3.bf16.msra.mxu1 %v4873_v24  ;;  %v4927_v47 = vpack.c.bf16 %v3927_v40, %v3926_v44  ;;  %v633_v50 = vpop.f32.mrb[39].mxu1 }
 0x19e   :  { %v718_v56 = vpack.c.bf16 %v4924_v31, %v4921_v35  ;;  %4004 = vmatprep.subr.bf16.mxu1 %v4887_v53  ;;  %v4932_v28 = vpack.c.bf16 %v633_v50, %v630_v58 }
 0x19f   :  { %3957 = vmatmul.mubr.bf16.gmra.mrb[52].mxu1 %v712_v9  ;;  %3970 = vmatprep.subr.bf16.mxu0 %v750_v59 }
 0x1a0   :  { %3960 = vmatprep.mubr.bf16.mxu1 %v713_v27  ;;  %3971 = vmatpush3.bf16.xpose.msra.mxu0 %v750_v59 }
 0x1a1   :  { %v457_v24 = vpop.f32.mrb[40].mxu0  ;;  %4005 = vmatpush3.bf16.msra.mxu1 %v4887_v53 }
 0x1a2   :  { %v697_v60 = vmul.f32 0.088388346, %v457_v24  ;;  %v459_v62 = vpop.f32.mrb[41].mxu0  ;;  %4006 = vmatprep.subr.bf16.mxu1 %v4883_v48  ;;  %v3930_v4 = vpop.f32.mrb[40].mxu1 }
 0x1a3   :  { %v461_v6 = vpop.f32.mrb[42].mxu0  ;;  %v646_v7 = vpop.f32.mrb[41].mxu1 }
 0x1a4   :  { %v698_v12 = vmul.f32 0.088388346, %v461_v6  ;;  %v463_v16 = vpop.f32.mrb[43].mxu0  ;;  %v3931_v63 = vpop.f32.mrb[42].mxu1 }
 0x1a5   :  { %v751_v3 = vpack.c.bf16 %v463_v16, %v459_v62  ;;  %4007 = vmatpush3.bf16.msra.mxu1 %v4883_v48  ;;  %v4943_v9 = vpack.c.bf16 %v3931_v63, %v3930_v4  ;;  %v649_v17 = vpop.f32.mrb[43].mxu1 }
 0x1a6   :  { %v719_v18 = vpack.c.bf16 %v698_v12, %v697_v60  ;;  %4008 = vmatprep.subr.bf16.mxu1 %v4897_v15  ;;  %v4946_v27 = vpack.c.bf16 %v649_v17, %v646_v7 }
 0x1a7   :  { %3961 = vmatmul.mubr.bf16.gmra.mrb[56].mxu1 %v714_v51  ;;  %3972 = vmatprep.subr.bf16.mxu0 %v751_v3 }
 0x1a8   :  { %3964 = vmatprep.mubr.bf16.mxu1 %v715_v14  ;;  %3973 = vmatpush3.bf16.xpose.msra.mxu0 %v751_v3 }
 0x1a9   :  { %v467_v53 = vpop.f32.mrb[44].mxu0  ;;  %4009 = vmatpush3.bf16.msra.mxu1 %v4897_v15 }
 0x1aa   :  { %v699_v48 = vmul.f32 0.088388346, %v467_v53  ;;  %v469_v21 = vpop.f32.mrb[45].mxu0  ;;  %4010 = vmatprep.subr.bf16.mxu1 %v4893_v11  ;;  %v3934_v22 = vpop.f32.mrb[44].mxu1 }
 0x1ab   :  { %v471_v33 = vpop.f32.mrb[46].mxu0  ;;  %v662_v35 = vpop.f32.mrb[45].mxu1 }
 0x1ac   :  { %v700_v37 = vmul.f32 0.088388346, %v471_v33  ;;  %v473_v44 = vpop.f32.mrb[47].mxu0  ;;  %v3935_v38 = vpop.f32.mrb[46].mxu1 }
 0x1ad   :  { %v752_v42 = vpack.c.bf16 %v473_v44, %v469_v21  ;;  %4011 = vmatpush3.bf16.msra.mxu1 %v4893_v11  ;;  %v4957_v51 = vpack.c.bf16 %v3935_v38, %v3934_v22  ;;  %v665_v1 = vpop.f32.mrb[47].mxu1 }
 0x1ae   :  { %v720_v2 = vpack.c.bf16 %v700_v37, %v699_v48  ;;  %4012 = vmatprep.subr.bf16.mxu1 %v4907_v49  ;;  %v4960_v14 = vpack.c.bf16 %v665_v1, %v662_v35 }
 0x1af   :  { %3965 = vmatmul.mubr.bf16.gmra.mrb[60].mxu1 %v716_v46  ;;  %3974 = vmatprep.subr.bf16.mxu0 %v752_v42 }
 0x1b0   :  { %3975 = vmatpush3.bf16.xpose.msra.mxu0 %v752_v42 }
 0x1b1   :  { %3976 = vmatprep.subr.bf16.mxu0 %v4823_v23  ;;  %4013 = vmatpush3.bf16.msra.mxu1 %v4907_v49 }
 0x1b2   :  { %4014 = vmatprep.subr.bf16.mxu1 %v4903_v43 }
 0x1b5   :  { %4015 = vmatpush3.bf16.msra.mxu1 %v4903_v43 }
 0x1b6   :  { %4032 = vmatprep.subr.bf16.mxu1 %v4912_v26 }
 0x1b8   :  { %3977 = vmatpush3.bf16.xpose.msra.mxu0 %v4823_v23 }
 0x1b9   :  { %3978 = vmatprep.subr.bf16.mxu0 %v4835_v39 }
 0x1c0   :  { %3979 = vmatpush3.bf16.xpose.msra.mxu0 %v4835_v39 }
 0x1c1   :  { %3980 = vmatprep.subr.bf16.mxu0 %v4849_v55 }
 0x1c8   :  { %3981 = vmatpush3.bf16.xpose.msra.mxu0 %v4849_v55 }
 0x1c9   :  { %3982 = vmatprep.subr.bf16.mxu0 %v4863_v8 }
 0x1d0   :  { %3983 = vmatpush3.bf16.xpose.msra.mxu0 %v4863_v8 }
 0x1d7   :  { %3985 = vmatmul.mubr.bf16.vlgmr.msra.gmra.mrb[48].mxu0 %v718_v56 }
 0x1d8   :  { %3988 = vmatprep.mubr.bf16.mxu0 %v719_v18 }
 0x1df   :  { %3989 = vmatmul.mubr.bf16.gmra.mrb[52].mxu0 %v720_v2 }
 0x1e0   :  { %3992 = vmatprep.mubr.bf16.mxu0 %v721_v25 }
 0x1e7   :  { %3993 = vmatmul.mubr.bf16.gmra.mrb[56].mxu0 %v722_v41 }
 0x1e8   :  { %3996 = vmatprep.mubr.bf16.mxu0 %v723_v57 }
 0x1ef   :  { %3997 = vmatmul.mubr.bf16.gmra.mrb[60].mxu0 %v724_v10 }
 0x26a   :  { %v3954_v23 = vpop.f32.mrb[48].mxu1 }
 0x26b   :  { %v896_v39 = vpop.f32.mrb[49].mxu1  ;;  %vm1058_vm0 = vcmp.ne.f32.partialorder %v3954_v23, 0.0 }
 0x26c   :  { %v3955_v55 = vpop.f32.mrb[50].mxu1  ;;  %v4989_v8 = vsel %vm1058_vm0, %v3954_v23, -9e+15  ;;  %vm1056_vm1 = vcmp.ne.f32.partialorder %v896_v39, 0.0 }
 0x26d   :  { %1124 = vmax.xlane.f32.xlu1 %v4989_v8  ;;  %v899_v13 = vpop.f32.mrb[51].mxu1  ;;  %v4992_v20 = vsel %vm1056_vm1, %v896_v39, -9e+15  ;;  %vm1059_vm2 = vcmp.ne.f32.partialorder %v3955_v55, 0.0 }
 0x26e   :  { %1120 = vmax.xlane.f32.xlu0 %v4992_v20  ;;  %vm1057_vm3 = vcmp.ne.f32.partialorder %v899_v13, 0.0  ;;  %v4995_v25 = vsel %vm1059_vm2, %v3955_v55, -9e+15 }
 0x26f   :  { %v4998_v29 = vsel %vm1057_vm3, %v899_v13, -9e+15 }
 0x271   :  { %1126 = vmax.xlane.f32.xlu1 %v4995_v25 }
 0x272   :  { %1122 = vmax.xlane.f32.xlu0 %v4998_v29  ;;  %v3958_v36 = vpop.f32.mrb[52].mxu1 }
 0x273   :  { %v912_v41 = vpop.f32.mrb[53].mxu1  ;;  %vm1062_vm6 = vcmp.ne.f32.partialorder %v3958_v36, 0.0 }
 0x274   :  { %v3959_v45 = vpop.f32.mrb[54].mxu1  ;;  %vm1060_vm4 = vcmp.ne.f32.partialorder %v912_v41, 0.0  ;;  %v5007_v5 = vsel %vm1062_vm6, %v3958_v36, -9e+15 }
 0x275   :  { %v915_v52 = vpop.f32.mrb[55].mxu1  ;;  %v5001_v57 = vsel %vm1060_vm4, %v912_v41, -9e+15  ;;  %vm1063_vm7 = vcmp.ne.f32.partialorder %v3959_v45, 0.0 }
 0x276   :  { %1128 = vmax.xlane.f32.xlu0 %v5001_v57  ;;  %vm1061_vm5 = vcmp.ne.f32.partialorder %v915_v52, 0.0  ;;  %v5010_v15 = vsel %vm1063_vm7, %v3959_v45, -9e+15 }
 0x277   :  { %v5004_v61 = vsel %vm1061_vm5, %v915_v52, -9e+15 }
 0x278   :  { %1130 = vmax.xlane.f32.xlu1 %v5004_v61 }
 0x27a   :  { %1132 = vmax.xlane.f32.xlu0 %v5007_v5  ;;  %v3962_v10 = vpop.f32.mrb[56].mxu1 }
 0x27b   :  { %v928_v11 = vpop.f32.mrb[57].mxu1  ;;  %vm1066_vm10 = vcmp.ne.f32.partialorder %v3962_v10, 0.0 }
 0x27c   :  { %1134 = vmax.xlane.f32.xlu1 %v5010_v15  ;;  %v3963_v30 = vpop.f32.mrb[58].mxu1  ;;  %vm1064_vm8 = vcmp.ne.f32.partialorder %v928_v11, 0.0  ;;  %v5019_v49 = vsel %vm1066_vm10, %v3962_v10, -9e+15 }
 0x27d   :  { %v931_v32 = vpop.f32.mrb[59].mxu1  ;;  %v5013_v43 = vsel %vm1064_vm8, %v928_v11, -9e+15  ;;  %vm1067_vm11 = vcmp.ne.f32.partialorder %v3963_v30, 0.0 }
 0x27e   :  { %1136 = vmax.xlane.f32.xlu0 %v5013_v43  ;;  %vm1065_vm9 = vcmp.ne.f32.partialorder %v931_v32, 0.0  ;;  %v5022_v31 = vsel %vm1067_vm11, %v3963_v30, -9e+15 }
 0x27f   :  { %v5016_v46 = vsel %vm1065_vm9, %v931_v32, -9e+15 }
 0x280   :  { %1138 = vmax.xlane.f32.xlu1 %v5016_v46 }
 0x282   :  { %1140 = vmax.xlane.f32.xlu0 %v5019_v49  ;;  %v3966_v54 = vpop.f32.mrb[60].mxu1 }
 0x283   :  { %v944_v58 = vpop.f32.mrb[61].mxu1  ;;  %vm1070_vm14 = vcmp.ne.f32.partialorder %v3966_v54, 0.0 }
 0x284   :  { %1142 = vmax.xlane.f32.xlu1 %v5022_v31  ;;  %v3967_v34 = vpop.f32.mrb[62].mxu1  ;;  %vm1068_vm12 = vcmp.ne.f32.partialorder %v944_v58, 0.0  ;;  %v5031_v56 = vsel %vm1070_vm14, %v3966_v54, -9e+15 }
 0x285   :  { %v947_v40 = vpop.f32.mrb[63].mxu1  ;;  %v5025_v59 = vsel %vm1068_vm12, %v944_v58, -9e+15  ;;  %vm1071_vm15 = vcmp.ne.f32.partialorder %v3967_v34, 0.0 }
 0x286   :  { %1144 = vmax.xlane.f32.xlu0 %v5025_v59  ;;  %vm1069_vm13 = vcmp.ne.f32.partialorder %v947_v40, 0.0  ;;  %v5034_v24 = vsel %vm1071_vm15, %v3967_v34, -9e+15 }
 0x287   :  { %v5028_v50 = vsel %vm1069_vm13, %v947_v40, -9e+15 }
 0x288   :  { %1146 = vmax.xlane.f32.xlu1 %v5028_v50 }
 0x28a   :  { %1148 = vmax.xlane.f32.xlu0 %v5031_v56 }
 0x28c   :  { %1150 = vmax.xlane.f32.xlu1 %v5034_v24 }
 0x2aa   :  { %v3986_v60 = vpop.f32.mrb[48].mxu0 }
 0x2ab   :  { %v993_v62 = vpop.f32.mrb[49].mxu0  ;;  %vm1074_vm1 = vcmp.ne.f32.partialorder %v3986_v60, 0.0 }
 0x2ac   :  { %v3987_v4 = vpop.f32.mrb[50].mxu0  ;;  %vm1072_vm0 = vcmp.ne.f32.partialorder %v993_v62, 0.0  ;;  %v5042_v16 = vsel %vm1074_vm1, %v3986_v60, -9e+15 }
 0x2ad   :  { %v996_v6 = vpop.f32.mrb[51].mxu0  ;;  %v5037_v7 = vsel %vm1072_vm0, %v993_v62, -9e+15  ;;  %vm1075_vm3 = vcmp.ne.f32.partialorder %v3987_v4, 0.0 }
 0x2ae   :  { %1152 = vmax.xlane.f32.xlu0 %v5037_v7  ;;  %vm1073_vm2 = vcmp.ne.f32.partialorder %v996_v6, 0.0  ;;  %v5045_v63 = vsel %vm1075_vm3, %v3987_v4, -9e+15 }
 0x2af   :  { %v5040_v12 = vsel %vm1073_vm2, %v996_v6, -9e+15 }
 0x2b0   :  { %1154 = vmax.xlane.f32.xlu1 %v5040_v12 }
 0x2b2   :  { %1156 = vmax.xlane.f32.xlu0 %v5042_v16  ;;  %v3990_v3 = vpop.f32.mrb[52].mxu0 }
 0x2b3   :  { %v1009_v17 = vpop.f32.mrb[53].mxu0  ;;  %vm1078_vm4 = vcmp.ne.f32.partialorder %v3990_v3, 0.0 }
 0x2b4   :  { %1158 = vmax.xlane.f32.xlu1 %v5045_v63  ;;  %v3991_v18 = vpop.f32.mrb[54].mxu0  ;;  %v5049_v53 = vsel %vm1078_vm4, %v3990_v3, -9e+15  ;;  %vm1076_vm5 = vcmp.ne.f32.partialorder %v1009_v17, 0.0 }
 0x2b5   :  { %v1012_v48 = vpop.f32.mrb[55].mxu0  ;;  %vm1079_vm6 = vcmp.ne.f32.partialorder %v3991_v18, 0.0  ;;  %v5054_v22 = vsel %vm1076_vm5, %v1009_v17, -9e+15 }
 0x2b6   :  { %1164 = vmax.xlane.f32.xlu0 %v5049_v53  ;;  %v5052_v21 = vsel %vm1079_vm6, %v3991_v18, -9e+15  ;;  %vm1077_vm7 = vcmp.ne.f32.partialorder %v1012_v48, 0.0 }
 0x2b7   :  { %v5057_v33 = vsel %vm1077_vm7, %v1012_v48, -9e+15 }
 0x2b8   :  { %1166 = vmax.xlane.f32.xlu1 %v5052_v21 }
 0x2ba   :  { %1160 = vmax.xlane.f32.xlu0 %v5054_v22  ;;  %v3994_v35 = vpop.f32.mrb[56].mxu0 }
 0x2bb   :  { %v1025_v37 = vpop.f32.mrb[57].mxu0  ;;  %vm1082_vm9 = vcmp.ne.f32.partialorder %v3994_v35, 0.0 }
 0x2bc   :  { %1162 = vmax.xlane.f32.xlu1 %v5057_v33  ;;  %v3995_v44 = vpop.f32.mrb[58].mxu0  ;;  %vm1080_vm8 = vcmp.ne.f32.partialorder %v1025_v37, 0.0 }
 0x2bd   :  { %v1028_v38 = vpop.f32.mrb[59].mxu0  ;;  %v5088_v48 = vsel %vm1080_vm8, %v1025_v37, -9e+15  ;;  %vm1083_vm11 = vcmp.ne.f32.partialorder %v3995_v44, 0.0 }
 0x2be   :  { %vm1081_vm10 = vcmp.ne.f32.partialorder %v1028_v38, 0.0 }
 0x2c2   :  { %v5061_v42 = vpop.f32.mrb[60].mxu0 }
 0x2c3   :  { %v5063_v1 = vpop.f32.mrb[61].mxu0  ;;  %vm1086_vm13 = vcmp.ne.f32.partialorder %v5061_v42, 0.0 }
 0x2c4   :  { %v5065_v2 = vpop.f32.mrb[62].mxu0  ;;  %vm1084_vm12 = vcmp.ne.f32.partialorder %v5063_v1, 0.0 }
 0x2c5   :  { %v5067_v23 = vpop.f32.mrb[63].mxu0  ;;  %vm1087_vm15 = vcmp.ne.f32.partialorder %v5065_v2, 0.0 }
 0x2c6   :  { %vm1085_vm14 = vcmp.ne.f32.partialorder %v5067_v23, 0.0 }
 0x2fa   :  { %v1125_v39 = vpop.xlane.xlu1 %1124 }
 0x2fb   :  { %v1186_v55 = vsub.f32 %v4989_v8, %v1125_v39  ;;  %v1121_v13 = vpop.xlane.xlu0 %1120 }
 0x2fc   :  { %v1184_v36 = vsub.f32 %v4992_v20, %v1121_v13  ;;  %v5092_v13 = vsel %vm1082_vm9, %v3994_v35, -9e+15 }
 0x2fd   :  { %v1220_v52 = vmul.f32 1.442695, %v1186_v55 }
 0x2fe   :  { %v1216_v41 = vmul.f32 1.442695, %v1184_v36  ;;  %v1127_v45 = vpop.xlane.xlu1 %1126  ;;  %v5094_v36 = vsel %vm1081_vm10, %v1028_v38, -9e+15 }
 0x2ff   :  { %v1123_v10 = vpop.xlane.xlu0 %1122  ;;  %v1187_v11 = vsub.f32 %v4995_v25, %v1127_v45  ;;  %v5101_v45 = vsel %vm1083_vm11, %v3995_v44, -9e+15 }
 0x300   :  { %4222 = vpow2.f32 %v1216_v41  ;;  %v1185_v30 = vsub.f32 %v4998_v29, %v1123_v10 }
 0x301   :  { %4224 = vpow2.f32 %v1220_v52  ;;  %v1222_v58 = vmul.f32 1.442695, %v1187_v11 }
 0x302   :  { %v1218_v32 = vmul.f32 1.442695, %v1185_v30 }
 0x303   :  { %v1129_v54 = vpop.xlane.xlu0 %1128 }
 0x304   :  { %4226 = vpow2.f32 %v1218_v32  ;;  %v1188_v8 = vsub.f32 %v5001_v57, %v1129_v54 }
 0x305   :  { %v1131_v34 = vpop.xlane.xlu1 %1130  ;;  %4228 = vpow2.f32 %v1222_v58 }
 0x306   :  { %v1189_v60 = vsub.f32 %v5004_v61, %v1131_v34  ;;  %v1224_v62 = vmul.f32 1.442695, %v1188_v8  ;;  %v5119_v34 = vsel %vm1084_vm12, %v5063_v1, -9e+15  ;;  %v5128_v1 = vsel %vm1086_vm13, %v5061_v42, -9e+15 }
 0x307   :  { %v1133_v40 = vpop.xlane.xlu0 %1132  ;;  %v5140_v42 = vsel %vm1087_vm15, %v5065_v2, -9e+15 }
 0x308   :  { %v1190_v25 = vsub.f32 %v5007_v5, %v1133_v40  ;;  %v1226_v3 = vmul.f32 1.442695, %v1189_v60  ;;  %4230 = vpow2.f32 %v1224_v62  ;;  %v5131_v62 = vsel %vm1085_vm14, %v5067_v23, -9e+15 }
 0x309   :  { %v1135_v4 = vpop.xlane.xlu1 %1134 }
 0x30a   :  { %v5074_v20 = vpop.eup %4222  ;;  %v1228_v57 = vmul.f32 1.442695, %v1190_v25  ;;  %v1191_v61 = vsub.f32 %v5010_v15, %v1135_v4  ;;  %4232 = vpow2.f32 %v1226_v3 }
 0x30b   :  { %1280 = vadd.xlane.f32.xlu0 %v5074_v20  ;;  %v5079_v29 = vpop.eup %4224  ;;  %v1137_v17 = vpop.xlane.xlu0 %1136 }
 0x30c   :  { %4234 = vpow2.f32 %v1228_v57  ;;  %v1230_v39 = vmul.f32 1.442695, %v1191_v61  ;;  %v1192_v15 = vsub.f32 %v5013_v43, %v1137_v17 }
 0x30d   :  { %v1139_v5 = vpop.xlane.xlu1 %1138 }
 0x30e   :  { %v5081_v6 = vpop.eup %4226  ;;  %4236 = vpow2.f32 %v1230_v39  ;;  %v1193_v52 = vsub.f32 %v5016_v46, %v1139_v5  ;;  %v1232_v35 = vmul.f32 1.442695, %v1192_v15 }
 0x30f   :  { %1284 = vadd.xlane.f32.xlu0 %v5079_v29  ;;  %1282 = vadd.xlane.f32.xlu1 %v5081_v6  ;;  %v5086_v18 = vpop.eup %4228  ;;  %v1141_v55 = vpop.xlane.xlu0 %1140 }
 0x310   :  { %v1194_v38 = vsub.f32 %v5019_v49, %v1141_v55  ;;  %v1234_v43 = vmul.f32 1.442695, %v1193_v52  ;;  %4238 = vpow2.f32 %v1232_v35 }
 0x311   :  { %v1143_v37 = vpop.xlane.xlu1 %1142 }
 0x312   :  { %v5099_v41 = vpop.eup %4230  ;;  %v1195_v32 = vsub.f32 %v5022_v31, %v1143_v37  ;;  %v1236_v46 = vmul.f32 1.442695, %v1194_v38  ;;  %4240 = vpow2.f32 %v1234_v43 }
 0x313   :  { %1286 = vadd.xlane.f32.xlu1 %v5086_v18  ;;  %1168 = vmax.xlane.f32.xlu0 %v5088_v48  ;;  %v1145_v10 = vpop.xlane.xlu0 %1144 }
 0x314   :  { %v5107_v11 = vpop.eup %4232  ;;  %v1196_v44 = vsub.f32 %v5025_v59, %v1145_v10  ;;  %v1238_v31 = vmul.f32 1.442695, %v1195_v32  ;;  %4242 = vpow2.f32 %v1236_v46 }
 0x315   :  { %v1147_v54 = vpop.xlane.xlu1 %1146 }
 0x316   :  { %v5109_v30 = vpop.eup %4234  ;;  %v1197_v8 = vsub.f32 %v5028_v50, %v1147_v54  ;;  %v1240_v59 = vmul.f32 1.442695, %v1196_v44  ;;  %4244 = vpow2.f32 %v1238_v31 }
 0x317   :  { %1172 = vmax.xlane.f32.xlu0 %v5092_v13  ;;  %1170 = vmax.xlane.f32.xlu1 %v5094_v36  ;;  %v1149_v58 = vpop.xlane.xlu0 %1148 }
 0x318   :  { %v5116_v49 = vpop.eup %4236  ;;  %v1198_v40 = vsub.f32 %v5031_v56, %v1149_v58  ;;  %v1242_v25 = vmul.f32 1.442695, %v1197_v8  ;;  %4246 = vpow2.f32 %v1240_v59 }
 0x319   :  { %v1151_v60 = vpop.xlane.xlu1 %1150 }
 0x31a   :  { %v1244_v50 = vmul.f32 1.442695, %v1198_v40  ;;  %v1199_v4 = vsub.f32 %v5034_v24, %v1151_v60  ;;  %v5137_v56 = vpop.eup %4238  ;;  %4248 = vpow2.f32 %v1242_v25 }
 0x31b   :  { %1288 = vadd.xlane.f32.xlu0 %v5099_v41  ;;  %1174 = vmax.xlane.f32.xlu1 %v5101_v45 }
 0x31c   :  { %4250 = vpow2.f32 %v1244_v50  ;;  %v1246_v23 = vmul.f32 1.442695, %v1199_v4  ;;  %v5144_v3 = vpop.eup %4240 }
 0x31e   :  { %v5146_v17 = vpop.eup %4242  ;;  %4252 = vpow2.f32 %v1246_v23 }
 0x31f   :  { %1292 = vadd.xlane.f32.xlu0 %v5109_v30  ;;  %1290 = vadd.xlane.f32.xlu1 %v5107_v11 }
 0x320   :  { %v5150_v24 = vpop.eup %4244 }
 0x322   :  { %v5152_v2 = vpop.eup %4246 }
 0x323   :  { %1294 = vadd.xlane.f32.xlu1 %v5116_v49  ;;  %1176 = vmax.xlane.f32.xlu0 %v5119_v34 }
 0x324   :  { %v5156_v57 = vpop.eup %4248 }
 0x326   :  { %v5158_v61 = vpop.eup %4250 }
 0x327   :  { %1180 = vmax.xlane.f32.xlu0 %v5128_v1  ;;  %1178 = vmax.xlane.f32.xlu1 %v5131_v62 }
 0x328   :  { %v5162_v5 = vpop.eup %4252 }
 0x32b   :  { %1296 = vadd.xlane.f32.xlu0 %v5137_v56  ;;  %1182 = vmax.xlane.f32.xlu1 %v5140_v42 }
 0x32f   :  { %1300 = vadd.xlane.f32.xlu0 %v5146_v17  ;;  %1298 = vadd.xlane.f32.xlu1 %v5144_v3 }
 0x333   :  { %1304 = vadd.xlane.f32.xlu0 %v5152_v2  ;;  %1302 = vadd.xlane.f32.xlu1 %v5150_v24 }
 0x337   :  { %1308 = vadd.xlane.f32.xlu0 %v5158_v61  ;;  %1306 = vadd.xlane.f32.xlu1 %v5156_v57 }
 0x33b   :  { %v1153_v39 = vpop.xlane.xlu0 %1152  ;;  %1310 = vadd.xlane.f32.xlu1 %v5162_v5 }
 0x33c   :  { %v1200_v55 = vsub.f32 %v5037_v7, %v1153_v39 }
 0x33d   :  { %v1155_v15 = vpop.xlane.xlu1 %1154 }
 0x33e   :  { %v1248_v37 = vmul.f32 1.442695, %v1200_v55  ;;  %v1201_v52 = vsub.f32 %v5040_v12, %v1155_v15 }
 0x33f   :  { %v1157_v10 = vpop.xlane.xlu0 %1156 }
 0x340   :  { %4254 = vpow2.f32 %v1248_v37  ;;  %v1250_v35 = vmul.f32 1.442695, %v1201_v52  ;;  %v1202_v38 = vsub.f32 %v5042_v16, %v1157_v10 }
 0x341   :  { %v1159_v43 = vpop.xlane.xlu1 %1158 }
 0x342   :  { %4256 = vpow2.f32 %v1250_v35  ;;  %v1252_v32 = vmul.f32 1.442695, %v1202_v38  ;;  %v1203_v54 = vsub.f32 %v5045_v63, %v1159_v43 }
 0x343   :  { %v1165_v46 = vpop.xlane.xlu0 %1164 }
 0x344   :  { %4258 = vpow2.f32 %v1252_v32  ;;  %v1254_v44 = vmul.f32 1.442695, %v1203_v54  ;;  %v1206_v31 = vsub.f32 %v5049_v53, %v1165_v46 }
 0x345   :  { %v1167_v58 = vpop.xlane.xlu1 %1166 }
 0x346   :  { %4260 = vpow2.f32 %v1254_v44  ;;  %v1207_v16 = vsub.f32 %v5052_v21, %v1167_v58  ;;  %v1260_v25 = vmul.f32 1.442695, %v1206_v31 }
 0x347   :  { %v1161_v7 = vpop.xlane.xlu0 %1160 }
 0x348   :  { %v1204_v12 = vsub.f32 %v5054_v22, %v1161_v7  ;;  %v1262_v22 = vmul.f32 1.442695, %v1207_v16 }
 0x349   :  { %v1163_v8 = vpop.xlane.xlu1 %1162 }
 0x34a   :  { %v5171_v59 = vpop.eup %4254  ;;  %v1256_v40 = vmul.f32 1.442695, %v1204_v12  ;;  %v1205_v60 = vsub.f32 %v5057_v33, %v1163_v8 }
 0x34b   :  { %1312 = vadd.xlane.f32.xlu0 %v5171_v59 }
 0x34c   :  { %v5176_v63 = vpop.eup %4256  ;;  %4262 = vpow2.f32 %v1256_v40  ;;  %v1258_v50 = vmul.f32 1.442695, %v1205_v60 }
 0x34d   :  { %1314 = vadd.xlane.f32.xlu1 %v5176_v63 }
 0x34e   :  { %v5179_v53 = vpop.eup %4258  ;;  %4264 = vpow2.f32 %v1258_v50 }
 0x34f   :  { %1316 = vadd.xlane.f32.xlu0 %v5179_v53  ;;  %4266 = vpow2.f32 %v1260_v25 }
 0x350   :  { %v5182_v4 = vpop.eup %4260  ;;  %4268 = vpow2.f32 %v1262_v22 }
 0x351   :  { %1318 = vadd.xlane.f32.xlu1 %v5182_v4 }
 0x356   :  { %v5185_v21 = vpop.eup %4262 }
 0x357   :  { %1320 = vadd.xlane.f32.xlu0 %v5185_v21 }
 0x358   :  { %v5188_v33 = vpop.eup %4264 }
 0x359   :  { %1322 = vadd.xlane.f32.xlu1 %v5188_v33  ;;  %v5191_v23 = vpop.eup %4266 }
 0x35a   :  { %v5194_v39 = vpop.eup %4268 }
 0x35b   :  { %1324 = vadd.xlane.f32.xlu0 %v5191_v23 }
 0x35d   :  { %1326 = vadd.xlane.f32.xlu1 %v5194_v39 }
 0x398   :  { %v1281_v55 = vpop.xlane.xlu0 %1280 }
 0x399   :  { %4270 = vrcp.f32 %v1281_v55 }
 0x39c   :  { %v1285_v15 = vpop.xlane.xlu0 %1284  ;;  %v1283_v37 = vpop.xlane.xlu1 %1282 }
 0x39d   :  { %4272 = vrcp.f32 %v1285_v15 }
 0x39e   :  { %4274 = vrcp.f32 %v1283_v37 }
 0x3a0   :  { %v1287_v52 = vpop.xlane.xlu1 %1286  ;;  %v1169_v10 = vpop.xlane.xlu0 %1168 }
 0x3a1   :  { %4276 = vrcp.f32 %v1287_v52  ;;  %v1208_v35 = vsub.f32 %v5088_v48, %v1169_v10 }
 0x3a3   :  { %v4271_v38 = vpop.eup %4270  ;;  %v1264_v43 = vmul.f32 1.442695, %v1208_v35 }
 0x3a4   :  { %v1173_v32 = vpop.xlane.xlu0 %1172  ;;  %v1171_v54 = vpop.xlane.xlu1 %1170  ;;  %v1376_v46 = vmul.f32 %v4271_v38, %v5074_v20 }
 0x3a5   :  { %4278 = vpow2.f32 %v1264_v43  ;;  %v1210_v44 = vsub.f32 %v5092_v13, %v1173_v32  ;;  %v1209_v58 = vsub.f32 %v5094_v36, %v1171_v54 }
 0x3a6   :  { %3526 = vst [vmem:[#allocation13] sm:$0xff] %v1376_v46 }
 0x3a7   :  { %v4273_v7 = vpop.eup %4272  ;;  %v1268_v31 = vmul.f32 1.442695, %v1210_v44  ;;  %v1266_v12 = vmul.f32 1.442695, %v1209_v58 }
 0x3a8   :  { %v4275_v8 = vpop.eup %4274  ;;  %v1378_v16 = vmul.f32 %v4273_v7, %v5079_v29  ;;  %v1289_v40 = vpop.xlane.xlu0 %1288 }
 0x3a9   :  { %v1175_v48 = vpop.xlane.xlu1 %1174  ;;  %4280 = vpow2.f32 %v1268_v31  ;;  %v1377_v25 = vmul.f32 %v4275_v8, %v5081_v6 }
 0x3aa   :  { %v1211_v60 = vsub.f32 %v5101_v45, %v1175_v48  ;;  %3528 = vst [vmem:[#allocation13 + $0x10] sm:$0xff] %v1378_v16  ;;  %4282 = vpow2.f32 %v1266_v12 }
 0x3ab   :  { %v4277_v20 = vpop.eup %4276  ;;  %4284 = vrcp.f32 %v1289_v40  ;;  %v1408_v36 = vpack.c.bf16 %v1377_v25, %v1376_v46  ;;  %3527 = vst [vmem:[#allocation13 + $0x8] sm:$0xff] %v1377_v25 }
 0x3ac   :  { %v1270_v13 = vmul.f32 1.442695, %v1211_v60  ;;  %v1379_v50 = vmul.f32 %v4277_v20, %v5086_v18  ;;  %v1293_v22 = vpop.xlane.xlu0 %1292 }
 0x3ad   :  { %v1291_v55 = vpop.xlane.xlu1 %1290  ;;  %4016 = vmatprep.mubr.bf16.mxu1 %v1408_v36 }
 0x3ae   :  { %4286 = vpow2.f32 %v1270_v13  ;;  %3529 = vst [vmem:[#allocation13 + $0x18] sm:$0xff] %v1379_v50  ;;  %v1409_v29 = vpack.c.bf16 %v1379_v50, %v1378_v16 }
 0x3af   :  { %4288 = vrcp.f32 %v1293_v22  ;;  %v5205_v15 = vpop.eup %4278 }
 0x3b0   :  { %4290 = vrcp.f32 %v1291_v55  ;;  %4017 = vmatmul.mubr.bf16.vlgmr.msra.gmra.mrb[64].mxu1 %v1409_v29  ;;  %1328 = vadd.xlane.f32.xlu0 %v5205_v15  ;;  %v1177_v45 = vpop.xlane.xlu0 %1176 }
 0x3b1   :  { %v1295_v6 = vpop.xlane.xlu1 %1294  ;;  %4033 = vmatpush3.bf16.msra.mxu1 %v4912_v26  ;;  %v1212_v18 = vsub.f32 %v5119_v34, %v1177_v45 }
 0x3b2   :  { %4292 = vrcp.f32 %v1295_v6  ;;  %4034 = vmatprep.subr.bf16.mxu1 %v4910_v19 }
 0x3b3   :  { %v5211_v37 = vpop.eup %4280  ;;  %v1272_v52 = vmul.f32 1.442695, %v1212_v18 }
 0x3b4   :  { %v5213_v10 = vpop.eup %4282  ;;  %1332 = vadd.xlane.f32.xlu0 %v5211_v37  ;;  %v1181_v35 = vpop.xlane.xlu0 %1180 }
 0x3b5   :  { %v1179_v38 = vpop.xlane.xlu1 %1178  ;;  %v4285_v43 = vpop.eup %4284  ;;  %4294 = vpow2.f32 %v1272_v52  ;;  %4035 = vmatpush3.bf16.msra.mxu1 %v4910_v19  ;;  %v1214_v26 = vsub.f32 %v5128_v1, %v1181_v35  ;;  %1330 = vadd.xlane.f32.xlu1 %v5213_v10 }
 0x3b6   :  { %v1213_v34 = vsub.f32 %v5131_v62, %v1179_v38  ;;  %4036 = vmatprep.subr.bf16.mxu1 %v4932_v28  ;;  %v1380_v32 = vmul.f32 %v4285_v43, %v5099_v41 }
 0x3b7   :  { %v1276_v46 = vmul.f32 1.442695, %v1214_v26 }
 0x3b8   :  { %v5222_v54 = vpop.eup %4286  ;;  %v1274_v44 = vmul.f32 1.442695, %v1213_v34  ;;  %v1297_v7 = vpop.xlane.xlu0 %1296  ;;  %3530 = vst [vmem:[#allocation13 + $0x20] sm:$0xff] %v1380_v32 }
 0x3b9   :  { %v4289_v58 = vpop.eup %4288  ;;  %v1183_v31 = vpop.xlane.xlu1 %1182  ;;  %4296 = vpow2.f32 %v1276_v46  ;;  %4037 = vmatpush3.bf16.msra.mxu1 %v4932_v28  ;;  %1334 = vadd.xlane.f32.xlu1 %v5222_v54 }
 0x3ba   :  { %v4291_v12 = vpop.eup %4290  ;;  %v1215_v19 = vsub.f32 %v5140_v42, %v1183_v31  ;;  %v1382_v1 = vmul.f32 %v4289_v58, %v5109_v30  ;;  %4298 = vpow2.f32 %v1274_v44  ;;  %4038 = vmatprep.subr.bf16.mxu1 %v4927_v47  ;;  %v4174_v31 = vld [vmem:[#allocation8] sm:$0xff]  }
 0x3bb   :  { %v1381_v41 = vmul.f32 %v4291_v12, %v5107_v11  ;;  %4300 = vrcp.f32 %v1297_v7  ;;  %v4175_v12 = vld [vmem:[#allocation8 + $0x8] sm:$0xff]   ;;  %4064 = vmatprep.subr.bf16.mxu0 %v4174_v31 }
 0x3bc   :  { %v4293_v62 = vpop.eup %4292  ;;  %v1278_v8 = vmul.f32 1.442695, %v1215_v19  ;;  %3532 = vst [vmem:[#allocation13 + $0x30] sm:$0xff] %v1382_v1  ;;  %v1301_v40 = vpop.xlane.xlu0 %1300  ;;  %4065 = vmatpush3.bf16.msra.mxu0 %v4174_v31 }
 0x3bd   :  { %v1410_v16 = vpack.c.bf16 %v1381_v41, %v1380_v32  ;;  %3531 = vst [vmem:[#allocation13 + $0x28] sm:$0xff] %v1381_v41  ;;  %v1299_v48 = vpop.xlane.xlu1 %1298  ;;  %v1383_v28 = vmul.f32 %v4293_v62, %v5116_v49  ;;  %4039 = vmatpush3.bf16.msra.mxu1 %v4927_v47  ;;  %4066 = vmatprep.subr.bf16.mxu0 %v4175_v12 }
 0x3be   :  { %4302 = vpow2.f32 %v1278_v8  ;;  %4040 = vmatprep.subr.bf16.mxu1 %v4946_v27 }
 0x3bf   :  { %4020 = vmatprep.mubr.bf16.mxu1 %v1410_v16  ;;  %4304 = vrcp.f32 %v1301_v40  ;;  %v1411_v30 = vpack.c.bf16 %v1383_v28, %v1382_v1  ;;  %3533 = vst [vmem:[#allocation13 + $0x38] sm:$0xff] %v1383_v28  ;;  %v5233_v11 = vpop.eup %4294 }
 0x3c0   :  { %4306 = vrcp.f32 %v1299_v48  ;;  %1336 = vadd.xlane.f32.xlu0 %v5233_v11  ;;  %v1305_v42 = vpop.xlane.xlu0 %1304  ;;  %4067 = vmatpush3.bf16.msra.mxu0 %v4175_v12 }
 0x3c1   :  { %4021 = vmatmul.mubr.bf16.gmra.mrb[68].mxu1 %v1411_v30  ;;  %v1303_v60 = vpop.xlane.xlu1 %1302  ;;  %4308 = vrcp.f32 %v1305_v42 }
 0x3c2   :  { %4041 = vmatpush3.bf16.msra.mxu1 %v4946_v27  ;;  %4310 = vrcp.f32 %v1303_v60 }
 0x3c3   :  { %4042 = vmatprep.subr.bf16.mxu1 %v4943_v9  ;;  %v5238_v47 = vpop.eup %4296 }
 0x3c4   :  { %v5240_v49 = vpop.eup %4298  ;;  %1340 = vadd.xlane.f32.xlu0 %v5238_v47  ;;  %v1309_v25 = vpop.xlane.xlu0 %1308 }
 0x3c5   :  { %v1307_v20 = vpop.xlane.xlu1 %1306  ;;  %v4301_v13 = vpop.eup %4300  ;;  %4312 = vrcp.f32 %v1309_v25  ;;  %1338 = vadd.xlane.f32.xlu1 %v5240_v49 }
 0x3c6   :  { %4043 = vmatpush3.bf16.msra.mxu1 %v4943_v9  ;;  %4314 = vrcp.f32 %v1307_v20  ;;  %v1384_v27 = vmul.f32 %v4301_v13, %v5137_v56 }
 0x3c7   :  { %4044 = vmatprep.subr.bf16.mxu1 %v4960_v14 }
 0x3c8   :  { %v5247_v36 = vpop.eup %4302  ;;  %3534 = vst [vmem:[#allocation13 + $0x40] sm:$0xff] %v1384_v27 }
 0x3c9   :  { %v4305_v50 = vpop.eup %4304  ;;  %v1311_v22 = vpop.xlane.xlu1 %1310  ;;  %1342 = vadd.xlane.f32.xlu1 %v5247_v36 }
 0x3ca   :  { %v4307_v55 = vpop.eup %4306  ;;  %4045 = vmatpush3.bf16.msra.mxu1 %v4960_v14  ;;  %4316 = vrcp.f32 %v1311_v22  ;;  %v1386_v9 = vmul.f32 %v4305_v50, %v5146_v17  ;;  %v4181_v22 = vld [vmem:[#allocation8 + $0x38] sm:$0xff]  }
 0x3cb   :  { %4046 = vmatprep.subr.bf16.mxu1 %v4957_v51  ;;  %v1385_v29 = vmul.f32 %v4307_v55, %v5144_v3  ;;  %v4309_v6 = vpop.eup %4308 }
 0x3cc   :  { %3536 = vst [vmem:[#allocation13 + $0x50] sm:$0xff] %v1386_v9  ;;  %v4311_v56 = vpop.eup %4310  ;;  %v1388_v18 = vmul.f32 %v4309_v6, %v5152_v2 }
 0x3cd   :  { %v1412_v45 = vpack.c.bf16 %v1385_v29, %v1384_v27  ;;  %3535 = vst [vmem:[#allocation13 + $0x48] sm:$0xff] %v1385_v29  ;;  %v1387_v14 = vmul.f32 %v4311_v56, %v5150_v24 }
 0x3ce   :  { %4047 = vmatpush3.bf16.msra.mxu1 %v4957_v51  ;;  %3538 = vst [vmem:[#allocation13 + $0x60] sm:$0xff] %v1388_v18 }
 0x3cf   :  { %4024 = vmatprep.mubr.bf16.mxu1 %v1412_v45  ;;  %v4313_v52 = vpop.eup %4312  ;;  %v1413_v35 = vpack.c.bf16 %v1387_v14, %v1386_v9  ;;  %3537 = vst [vmem:[#allocation13 + $0x58] sm:$0xff] %v1387_v14 }
 0x3d0   :  { %v4315_v17 = vpop.eup %4314  ;;  %v1390_v38 = vmul.f32 %v4313_v52, %v5158_v61 }
 0x3d1   :  { %4025 = vmatmul.mubr.bf16.gmra.mrb[72].mxu1 %v1413_v35  ;;  %v1389_v3 = vmul.f32 %v4315_v17, %v5156_v57 }
 0x3d2   :  { %3540 = vst [vmem:[#allocation13 + $0x70] sm:$0xff] %v1390_v38 }
 0x3d3   :  { %v1414_v26 = vpack.c.bf16 %v1389_v3, %v1388_v18  ;;  %3539 = vst [vmem:[#allocation13 + $0x68] sm:$0xff] %v1389_v3 }
 0x3d4   :  { %v4317_v43 = vpop.eup %4316 }
 0x3d5   :  { %v1391_v2 = vmul.f32 %v4317_v43, %v5162_v5  ;;  %4028 = vmatprep.mubr.bf16.mxu1 %v1414_v26 }
 0x3d7   :  { %v1415_v51 = vpack.c.bf16 %v1391_v2, %v1390_v38  ;;  %3541 = vst [vmem:[#allocation13 + $0x78] sm:$0xff] %v1391_v2 }
 0x3d8   :  { %v1313_v24 = vpop.xlane.xlu0 %1312 }
 0x3d9   :  { %4318 = vrcp.f32 %v1313_v24  ;;  %4029 = vmatmul.mubr.bf16.gmra.mrb[76].mxu1 %v1415_v51 }
 0x3da   :  { %v1315_v34 = vpop.xlane.xlu1 %1314 }
 0x3db   :  { %4320 = vrcp.f32 %v1315_v34 }
 0x3dc   :  { %v1317_v32 = vpop.xlane.xlu0 %1316 }
 0x3dd   :  { %4322 = vrcp.f32 %v1317_v32 }
 0x3de   :  { %v1319_v61 = vpop.xlane.xlu1 %1318 }
 0x3df   :  { %4324 = vrcp.f32 %v1319_v61 }
 0x3e3   :  { %v4319_v46 = vpop.eup %4318 }
 0x3e4   :  { %v1321_v57 = vpop.xlane.xlu0 %1320  ;;  %v1392_v44 = vmul.f32 %v4319_v46, %v5171_v59 }
 0x3e5   :  { %v4321_v58 = vpop.eup %4320  ;;  %4326 = vrcp.f32 %v1321_v57 }
 0x3e6   :  { %v1323_v7 = vpop.xlane.xlu1 %1322  ;;  %v1393_v5 = vmul.f32 %v4321_v58, %v5176_v63  ;;  %3542 = vst [vmem:[#allocation13 + $0x80] sm:$0xff] %v1392_v44  ;;  %v4176_v63 = vld [vmem:[#allocation8 + $0x10] sm:$0xff]  }
 0x3e7   :  { %v4323_v19 = vpop.eup %4322  ;;  %4328 = vrcp.f32 %v1323_v7  ;;  %4068 = vmatprep.subr.bf16.mxu0 %v4176_v63 }
 0x3e8   :  { %v1394_v1 = vmul.f32 %v4323_v19, %v5179_v53  ;;  %v1325_v41 = vpop.xlane.xlu0 %1324  ;;  %v1416_v62 = vpack.c.bf16 %v1393_v5, %v1392_v44  ;;  %3543 = vst [vmem:[#allocation13 + $0x88] sm:$0xff] %v1393_v5  ;;  %v4177_v53 = vld [vmem:[#allocation8 + $0x18] sm:$0xff]   ;;  %4069 = vmatpush3.bf16.msra.mxu0 %v4176_v63 }
 0x3e9   :  { %v4325_v8 = vpop.eup %4324  ;;  %4330 = vrcp.f32 %v1325_v41  ;;  %4070 = vmatprep.subr.bf16.mxu0 %v4177_v53 }
 0x3ea   :  { %3544 = vst [vmem:[#allocation13 + $0x90] sm:$0xff] %v1394_v1  ;;  %v1395_v59 = vmul.f32 %v4325_v8, %v5182_v4  ;;  %4048 = vmatprep.mubr.bf16.mxu1 %v1416_v62  ;;  %v1327_v16 = vpop.xlane.xlu1 %1326  ;;  %v4178_v4 = vld [vmem:[#allocation8 + $0x20] sm:$0xff]  }
 0x3eb   :  { %4332 = vrcp.f32 %v1327_v16 }
 0x3ec   :  { %3545 = vst [vmem:[#allocation13 + $0x98] sm:$0xff] %v1395_v59  ;;  %v1417_v40 = vpack.c.bf16 %v1395_v59, %v1394_v1  ;;  %4071 = vmatpush3.bf16.msra.mxu0 %v4177_v53 }
 0x3ed   :  { %4072 = vmatprep.subr.bf16.mxu0 %v4178_v4 }
 0x3ee   :  { %4049 = vmatmul.mubr.bf16.vlgmr.msra.gmra.mrb[80].mxu1 %v1417_v40 }
 0x3ef   :  { %v4327_v48 = vpop.eup %4326 }
 0x3f0   :  { %v1396_v28 = vmul.f32 %v4327_v48, %v5185_v21  ;;  %v4179_v21 = vld [vmem:[#allocation8 + $0x28] sm:$0xff]   ;;  %4073 = vmatpush3.bf16.msra.mxu0 %v4178_v4 }
 0x3f1   :  { %v4329_v30 = vpop.eup %4328  ;;  %4074 = vmatprep.subr.bf16.mxu0 %v4179_v21 }
 0x3f2   :  { %v1397_v42 = vmul.f32 %v4329_v30, %v5188_v33  ;;  %3546 = vst [vmem:[#allocation13 + $0xa0] sm:$0xff] %v1396_v28  ;;  %v4180_v33 = vld [vmem:[#allocation8 + $0x30] sm:$0xff]  }
 0x3f3   :  { %v4331_v60 = vpop.eup %4330 }
 0x3f4   :  { %v1418_v25 = vpack.c.bf16 %v1397_v42, %v1396_v28  ;;  %3547 = vst [vmem:[#allocation13 + $0xa8] sm:$0xff] %v1397_v42  ;;  %v1398_v20 = vmul.f32 %v4331_v60, %v5191_v23  ;;  %4075 = vmatpush3.bf16.msra.mxu0 %v4179_v21 }
 0x3f5   :  { %v4333_v13 = vpop.eup %4332  ;;  %4076 = vmatprep.subr.bf16.mxu0 %v4180_v33 }
 0x3f6   :  { %4052 = vmatprep.mubr.bf16.mxu1 %v1418_v25  ;;  %v1399_v27 = vmul.f32 %v4333_v13, %v5194_v39  ;;  %3548 = vst [vmem:[#allocation13 + $0xb0] sm:$0xff] %v1398_v20 }
 0x3f8   :  { %v1419_v50 = vpack.c.bf16 %v1399_v27, %v1398_v20  ;;  %3549 = vst [vmem:[#allocation13 + $0xb8] sm:$0xff] %v1399_v27  ;;  %4077 = vmatpush3.bf16.msra.mxu0 %v4180_v33 }
 0x3f9   :  { %4078 = vmatprep.subr.bf16.mxu0 %v4181_v22 }
 0x3fa   :  { %4053 = vmatmul.mubr.bf16.gmra.mrb[84].mxu1 %v1419_v50 }
 0x3fc   :  { %4079 = vmatpush3.bf16.msra.mxu0 %v4181_v22 }
 0x43d   :  { %v1329_v23 = vpop.xlane.xlu0 %1328 }
 0x43e   :  { %4334 = vrcp.f32 %v1329_v23 }
 0x441   :  { %v1333_v55 = vpop.xlane.xlu0 %1332 }
 0x442   :  { %4336 = vrcp.f32 %v1333_v55  ;;  %v1331_v39 = vpop.xlane.xlu1 %1330 }
 0x443   :  { %4338 = vrcp.f32 %v1331_v39 }
 0x446   :  { %v1335_v9 = vpop.xlane.xlu1 %1334 }
 0x447   :  { %4340 = vrcp.f32 %v1335_v9 }
 0x448   :  { %v4335_v29 = vpop.eup %4334 }
 0x449   :  { %v1400_v6 = vmul.f32 %v4335_v29, %v5205_v15 }
 0x44b   :  { %3550 = vst [vmem:[#allocation13 + $0xc0] sm:$0xff] %v1400_v6 }
 0x44c   :  { %v4337_v56 = vpop.eup %4336 }
 0x44d   :  { %v4339_v45 = vpop.eup %4338  ;;  %v1337_v18 = vpop.xlane.xlu0 %1336  ;;  %v1402_v14 = vmul.f32 %v4337_v56, %v5211_v37 }
 0x44e   :  { %4342 = vrcp.f32 %v1337_v18  ;;  %v1401_v52 = vmul.f32 %v4339_v45, %v5213_v10 }
 0x44f   :  { %3552 = vst [vmem:[#allocation13 + $0xd0] sm:$0xff] %v1402_v14 }
 0x450   :  { %v1420_v35 = vpack.c.bf16 %v1401_v52, %v1400_v6  ;;  %3551 = vst [vmem:[#allocation13 + $0xc8] sm:$0xff] %v1401_v52 }
 0x451   :  { %v4341_v17 = vpop.eup %4340  ;;  %v1341_v38 = vpop.xlane.xlu0 %1340 }
 0x452   :  { %4344 = vrcp.f32 %v1341_v38  ;;  %4056 = vmatprep.mubr.bf16.mxu1 %v1420_v35  ;;  %v1339_v3 = vpop.xlane.xlu1 %1338  ;;  %v1403_v43 = vmul.f32 %v4341_v17, %v5222_v54  ;;  %v1651_v38 = vld [vmem:[#allocation3] sm:$0xff] }
 0x453   :  { %4346 = vrcp.f32 %v1339_v3 }
 0x454   :  { %v1421_v15 = vpack.c.bf16 %v1403_v43, %v1402_v14  ;;  %3553 = vst [vmem:[#allocation13 + $0xd8] sm:$0xff] %v1403_v43 }
 0x456   :  { %4057 = vmatmul.mubr.bf16.gmra.mrb[88].mxu1 %v1421_v15  ;;  %v1343_v26 = vpop.xlane.xlu1 %1342  ;;  %v1652_v15 = vld [vmem:[#allocation3 + $0x8] sm:$0xff] }
 0x457   :  { %4348 = vrcp.f32 %v1343_v26 }
 0x458   :  { %v4343_v37 = vpop.eup %4342 }
 0x459   :  { %v1404_v2 = vmul.f32 %v4343_v37, %v5233_v11 }
 0x45b   :  { %3554 = vst [vmem:[#allocation13 + $0xe0] sm:$0xff] %v1404_v2 }
 0x45c   :  { %v4345_v10 = vpop.eup %4344 }
 0x45d   :  { %v4347_v51 = vpop.eup %4346  ;;  %v1406_v24 = vmul.f32 %v4345_v10, %v5238_v47 }
 0x45e   :  { %v1405_v34 = vmul.f32 %v4347_v51, %v5240_v49 }
 0x45f   :  { %3556 = vst [vmem:[#allocation13 + $0xf0] sm:$0xff] %v1406_v24 }
 0x460   :  { %v1422_v32 = vpack.c.bf16 %v1405_v34, %v1404_v2  ;;  %3555 = vst [vmem:[#allocation13 + $0xe8] sm:$0xff] %v1405_v34  ;;  %v1653_v2 = vld [vmem:[#allocation3 + $0x10] sm:$0xff] }
 0x461   :  { %v4349_v54 = vpop.eup %4348 }
 0x462   :  { %4060 = vmatprep.mubr.bf16.mxu1 %v1422_v32  ;;  %v1407_v61 = vmul.f32 %v4349_v54, %v5247_v36  ;;  %v1655_v54 = vld [vmem:[#allocation3 + $0x20] sm:$0xff] }
 0x464   :  { %v1423_v46 = vpack.c.bf16 %v1407_v61, %v1406_v24  ;;  %3557 = vst [vmem:[#allocation13 + $0xf8] sm:$0xff] %v1407_v61  ;;  %v1654_v24 = vld [vmem:[#allocation3 + $0x18] sm:$0xff] }
 0x466   :  { %4061 = vmatmul.mubr.bf16.gmra.mrb[92].mxu1 %v1423_v46 }
 0x467   :  { %2479 = vmatprep.mubr.bf16.mxu1 %v4653_v0 }
 0x483   :  { %v4018_v11 = vpop.f32.mrb[64].mxu1 }
 0x484   :  { %v1458_v57 = vpop.f32.mrb[65].mxu1 }
 0x485   :  { %v4019_v44 = vpop.f32.mrb[66].mxu1 }
 0x486   :  { %v1619_v58 = vpack.c.bf16 %v4019_v44, %v4018_v11  ;;  %v1461_v7 = vpop.f32.mrb[67].mxu1  ;;  %v1656_v11 = vld [vmem:[#allocation3 + $0x28] sm:$0xff] }
 0x487   :  { %v1618_v47 = vpack.c.bf16 %v1461_v7, %v1458_v57 }
 0x489   :  { %4080 = vmatprep.mubr.bf16.mxu0 %v1618_v47 }
 0x48a   :  { %4081 = vmatmul.mubr.bf16.vlgmr.msra.gmra.mrb[64].mxu0 %v1619_v58  ;;  %v1657_v58 = vld [vmem:[#allocation3 + $0x30] sm:$0xff] }
 0x494   :  { %v4022_v49 = vpop.f32.mrb[68].mxu1 }
 0x495   :  { %v1474_v5 = vpop.f32.mrb[69].mxu1 }
 0x496   :  { %v4023_v31 = vpop.f32.mrb[70].mxu1 }
 0x497   :  { %v1621_v12 = vpack.c.bf16 %v4023_v31, %v4022_v49  ;;  %v1477_v19 = vpop.f32.mrb[71].mxu1  ;;  %v1658_v49 = vld [vmem:[#allocation3 + $0x38] sm:$0xff] }
 0x498   :  { %v1620_v1 = vpack.c.bf16 %v1477_v19, %v1474_v5 }
 0x49a   :  { %4084 = vmatprep.mubr.bf16.mxu0 %v1620_v1 }
 0x49b   :  { %4085 = vmatmul.mubr.bf16.gmra.mrb[68].mxu0 %v1621_v12  ;;  %v1659_v12 = vld [vmem:[#allocation3 + $0x40] sm:$0xff] }
 0x4a4   :  { %v4026_v36 = vpop.f32.mrb[72].mxu1 }
 0x4a5   :  { %v1490_v41 = vpop.f32.mrb[73].mxu1 }
 0x4a6   :  { %v4027_v62 = vpop.f32.mrb[74].mxu1 }
 0x4a7   :  { %v1623_v8 = vpack.c.bf16 %v4027_v62, %v4026_v36  ;;  %v1493_v59 = vpop.f32.mrb[75].mxu1  ;;  %v1660_v36 = vld [vmem:[#allocation3 + $0x48] sm:$0xff] }
 0x4a8   :  { %v1622_v16 = vpack.c.bf16 %v1493_v59, %v1490_v41 }
 0x4aa   :  { %4088 = vmatprep.mubr.bf16.mxu0 %v1622_v16 }
 0x4ab   :  { %4089 = vmatmul.mubr.bf16.gmra.mrb[72].mxu0 %v1623_v8  ;;  %v1661_v8 = vld [vmem:[#allocation3 + $0x50] sm:$0xff] }
 0x4ac   :  { %v4030_v63 = vpop.f32.mrb[76].mxu1 }
 0x4ad   :  { %v1506_v40 = vpop.f32.mrb[77].mxu1 }
 0x4ae   :  { %v4031_v53 = vpop.f32.mrb[78].mxu1 }
 0x4af   :  { %v1625_v48 = vpack.c.bf16 %v4031_v53, %v4030_v63  ;;  %v1509_v28 = vpop.f32.mrb[79].mxu1  ;;  %v1662_v63 = vld [vmem:[#allocation3 + $0x58] sm:$0xff]  ;;  %v1663_v53 = vld [vmem:[#allocation3 + $0x60] sm:$0xff] }
 0x4b0   :  { %v1624_v30 = vpack.c.bf16 %v1509_v28, %v1506_v40 }
 0x4b2   :  { %4092 = vmatprep.mubr.bf16.mxu0 %v1624_v30 }
 0x4b3   :  { %4093 = vmatmul.mubr.bf16.gmra.mrb[76].mxu0 %v1625_v48 }
 0x4c1   :  { %v4050_v42 = vpop.f32.mrb[80].mxu1 }
 0x4c2   :  { %v1555_v4 = vpop.f32.mrb[81].mxu1 }
 0x4c3   :  { %v4051_v60 = vpop.f32.mrb[82].mxu1 }
 0x4c4   :  { %v1627_v25 = vpack.c.bf16 %v4051_v60, %v4050_v42  ;;  %v1558_v20 = vpop.f32.mrb[83].mxu1  ;;  %v1664_v42 = vld [vmem:[#allocation3 + $0x68] sm:$0xff] }
 0x4c5   :  { %v1626_v13 = vpack.c.bf16 %v1558_v20, %v1555_v4 }
 0x4c7   :  { %4096 = vmatprep.mubr.bf16.mxu0 %v1626_v13 }
 0x4c8   :  { %4097 = vmatmul.mubr.bf16.gmra.mrb[80].mxu0 %v1627_v25  ;;  %v1665_v25 = vld [vmem:[#allocation3 + $0x70] sm:$0xff] }
 0x4cd   :  { %v4054_v27 = vpop.f32.mrb[84].mxu1 }
 0x4ce   :  { %v1571_v21 = vpop.f32.mrb[85].mxu1 }
 0x4cf   :  { %v4055_v50 = vpop.f32.mrb[86].mxu1 }
 0x4d0   :  { %v1629_v33 = vpack.c.bf16 %v4055_v50, %v4054_v27  ;;  %v1574_v22 = vpop.f32.mrb[87].mxu1  ;;  %v1666_v27 = vld [vmem:[#allocation3 + $0x78] sm:$0xff] }
 0x4d1   :  { %v1628_v23 = vpack.c.bf16 %v1574_v22, %v1571_v21 }
 0x4d3   :  { %4100 = vmatprep.mubr.bf16.mxu0 %v1628_v23 }
 0x4d4   :  { %4101 = vmatmul.mubr.bf16.gmra.mrb[84].mxu0 %v1629_v33  ;;  %v1667_v33 = vld [vmem:[#allocation3 + $0x80] sm:$0xff] }
 0x529   :  { %v4058_v55 = vpop.f32.mrb[88].mxu1 }
 0x52a   :  { %v1587_v39 = vpop.f32.mrb[89].mxu1 }
 0x52b   :  { %v4059_v9 = vpop.f32.mrb[90].mxu1 }
 0x52c   :  { %v1631_v29 = vpack.c.bf16 %v4059_v9, %v4058_v55  ;;  %v1590_v6 = vpop.f32.mrb[91].mxu1  ;;  %v1668_v55 = vld [vmem:[#allocation3 + $0x88] sm:$0xff] }
 0x52d   :  { %v1630_v56 = vpack.c.bf16 %v1590_v6, %v1587_v39 }
 0x52f   :  { %4104 = vmatprep.mubr.bf16.mxu0 %v1630_v56 }
 0x530   :  { %4105 = vmatmul.mubr.bf16.gmra.mrb[88].mxu0 %v1631_v29  ;;  %v1669_v29 = vld [vmem:[#allocation3 + $0x90] sm:$0xff] }
 0x539   :  { %v4062_v45 = vpop.f32.mrb[92].mxu1 }
 0x53a   :  { %v1603_v18 = vpop.f32.mrb[93].mxu1 }
 0x53b   :  { %v4063_v14 = vpop.f32.mrb[94].mxu1 }
 0x53c   :  { %v1633_v52 = vpack.c.bf16 %v4063_v14, %v4062_v45  ;;  %v1606_v35 = vpop.f32.mrb[95].mxu1  ;;  %v1670_v45 = vld [vmem:[#allocation3 + $0x98] sm:$0xff] }
 0x53d   :  { %v1632_v17 = vpack.c.bf16 %v1606_v35, %v1603_v18 }
 0x53f   :  { %4108 = vmatprep.mubr.bf16.mxu0 %v1632_v17 }
 0x540   :  { %4109 = vmatmul.mubr.bf16.gmra.mrb[92].mxu0 %v1633_v52 }
 0x55d   :  { %v4082_v3 = vpop.f32.mrb[64].mxu0 }
 0x55e   :  { %v1765_v43 = vpop.f32.mrb[65].mxu0  ;;  %v5282_v34 = vadd.f32 %v4082_v3, %v1653_v2  ;;  %v4182_v3 = vld [vmem:[#allocation9] ss:$8 sps:$4 sm:$0xff]  }
 0x55f   :  { %v5277_v26 = vadd.f32 %v1765_v43, %v1651_v38  ;;  %v4083_v37 = vpop.f32.mrb[66].mxu0  ;;  %v4184_v43 = vld [vmem:[#allocation9 + $0x4] ss:$8 sps:$4 sm:$0xff]  }
 0x560   :  { %v1768_v10 = vpop.f32.mrb[67].mxu0  ;;  %v5285_v32 = vadd.f32 %v4083_v37, %v1654_v24  ;;  %2447 = vmatprep.subr.bf16.mxu1 %v4184_v43  ;;  %v4185_v37 = vld [vmem:[#allocation9 + $0x10] ss:$8 sps:$4 sm:$0xff]   ;;  %v4193_v43 = vld [vmem:[#allocation9 + $0x34] ss:$8 sps:$4 sm:$0xff]  }
 0x561   :  { %v5279_v51 = vadd.f32 %v1768_v10, %v1652_v15  ;;  %1894 = vadd.xlane.f32.xlu0 %v5277_v26  ;;  %v4187_v15 = vld [vmem:[#allocation9 + $0x14] ss:$8 sps:$4 sm:$0xff]   ;;  %2448 = vmatpush1.bf16.msra.mxu1 %v4182_v3 }
 0x562   :  { %2449 = vmatprep.subr.bf16.mxu1 %v4187_v15 }
 0x563   :  { %1896 = vadd.xlane.f32.xlu1 %v5279_v51 }
 0x565   :  { %1898 = vadd.xlane.f32.xlu0 %v5282_v34  ;;  %2450 = vmatpush1.bf16.msra.mxu1 %v4185_v37 }
 0x567   :  { %1900 = vadd.xlane.f32.xlu1 %v5285_v32 }
 0x56e   :  { %v4086_v61 = vpop.f32.mrb[68].mxu0 }
 0x56f   :  { %v1781_v46 = vpop.f32.mrb[69].mxu0  ;;  %v5294_v5 = vadd.f32 %v4086_v61, %v1657_v58 }
 0x570   :  { %v5289_v57 = vadd.f32 %v1781_v46, %v1655_v54  ;;  %v4087_v44 = vpop.f32.mrb[70].mxu0 }
 0x571   :  { %v1784_v7 = vpop.f32.mrb[71].mxu0  ;;  %v5297_v31 = vadd.f32 %v4087_v44, %v1658_v49 }
 0x572   :  { %v5291_v47 = vadd.f32 %v1784_v7, %v1656_v11  ;;  %1902 = vadd.xlane.f32.xlu0 %v5289_v57  ;;  %v1671_v7 = vld [vmem:[#allocation3 + $0xa0] sm:$0xff] }
 0x574   :  { %1904 = vadd.xlane.f32.xlu1 %v5291_v47 }
 0x576   :  { %1906 = vadd.xlane.f32.xlu0 %v5294_v5 }
 0x578   :  { %1908 = vadd.xlane.f32.xlu1 %v5297_v31 }
 0x57e   :  { %v4090_v19 = vpop.f32.mrb[72].mxu0 }
 0x57f   :  { %v1797_v1 = vpop.f32.mrb[73].mxu0  ;;  %v5306_v40 = vadd.f32 %v4090_v19, %v1661_v8 }
 0x580   :  { %v5301_v41 = vadd.f32 %v1797_v1, %v1659_v12  ;;  %v4091_v62 = vpop.f32.mrb[74].mxu0  ;;  %v1672_v1 = vld [vmem:[#allocation3 + $0xa8] sm:$0xff] }
 0x581   :  { %v1800_v59 = vpop.f32.mrb[75].mxu0  ;;  %v5309_v48 = vadd.f32 %v4091_v62, %v1662_v63 }
 0x582   :  { %v5303_v16 = vadd.f32 %v1800_v59, %v1660_v36  ;;  %1910 = vadd.xlane.f32.xlu0 %v5301_v41  ;;  %v1673_v59 = vld [vmem:[#allocation3 + $0xb0] sm:$0xff] }
 0x584   :  { %1912 = vadd.xlane.f32.xlu1 %v5303_v16 }
 0x586   :  { %1914 = vadd.xlane.f32.xlu0 %v5306_v40  ;;  %v4094_v28 = vpop.f32.mrb[76].mxu0 }
 0x587   :  { %v1813_v30 = vpop.f32.mrb[77].mxu0  ;;  %v5318_v21 = vadd.f32 %v4094_v28, %v1665_v25 }
 0x588   :  { %v5312_v4 = vadd.f32 %v1813_v30, %v1663_v53  ;;  %1916 = vadd.xlane.f32.xlu1 %v5309_v48  ;;  %v4095_v60 = vpop.f32.mrb[78].mxu0  ;;  %v1674_v53 = vld [vmem:[#allocation3 + $0xb8] sm:$0xff] }
 0x589   :  { %v1816_v20 = vpop.f32.mrb[79].mxu0  ;;  %v5321_v50 = vadd.f32 %v4095_v60, %v1666_v27 }
 0x58a   :  { %v5315_v13 = vadd.f32 %v1816_v20, %v1664_v42  ;;  %1918 = vadd.xlane.f32.xlu0 %v5312_v4 }
 0x58c   :  { %1920 = vadd.xlane.f32.xlu1 %v5315_v13 }
 0x58e   :  { %1922 = vadd.xlane.f32.xlu0 %v5318_v21 }
 0x590   :  { %1924 = vadd.xlane.f32.xlu1 %v5321_v50 }
 0x59b   :  { %v4098_v22 = vpop.f32.mrb[80].mxu0 }
 0x59c   :  { %v1829_v23 = vpop.f32.mrb[81].mxu0  ;;  %v5330_v18 = vadd.f32 %v4098_v22, %v1669_v29 }
 0x59d   :  { %v5325_v39 = vadd.f32 %v1829_v23, %v1667_v33  ;;  %v4099_v9 = vpop.f32.mrb[82].mxu0 }
 0x59e   :  { %v1832_v6 = vpop.f32.mrb[83].mxu0  ;;  %v5333_v14 = vadd.f32 %v4099_v9, %v1670_v45  ;;  %v1675_v9 = vld [vmem:[#allocation3 + $0xc0] sm:$0xff] }
 0x59f   :  { %v5327_v56 = vadd.f32 %v1832_v6, %v1668_v55  ;;  %1926 = vadd.xlane.f32.xlu0 %v5325_v39  ;;  %v4190_v6 = vld [vmem:[#allocation9 + $0x24] ss:$8 sps:$4 sm:$0xff]  }
 0x5a0   :  { %2451 = vmatprep.subr.bf16.mxu1 %v4190_v6  ;;  %v1680_v6 = vld [vmem:[#allocation3 + $0xe8] sm:$0xff] }
 0x5a1   :  { %1928 = vadd.xlane.f32.xlu1 %v5327_v56 }
 0x5a3   :  { %1930 = vadd.xlane.f32.xlu0 %v5330_v18 }
 0x5a5   :  { %1932 = vadd.xlane.f32.xlu1 %v5333_v14 }
 0x5a7   :  { %v4102_v52 = vpop.f32.mrb[84].mxu0 }
 0x5a8   :  { %v1845_v35 = vpop.f32.mrb[85].mxu0  ;;  %v5363_v28 = vadd.f32 %v4102_v52, %v1673_v59 }
 0x5a9   :  { %v4103_v17 = vpop.f32.mrb[86].mxu0  ;;  %v5347_v36 = vadd.f32 %v1845_v35, %v1671_v7  ;;  %v4188_v35 = vld [vmem:[#allocation9 + $0x20] ss:$8 sps:$4 sm:$0xff]  }
 0x5aa   :  { %v1848_v38 = vpop.f32.mrb[87].mxu0  ;;  %v5365_v60 = vadd.f32 %v4103_v17, %v1674_v53  ;;  %2452 = vmatpush1.bf16.msra.mxu1 %v4188_v35 }
 0x5ab   :  { %v5352_v62 = vadd.f32 %v1848_v38, %v1672_v1  ;;  %v1676_v38 = vld [vmem:[#allocation3 + $0xc8] sm:$0xff]  ;;  %2453 = vmatprep.subr.bf16.mxu1 %v4193_v43  ;;  %v4197_v1 = vld [vmem:[#allocation9 + $0x50] ss:$8 sps:$4 sm:$0xff]  }
 0x5ee   :  { %v1895_v2 = vpop.xlane.xlu0 %1894 }
 0x5ef   :  { %v1959_v10 = vmul.f32 0.0078125, %v1895_v2  ;;  %v4191_v2 = vld [vmem:[#allocation9 + $0x30] ss:$8 sps:$4 sm:$0xff]  }
 0x5f0   :  { %v1897_v24 = vpop.xlane.xlu1 %1896  ;;  %2454 = vmatpush1.bf16.msra.mxu1 %v4191_v2 }
 0x5f1   :  { %v1960_v54 = vmul.f32 0.0078125, %v1897_v24  ;;  %v5338_v61 = vsub.f32 %v5277_v26, %v1959_v10  ;;  %v1677_v24 = vld [vmem:[#allocation3 + $0xd0] sm:$0xff] }
 0x5f2   :  { %v1899_v46 = vpop.xlane.xlu0 %1898 }
 0x5f3   :  { %v1961_v11 = vmul.f32 0.0078125, %v1899_v46  ;;  %v2023_v44 = vmul.f32 %v5338_v61, %v5338_v61  ;;  %v5343_v58 = vsub.f32 %v5279_v51, %v1960_v54  ;;  %v4194_v46 = vld [vmem:[#allocation9 + $0x40] ss:$8 sps:$4 sm:$0xff]  }
 0x5f4   :  { %v1901_v49 = vpop.xlane.xlu1 %1900 }
 0x5f5   :  { %v1962_v12 = vmul.f32 0.0078125, %v1901_v49  ;;  %2055 = vadd.xlane.f32.xlu0 %v2023_v44  ;;  %v2024_v19 = vmul.f32 %v5343_v58, %v5343_v58  ;;  %v5350_v26 = vsub.f32 %v5282_v34, %v1961_v11  ;;  %v1678_v11 = vld [vmem:[#allocation3 + $0xd8] sm:$0xff] }
 0x5f6   :  { %v4199_v49 = vld [vmem:[#allocation9 + $0x54] ss:$8 sps:$4 sm:$0xff]  }
 0x5f7   :  { %2057 = vadd.xlane.f32.xlu1 %v2024_v19  ;;  %v5356_v51 = vsub.f32 %v5285_v32, %v1962_v12  ;;  %v2025_v8 = vmul.f32 %v5350_v26, %v5350_v26 }
 0x5f9   :  { %1934 = vadd.xlane.f32.xlu0 %v5347_v36  ;;  %v2026_v63 = vmul.f32 %v5356_v51, %v5356_v51 }
 0x5fb   :  { %1936 = vadd.xlane.f32.xlu1 %v5352_v62 }
 0x5fd   :  { %2059 = vadd.xlane.f32.xlu0 %v2025_v8 }
 0x5ff   :  { %v1903_v34 = vpop.xlane.xlu0 %1902  ;;  %2061 = vadd.xlane.f32.xlu1 %v2026_v63 }
 0x600   :  { %v1963_v30 = vmul.f32 0.0078125, %v1903_v34 }
 0x601   :  { %v1905_v42 = vpop.xlane.xlu1 %1904  ;;  %1938 = vadd.xlane.f32.xlu0 %v5363_v28 }
 0x602   :  { %v1964_v32 = vmul.f32 0.0078125, %v1905_v42  ;;  %v5369_v25 = vsub.f32 %v5289_v57, %v1963_v30 }
 0x603   :  { %v1907_v20 = vpop.xlane.xlu0 %1906  ;;  %v4106_v33 = vpop.f32.mrb[88].mxu0  ;;  %1940 = vadd.xlane.f32.xlu1 %v5365_v60 }
 0x604   :  { %v1965_v27 = vmul.f32 0.0078125, %v1907_v20  ;;  %v2027_v22 = vmul.f32 %v5369_v25, %v5369_v25  ;;  %v5375_v23 = vsub.f32 %v5291_v47, %v1964_v32  ;;  %v1861_v55 = vpop.f32.mrb[89].mxu0  ;;  %v5395_v44 = vadd.f32 %v4106_v33, %v1677_v24  ;;  %v4202_v20 = vld [vmem:[#allocation9 + $0x64] ss:$8 sps:$4 sm:$0xff]  }
 0x605   :  { %v1909_v29 = vpop.xlane.xlu1 %1908  ;;  %v4107_v45 = vpop.f32.mrb[90].mxu0  ;;  %v5379_v3 = vadd.f32 %v1861_v55, %v1675_v9 }
 0x606   :  { %v1966_v52 = vmul.f32 0.0078125, %v1909_v29  ;;  %2063 = vadd.xlane.f32.xlu0 %v2027_v22  ;;  %v2028_v57 = vmul.f32 %v5375_v23, %v5375_v23  ;;  %v1864_v17 = vpop.f32.mrb[91].mxu0  ;;  %v5382_v47 = vsub.f32 %v5294_v5, %v1965_v27  ;;  %v4196_v5 = vld [vmem:[#allocation9 + $0x44] ss:$8 sps:$4 sm:$0xff]   ;;  %v5397_v12 = vadd.f32 %v4107_v45, %v1678_v11  ;;  %v4200_v22 = vld [vmem:[#allocation9 + $0x60] ss:$8 sps:$4 sm:$0xff]  }
 0x607   :  { %v5384_v15 = vadd.f32 %v1864_v17, %v1676_v38  ;;  %2455 = vmatprep.subr.bf16.mxu1 %v4196_v5  ;;  %v1679_v27 = vld [vmem:[#allocation3 + $0xe0] sm:$0xff]  ;;  %v4203_v17 = vld [vmem:[#allocation9 + $0x70] ss:$8 sps:$4 sm:$0xff]  }
 0x608   :  { %2065 = vadd.xlane.f32.xlu1 %v2028_v57  ;;  %v5388_v37 = vsub.f32 %v5297_v31, %v1966_v52  ;;  %v2029_v10 = vmul.f32 %v5382_v47, %v5382_v47  ;;  %2456 = vmatpush1.bf16.msra.mxu1 %v4194_v46  ;;  %v4205_v57 = vld [vmem:[#allocation9 + $0x74] ss:$8 sps:$4 sm:$0xff]  }
 0x609   :  { %2457 = vmatprep.subr.bf16.mxu1 %v4199_v49 }
 0x60a   :  { %1942 = vadd.xlane.f32.xlu0 %v5379_v3  ;;  %v2030_v54 = vmul.f32 %v5388_v37, %v5388_v37 }
 0x60c   :  { %1944 = vadd.xlane.f32.xlu1 %v5384_v15  ;;  %2458 = vmatpush1.bf16.msra.mxu1 %v4197_v1 }
 0x60d   :  { %2459 = vmatprep.subr.bf16.mxu1 %v4202_v20 }
 0x60e   :  { %2067 = vadd.xlane.f32.xlu0 %v2029_v10  ;;  %v1681_v10 = vld [vmem:[#allocation3 + $0xf0] sm:$0xff] }
 0x60f   :  { %v1911_v31 = vpop.xlane.xlu0 %1910 }
 0x610   :  { %2069 = vadd.xlane.f32.xlu1 %v2030_v54  ;;  %v1967_v7 = vmul.f32 0.0078125, %v1911_v31  ;;  %2460 = vmatpush1.bf16.msra.mxu1 %v4200_v22  ;;  %v1682_v54 = vld [vmem:[#allocation3 + $0xf8] sm:$0xff] }
 0x611   :  { %v1913_v19 = vpop.xlane.xlu1 %1912  ;;  %2461 = vmatprep.subr.bf16.mxu1 %v4205_v57 }
 0x612   :  { %1946 = vadd.xlane.f32.xlu0 %v5395_v44  ;;  %v5401_v8 = vsub.f32 %v5301_v41, %v1967_v7  ;;  %v1968_v59 = vmul.f32 0.0078125, %v1913_v19 }
 0x613   :  { %v1915_v63 = vpop.xlane.xlu0 %1914  ;;  %v4110_v53 = vpop.f32.mrb[92].mxu0 }
 0x614   :  { %1948 = vadd.xlane.f32.xlu1 %v5397_v12  ;;  %v5405_v34 = vsub.f32 %v5303_v16, %v1968_v59  ;;  %v1969_v30 = vmul.f32 0.0078125, %v1915_v63  ;;  %v1877_v42 = vpop.f32.mrb[93].mxu0  ;;  %v2031_v32 = vmul.f32 %v5401_v8, %v5401_v8  ;;  %2462 = vmatpush1.bf16.msra.mxu1 %v4203_v17  ;;  %v5427_v11 = vadd.f32 %v4110_v53, %v1681_v10 }
 0x615   :  { %v4111_v33 = vpop.f32.mrb[94].mxu0  ;;  %v1917_v41 = vpop.xlane.xlu1 %1916  ;;  %v5414_v52 = vadd.f32 %v1877_v42, %v1679_v27 }
 0x616   :  { %v1970_v55 = vmul.f32 0.0078125, %v1917_v41  ;;  %2071 = vadd.xlane.f32.xlu0 %v2031_v32  ;;  %v1880_v9 = vpop.f32.mrb[95].mxu0  ;;  %v2032_v29 = vmul.f32 %v5405_v34, %v5405_v34  ;;  %v5412_v45 = vsub.f32 %v5306_v40, %v1969_v30  ;;  %v5432_v49 = vadd.f32 %v4111_v33, %v1682_v54 }
 0x617   :  { %v1919_v16 = vpop.xlane.xlu0 %1918  ;;  %v5419_v43 = vadd.f32 %v1880_v9, %v1680_v6 }
 0x618   :  { %2073 = vadd.xlane.f32.xlu1 %v2032_v29  ;;  %v5417_v38 = vsub.f32 %v5309_v48, %v1970_v55  ;;  %v1971_v2 = vmul.f32 0.0078125, %v1919_v16  ;;  %v2033_v40 = vmul.f32 %v5412_v45, %v5412_v45 }
 0x619   :  { %v1921_v35 = vpop.xlane.xlu1 %1920 }
 0x61a   :  { %1950 = vadd.xlane.f32.xlu0 %v5414_v52  ;;  %v1972_v5 = vmul.f32 0.0078125, %v1921_v35  ;;  %v2034_v48 = vmul.f32 %v5417_v38, %v5417_v38  ;;  %v5430_v31 = vsub.f32 %v5312_v4, %v1971_v2 }
 0x61b   :  { %v1923_v24 = vpop.xlane.xlu0 %1922 }
 0x61c   :  { %1952 = vadd.xlane.f32.xlu1 %v5419_v43  ;;  %v1973_v7 = vmul.f32 0.0078125, %v1923_v24  ;;  %v5435_v19 = vsub.f32 %v5315_v13, %v1972_v5  ;;  %v2035_v63 = vmul.f32 %v5430_v31, %v5430_v31 }
 0x61d   :  { %v1925_v46 = vpop.xlane.xlu1 %1924 }
 0x61e   :  { %2075 = vadd.xlane.f32.xlu0 %v2033_v40  ;;  %v1974_v1 = vmul.f32 0.0078125, %v1925_v46  ;;  %v5439_v59 = vsub.f32 %v5318_v21, %v1973_v7  ;;  %v2036_v53 = vmul.f32 %v5435_v19, %v5435_v19 }
 0x620   :  { %2077 = vadd.xlane.f32.xlu1 %v2034_v48  ;;  %v5445_v4 = vsub.f32 %v5321_v50, %v1974_v1  ;;  %v2037_v13 = vmul.f32 %v5439_v59, %v5439_v59 }
 0x622   :  { %1954 = vadd.xlane.f32.xlu0 %v5427_v11  ;;  %v2038_v21 = vmul.f32 %v5445_v4, %v5445_v4 }
 0x624   :  { %1956 = vadd.xlane.f32.xlu1 %v5432_v49 }
 0x626   :  { %2079 = vadd.xlane.f32.xlu0 %v2035_v63 }
 0x628   :  { %2081 = vadd.xlane.f32.xlu1 %v2036_v53 }
 0x62a   :  { %2083 = vadd.xlane.f32.xlu0 %v2037_v13 }
 0x62c   :  { %2085 = vadd.xlane.f32.xlu1 %v2038_v21  ;;  %v1927_v30 = vpop.xlane.xlu0 %1926 }
 0x62d   :  { %v1975_v42 = vmul.f32 0.0078125, %v1927_v30 }
 0x62e   :  { %v1929_v32 = vpop.xlane.xlu1 %1928 }
 0x62f   :  { %v5454_v20 = vsub.f32 %v5325_v39, %v1975_v42  ;;  %v1976_v50 = vmul.f32 0.0078125, %v1929_v32 }
 0x630   :  { %v1931_v27 = vpop.xlane.xlu0 %1930 }
 0x631   :  { %v5457_v33 = vsub.f32 %v5327_v56, %v1976_v50  ;;  %v1977_v41 = vmul.f32 0.0078125, %v1931_v27  ;;  %v2039_v22 = vmul.f32 %v5454_v20, %v5454_v20 }
 0x632   :  { %v1933_v55 = vpop.xlane.xlu1 %1932 }
 0x633   :  { %v5462_v9 = vsub.f32 %v5330_v18, %v1977_v41  ;;  %v1978_v29 = vmul.f32 0.0078125, %v1933_v55  ;;  %2087 = vadd.xlane.f32.xlu0 %v2039_v22  ;;  %v2040_v6 = vmul.f32 %v5457_v33, %v5457_v33 }
 0x635   :  { %v5467_v39 = vsub.f32 %v5333_v14, %v1978_v29  ;;  %2089 = vadd.xlane.f32.xlu1 %v2040_v6  ;;  %v2041_v56 = vmul.f32 %v5462_v9, %v5462_v9 }
 0x637   :  { %2091 = vadd.xlane.f32.xlu0 %v2041_v56  ;;  %v2042_v16 = vmul.f32 %v5467_v39, %v5467_v39 }
 0x639   :  { %2093 = vadd.xlane.f32.xlu1 %v2042_v16 }
 0x682   :  { %v2056_v57 = vpop.xlane.xlu0 %2055 }
 0x683   :  { %v2119_v18 = vmul.f32 0.0078125, %v2056_v57 }
 0x684   :  { %v2058_v35 = vpop.xlane.xlu1 %2057 }
 0x685   :  { %v2151_v17 = vadd.f32 1e-05, %v2119_v18  ;;  %v2120_v2 = vmul.f32 0.0078125, %v2058_v35 }
 0x686   :  { %v1935_v40 = vpop.xlane.xlu0 %1934 }
 0x687   :  { %4350 = vrsqrt.f32 %v2151_v17  ;;  %v2152_v10 = vadd.f32 1e-05, %v2120_v2  ;;  %v1979_v24 = vmul.f32 0.0078125, %v1935_v40 }
 0x688   :  { %v1937_v14 = vpop.xlane.xlu1 %1936 }
 0x689   :  { %4352 = vrsqrt.f32 %v2152_v10  ;;  %v5474_v5 = vsub.f32 %v5347_v36, %v1979_v24  ;;  %v1980_v48 = vmul.f32 0.0078125, %v1937_v14 }
 0x68a   :  { %v2060_v54 = vpop.xlane.xlu0 %2059 }
 0x68b   :  { %v5477_v46 = vsub.f32 %v5352_v62, %v1980_v48  ;;  %v2121_v7 = vmul.f32 0.0078125, %v2060_v54  ;;  %v2043_v1 = vmul.f32 %v5474_v5, %v5474_v5  ;;  %v5486_v62 = vld [vmem:[%s6285_s3] ss:$0 sm:$0xff] }
 0x68c   :  { %v2062_v63 = vpop.xlane.xlu1 %2061 }
 0x68d   :  { %v2153_v53 = vadd.f32 1e-05, %v2121_v7  ;;  %v2122_v13 = vmul.f32 0.0078125, %v2062_v63  ;;  %2095 = vadd.xlane.f32.xlu0 %v2043_v1  ;;  %v2044_v21 = vmul.f32 %v5477_v46, %v5477_v46 }
 0x68e   :  { %v1939_v30 = vpop.xlane.xlu0 %1938 }
 0x68f   :  { %4354 = vrsqrt.f32 %v2153_v53  ;;  %v2154_v36 = vadd.f32 1e-05, %v2122_v13  ;;  %v1981_v42 = vmul.f32 0.0078125, %v1939_v30  ;;  %2097 = vadd.xlane.f32.xlu1 %v2044_v21 }
 0x690   :  { %v1941_v32 = vpop.xlane.xlu1 %1940 }
 0x691   :  { %v4351_v50 = vpop.eup %4350  ;;  %4356 = vrsqrt.f32 %v2154_v36  ;;  %v5489_v27 = vsub.f32 %v5363_v28, %v1981_v42  ;;  %v1982_v41 = vmul.f32 0.0078125, %v1941_v32 }
 0x692   :  { %v2215_v22 = vmul.f32 %v4351_v50, %v5338_v61 }
 0x693   :  { %v2064_v55 = vpop.xlane.xlu0 %2063  ;;  %v4353_v29 = vpop.eup %4352  ;;  %v5493_v6 = vsub.f32 %v5365_v60, %v1982_v41  ;;  %v2045_v16 = vmul.f32 %v5489_v27, %v5489_v27  ;;  %v5504_v60 = vld [vmem:[%s6286_s4] ss:$0 sm:$0xff] }
 0x694   :  { %v2123_v56 = vmul.f32 0.0078125, %v2064_v55  ;;  %v2253_v57 = vmul.f32 %v5486_v62, %v2215_v22  ;;  %v2216_v18 = vmul.f32 %v4353_v29, %v5343_v58 }
 0x695   :  { %v2066_v35 = vpop.xlane.xlu1 %2065  ;;  %2099 = vadd.xlane.f32.xlu0 %v2045_v16  ;;  %v2046_v61 = vmul.f32 %v5493_v6, %v5493_v6 }
 0x696   :  { %v2155_v17 = vadd.f32 1e-05, %v2123_v56  ;;  %v2124_v28 = vmul.f32 0.0078125, %v2066_v35  ;;  %v2254_v2 = vmul.f32 %v5486_v62, %v2216_v18  ;;  %v5508_v14 = vadd.f32 %v5504_v60, %v2253_v57 }
 0x697   :  { %v1943_v40 = vpop.xlane.xlu0 %1942  ;;  %2101 = vadd.xlane.f32.xlu1 %v2046_v61 }
 0x698   :  { %4358 = vrsqrt.f32 %v2155_v17  ;;  %v2156_v10 = vadd.f32 1e-05, %v2124_v28  ;;  %v1983_v24 = vmul.f32 0.0078125, %v1943_v40  ;;  %v5511_v48 = vadd.f32 %v5504_v60, %v2254_v2 }
 0x699   :  { %v1945_v58 = vpop.xlane.xlu1 %1944  ;;  %v4355_v54 = vpop.eup %4354 }
 0x69a   :  { %4360 = vrsqrt.f32 %v2156_v10  ;;  %v5514_v7 = vsub.f32 %v5379_v3, %v1983_v24  ;;  %v1984_v1 = vmul.f32 0.0078125, %v1945_v58  ;;  %v2323_v53 = vpack.c.bf16 %v5511_v48, %v5508_v14 }
 0x69b   :  { %v2068_v63 = vpop.xlane.xlu0 %2067  ;;  %v2217_v13 = vmul.f32 %v4355_v54, %v5350_v26  ;;  %v4357_v21 = vpop.eup %4356 }
 0x69c   :  { %v5520_v30 = vsub.f32 %v5384_v15, %v1984_v1  ;;  %v2125_v36 = vmul.f32 0.0078125, %v2068_v63  ;;  %v2047_v42 = vmul.f32 %v5514_v7, %v5514_v7  ;;  %2480 = vmatmul.mubr.bf16.vlgmr.msra.gmra.mrb[96].mxu1 %v2323_v53  ;;  %v2218_v3 = vmul.f32 %v4357_v21, %v5356_v51 }
 0x69d   :  { %v2070_v32 = vpop.xlane.xlu1 %2069  ;;  %v2255_v50 = vmul.f32 %v5486_v62, %v2217_v13  ;;  %2489 = vmatprep.mubr.bf16.mxu1 %v4653_v0 }
 0x69e   :  { %v2157_v41 = vadd.f32 1e-05, %v2125_v36  ;;  %v2126_v22 = vmul.f32 0.0078125, %v2070_v32  ;;  %2103 = vadd.xlane.f32.xlu0 %v2047_v42  ;;  %v2048_v26 = vmul.f32 %v5520_v30, %v5520_v30  ;;  %v2256_v55 = vmul.f32 %v5486_v62, %v2218_v3 }
 0x69f   :  { %v1947_v15 = vpop.xlane.xlu0 %1946  ;;  %v5531_v51 = vadd.f32 %v5504_v60, %v2255_v50 }
 0x6a0   :  { %4362 = vrsqrt.f32 %v2157_v41  ;;  %v2158_v29 = vadd.f32 1e-05, %v2126_v22  ;;  %v1985_v56 = vmul.f32 0.0078125, %v1947_v15  ;;  %2105 = vadd.xlane.f32.xlu1 %v2048_v26  ;;  %v5534_v57 = vadd.f32 %v5504_v60, %v2256_v55 }
 0x6a1   :  { %v1949_v16 = vpop.xlane.xlu1 %1948 }
 0x6a2   :  { %v4359_v18 = vpop.eup %4358  ;;  %4364 = vrsqrt.f32 %v2158_v29  ;;  %v5537_v35 = vsub.f32 %v5395_v44, %v1985_v56  ;;  %v1986_v17 = vmul.f32 0.0078125, %v1949_v16  ;;  %v2324_v28 = vpack.c.bf16 %v5534_v57, %v5531_v51 }
 0x6a3   :  { %v2219_v61 = vmul.f32 %v4359_v18, %v5369_v25  ;;  %v2072_v10 = vpop.xlane.xlu0 %2071 }
 0x6a4   :  { %v4361_v2 = vpop.eup %4360  ;;  %v5543_v40 = vsub.f32 %v5397_v12, %v1986_v17  ;;  %v2049_v24 = vmul.f32 %v5537_v35, %v5537_v35  ;;  %v2127_v58 = vmul.f32 0.0078125, %v2072_v10  ;;  %2490 = vmatmul.mubr.bf16.gmra.mrb[100].mxu1 %v2324_v28 }
 0x6a5   :  { %v2220_v54 = vmul.f32 %v4361_v2, %v5375_v23  ;;  %v2257_v44 = vmul.f32 %v5486_v62, %v2219_v61  ;;  %v2074_v1 = vpop.xlane.xlu1 %2073  ;;  %2499 = vmatprep.mubr.bf16.mxu1 %v4653_v0 }
 0x6a6   :  { %2107 = vadd.xlane.f32.xlu0 %v2049_v24  ;;  %v2050_v63 = vmul.f32 %v5543_v40, %v5543_v40  ;;  %v2159_v25 = vadd.f32 1e-05, %v2127_v58  ;;  %v2128_v12 = vmul.f32 0.0078125, %v2074_v1 }
 0x6a7   :  { %v2258_v53 = vmul.f32 %v5486_v62, %v2220_v54  ;;  %v1951_v13 = vpop.xlane.xlu0 %1950  ;;  %v5554_v21 = vadd.f32 %v5504_v60, %v2257_v44 }
 0x6a8   :  { %2109 = vadd.xlane.f32.xlu1 %v2050_v63  ;;  %4366 = vrsqrt.f32 %v2159_v25  ;;  %v2160_v23 = vadd.f32 1e-05, %v2128_v12  ;;  %v1987_v36 = vmul.f32 0.0078125, %v1951_v13 }
 0x6a9   :  { %v5557_v42 = vadd.f32 %v5504_v60, %v2258_v53  ;;  %v1953_v3 = vpop.xlane.xlu1 %1952 }
 0x6aa   :  { %v4363_v32 = vpop.eup %4362  ;;  %4368 = vrsqrt.f32 %v2160_v23  ;;  %v5560_v50 = vsub.f32 %v5414_v52, %v1987_v36  ;;  %v1988_v41 = vmul.f32 0.0078125, %v1953_v3 }
 0x6ab   :  { %v2325_v22 = vpack.c.bf16 %v5557_v42, %v5554_v21  ;;  %v2076_v15 = vpop.xlane.xlu0 %2075  ;;  %v2221_v55 = vmul.f32 %v4363_v32, %v5382_v47 }
 0x6ac   :  { %v4365_v26 = vpop.eup %4364  ;;  %v5566_v29 = vsub.f32 %v5419_v43, %v1988_v41  ;;  %v2129_v56 = vmul.f32 0.0078125, %v2076_v15  ;;  %v2051_v16 = vmul.f32 %v5560_v50, %v5560_v50 }
 0x6ad   :  { %2500 = vmatmul.mubr.bf16.gmra.mrb[104].mxu1 %v2325_v22  ;;  %v2222_v18 = vmul.f32 %v4365_v26, %v5388_v37  ;;  %v2078_v52 = vpop.xlane.xlu1 %2077  ;;  %v2259_v17 = vmul.f32 %v5486_v62, %v2221_v55 }
 0x6ae   :  { %2509 = vmatprep.mubr.bf16.mxu1 %v4653_v0  ;;  %v2161_v28 = vadd.f32 1e-05, %v2129_v56  ;;  %v2130_v61 = vmul.f32 0.0078125, %v2078_v52  ;;  %2111 = vadd.xlane.f32.xlu0 %v2051_v16  ;;  %v2052_v47 = vmul.f32 %v5566_v29, %v5566_v29 }
 0x6af   :  { %v2260_v43 = vmul.f32 %v5486_v62, %v2222_v18  ;;  %v1955_v2 = vpop.xlane.xlu0 %1954  ;;  %v5577_v10 = vadd.f32 %v5504_v60, %v2259_v17 }
 0x6b0   :  { %4370 = vrsqrt.f32 %v2161_v28  ;;  %v2162_v24 = vadd.f32 1e-05, %v2130_v61  ;;  %v1989_v37 = vmul.f32 0.0078125, %v1955_v2  ;;  %2113 = vadd.xlane.f32.xlu1 %v2052_v47 }
 0x6b1   :  { %v5580_v58 = vadd.f32 %v5504_v60, %v2260_v43  ;;  %v1957_v54 = vpop.xlane.xlu1 %1956 }
 0x6b2   :  { %v4367_v44 = vpop.eup %4366  ;;  %4372 = vrsqrt.f32 %v2162_v24  ;;  %v5583_v1 = vsub.f32 %v5427_v11, %v1989_v37  ;;  %v1990_v63 = vmul.f32 0.0078125, %v1957_v54 }
 0x6b3   :  { %v2326_v25 = vpack.c.bf16 %v5580_v58, %v5577_v10  ;;  %v2080_v12 = vpop.xlane.xlu0 %2079  ;;  %v2223_v53 = vmul.f32 %v4367_v44, %v5401_v8 }
 0x6b4   :  { %v4369_v13 = vpop.eup %4368  ;;  %v5589_v23 = vsub.f32 %v5432_v49, %v1990_v63  ;;  %v2131_v36 = vmul.f32 0.0078125, %v2080_v12  ;;  %v2053_v32 = vmul.f32 %v5583_v1, %v5583_v1 }
 0x6b5   :  { %2510 = vmatmul.mubr.bf16.gmra.mrb[108].mxu1 %v2326_v25  ;;  %v2082_v3 = vpop.xlane.xlu1 %2081  ;;  %v2224_v11 = vmul.f32 %v4369_v13, %v5405_v34  ;;  %v2261_v41 = vmul.f32 %v5486_v62, %v2223_v53 }
 0x6b6   :  { %2519 = vmatprep.mubr.bf16.mxu1 %v4653_v0  ;;  %v2163_v22 = vadd.f32 1e-05, %v2131_v36  ;;  %v2132_v26 = vmul.f32 0.0078125, %v2082_v3  ;;  %2115 = vadd.xlane.f32.xlu0 %v2053_v32  ;;  %v2054_v8 = vmul.f32 %v5589_v23, %v5589_v23 }
 0x6b7   :  { %v2084_v49 = vpop.xlane.xlu0 %2083  ;;  %v2262_v15 = vmul.f32 %v5486_v62, %v2224_v11  ;;  %v5600_v18 = vadd.f32 %v5504_v60, %v2261_v41 }
 0x6b8   :  { %4374 = vrsqrt.f32 %v2163_v22  ;;  %v2164_v55 = vadd.f32 1e-05, %v2132_v26  ;;  %v2133_v56 = vmul.f32 0.0078125, %v2084_v49  ;;  %2117 = vadd.xlane.f32.xlu1 %v2054_v8 }
 0x6b9   :  { %v2086_v16 = vpop.xlane.xlu1 %2085  ;;  %v5603_v34 = vadd.f32 %v5504_v60, %v2262_v15 }
 0x6ba   :  { %v4371_v52 = vpop.eup %4370  ;;  %4376 = vrsqrt.f32 %v2164_v55  ;;  %v2165_v17 = vadd.f32 1e-05, %v2133_v56  ;;  %v2134_v28 = vmul.f32 0.0078125, %v2086_v16 }
 0x6bb   :  { %v2327_v61 = vpack.c.bf16 %v5603_v34, %v5600_v18  ;;  %v2225_v47 = vmul.f32 %v4371_v52, %v5412_v45 }
 0x6bc   :  { %v4373_v43 = vpop.eup %4372  ;;  %4378 = vrsqrt.f32 %v2165_v17  ;;  %v2166_v2 = vadd.f32 1e-05, %v2134_v28 }
 0x6bd   :  { %2520 = vmatmul.mubr.bf16.gmra.mrb[112].mxu1 %v2327_v61  ;;  %v2226_v24 = vmul.f32 %v4373_v43, %v5417_v38  ;;  %v2263_v37 = vmul.f32 %v5486_v62, %v2225_v47 }
 0x6be   :  { %4380 = vrsqrt.f32 %v2166_v2  ;;  %2529 = vmatprep.mubr.bf16.mxu1 %v4653_v0 }
 0x6bf   :  { %v2264_v54 = vmul.f32 %v5486_v62, %v2226_v24  ;;  %v5613_v25 = vadd.f32 %v5504_v60, %v2263_v37 }
 0x6c0   :  { %v2088_v44 = vpop.xlane.xlu0 %2087 }
 0x6c1   :  { %v2135_v63 = vmul.f32 0.0078125, %v2088_v44  ;;  %v5616_v45 = vadd.f32 %v5504_v60, %v2264_v54 }
 0x6c2   :  { %v4375_v12 = vpop.eup %4374  ;;  %v2090_v53 = vpop.xlane.xlu1 %2089 }
 0x6c3   :  { %v2167_v13 = vadd.f32 1e-05, %v2135_v63  ;;  %v2136_v36 = vmul.f32 0.0078125, %v2090_v53  ;;  %v2328_v38 = vpack.c.bf16 %v5616_v45, %v5613_v25  ;;  %v2227_v32 = vmul.f32 %v4375_v12, %v5430_v31 }
 0x6c4   :  { %v4377_v3 = vpop.eup %4376  ;;  %v2092_v11 = vpop.xlane.xlu0 %2091 }
 0x6c5   :  { %4382 = vrsqrt.f32 %v2167_v13  ;;  %v2168_v41 = vadd.f32 1e-05, %v2136_v36  ;;  %v2137_v22 = vmul.f32 0.0078125, %v2092_v11  ;;  %2530 = vmatmul.mubr.bf16.gmra.mrb[116].mxu1 %v2328_v38  ;;  %v2228_v26 = vmul.f32 %v4377_v3, %v5435_v19  ;;  %v4206_v36 = vld [vmem:[#allocation11 + $0x40] sm:$0xff]  }
 0x6c6   :  { %v4379_v8 = vpop.eup %4378  ;;  %v2094_v49 = vpop.xlane.xlu1 %2093  ;;  %2539 = vmatprep.mubr.bf16.mxu1 %v4653_v0  ;;  %v2265_v15 = vmul.f32 %v5486_v62, %v2227_v32  ;;  %v4207_v32 = vld [vmem:[#allocation11] sm:$0xff]   ;;  %3776 = vmatprep.subr.bf16.mxu0 %v4206_v36 }
 0x6c7   :  { %4384 = vrsqrt.f32 %v2168_v41  ;;  %v2138_v55 = vmul.f32 0.0078125, %v2094_v49  ;;  %v2266_v56 = vmul.f32 %v5486_v62, %v2228_v26  ;;  %v2169_v31 = vadd.f32 1e-05, %v2137_v22  ;;  %3777 = vmatpush3.bf16.msra.mxu0 %v4207_v32  ;;  %v4209_v49 = vld [vmem:[#allocation11 + $0x8] sm:$0xff]  }
 0x6c8   :  { %v4381_v16 = vpop.eup %4380  ;;  %v5626_v52 = vadd.f32 %v5504_v60, %v2265_v15  ;;  %v2229_v19 = vmul.f32 %v4379_v8, %v5439_v59  ;;  %v4208_v8 = vld [vmem:[#allocation11 + $0x48] sm:$0xff]   ;;  %v4210_v15 = vld [vmem:[#allocation11 + $0x50] sm:$0xff]  }
 0x6c9   :  { %v2170_v17 = vadd.f32 1e-05, %v2138_v55  ;;  %v5629_v28 = vadd.f32 %v5504_v60, %v2266_v56  ;;  %v2230_v61 = vmul.f32 %v4381_v16, %v5445_v4  ;;  %3778 = vmatprep.subr.bf16.mxu0 %v4208_v8  ;;  %v4211_v55 = vld [vmem:[#allocation11 + $0x10] sm:$0xff]   ;;  %v4212_v56 = vld [vmem:[#allocation11 + $0x58] sm:$0xff]  }
 0x6ca   :  { %v2267_v2 = vmul.f32 %v5486_v62, %v2229_v19  ;;  %v4215_v19 = vld [vmem:[#allocation11 + $0x20] sm:$0xff]  }
 0x6cb   :  { %4386 = vrsqrt.f32 %v2170_v17  ;;  %v2329_v47 = vpack.c.bf16 %v5629_v28, %v5626_v52  ;;  %v2268_v43 = vmul.f32 %v5486_v62, %v2230_v61  ;;  %3779 = vmatpush3.bf16.msra.mxu0 %v4209_v49  ;;  %v4214_v17 = vld [vmem:[#allocation11 + $0x60] sm:$0xff]   ;;  %v4216_v61 = vld [vmem:[#allocation11 + $0x68] sm:$0xff]  }
 0x6cc   :  { %4388 = vrsqrt.f32 %v2169_v31  ;;  %v5642_v59 = vadd.f32 %v5504_v60, %v2267_v2  ;;  %3780 = vmatprep.subr.bf16.mxu0 %v4210_v15  ;;  %v4213_v31 = vld [vmem:[#allocation11 + $0x18] sm:$0xff]   ;;  %v4219_v2 = vld [vmem:[#allocation11 + $0x30] sm:$0xff]  }
 0x6cd   :  { %2540 = vmatmul.mubr.bf16.gmra.mrb[120].mxu1 %v2329_v47  ;;  %v5639_v37 = vadd.f32 %v5504_v60, %v2268_v43  ;;  %v4217_v47 = vld [vmem:[#allocation11 + $0x28] sm:$0xff]   ;;  %v4218_v43 = vld [vmem:[#allocation11 + $0x70] sm:$0xff]  }
 0x6ce   :  { %2549 = vmatprep.mubr.bf16.mxu1 %v4653_v0 }
 0x6cf   :  { %v4383_v24 = vpop.eup %4382  ;;  %v2330_v63 = vpack.c.bf16 %v5639_v37, %v5642_v59  ;;  %3781 = vmatpush3.bf16.msra.mxu0 %v4211_v55 }
 0x6d0   :  { %v2231_v4 = vmul.f32 %v4383_v24, %v5454_v20  ;;  %3782 = vmatprep.subr.bf16.mxu0 %v4212_v56  ;;  %v4220_v24 = vld [vmem:[#allocation11 + $0x78] sm:$0xff]  }
 0x6d1   :  { %v4385_v54 = vpop.eup %4384 }
 0x6d2   :  { %v2232_v44 = vmul.f32 %v4385_v54, %v5457_v33  ;;  %v2269_v13 = vmul.f32 %v5486_v62, %v2231_v4  ;;  %v4221_v54 = vld [vmem:[#allocation11 + $0x38] sm:$0xff]  }
 0x6d3   :  { %3783 = vmatpush3.bf16.msra.mxu0 %v4213_v31 }
 0x6d4   :  { %v2270_v12 = vmul.f32 %v5486_v62, %v2232_v44  ;;  %v5656_v33 = vadd.f32 %v5504_v60, %v2269_v13  ;;  %3784 = vmatprep.subr.bf16.mxu0 %v4214_v17 }
 0x6d5   :  { %v4387_v53 = vpop.eup %4386  ;;  %2550 = vmatmul.mubr.bf16.gmra.mrb[124].mxu1 %v2330_v63 }
 0x6d6   :  { %v4389_v38 = vpop.eup %4388  ;;  %2559 = vmatprep.mubr.bf16.mxu1 %v4653_v0  ;;  %v5652_v3 = vadd.f32 %v5504_v60, %v2270_v12  ;;  %v2234_v20 = vmul.f32 %v4387_v53, %v5467_v39 }
 0x6d7   :  { %v2233_v11 = vmul.f32 %v4389_v38, %v5462_v9  ;;  %3785 = vmatpush3.bf16.msra.mxu0 %v4215_v19 }
 0x6d8   :  { %v2331_v41 = vpack.c.bf16 %v5652_v3, %v5656_v33  ;;  %v2272_v22 = vmul.f32 %v5486_v62, %v2234_v20  ;;  %3786 = vmatprep.subr.bf16.mxu0 %v4216_v61 }
 0x6d9   :  { %v2271_v26 = vmul.f32 %v5486_v62, %v2233_v11 }
 0x6da   :  { %v5665_v39 = vadd.f32 %v5504_v60, %v2272_v22 }
 0x6db   :  { %v5668_v9 = vadd.f32 %v5504_v60, %v2271_v26  ;;  %3787 = vmatpush3.bf16.msra.mxu0 %v4217_v47 }
 0x6dc   :  { %3788 = vmatprep.subr.bf16.mxu0 %v4218_v43 }
 0x6dd   :  { %2560 = vmatmul.mubr.bf16.gmra.mrb[128].mxu1 %v2331_v41  ;;  %v2332_v16 = vpack.c.bf16 %v5665_v39, %v5668_v9 }
 0x6de   :  { %2569 = vmatprep.mubr.bf16.mxu1 %v4653_v0 }
 0x6df   :  { %3789 = vmatpush3.bf16.msra.mxu0 %v4219_v2 }
 0x6e0   :  { %3790 = vmatprep.subr.bf16.mxu0 %v4220_v24 }
 0x6e3   :  { %3791 = vmatpush3.bf16.msra.mxu0 %v4221_v54 }
 0x6e5   :  { %2570 = vmatmul.mubr.bf16.gmra.mrb[132].mxu1 %v2332_v16 }
 0x6e6   :  { %2579 = vmatprep.mubr.bf16.mxu1 %v4653_v0 }
 0x71a   :  { %v2096_v4 = vpop.xlane.xlu0 %2095 }
 0x71b   :  { %v2139_v44 = vmul.f32 0.0078125, %v2096_v4 }
 0x71c   :  { %v2098_v63 = vpop.xlane.xlu1 %2097 }
 0x71d   :  { %v2171_v12 = vadd.f32 1e-05, %v2139_v44  ;;  %v2140_v53 = vmul.f32 0.0078125, %v2098_v63 }
 0x71f   :  { %4390 = vrsqrt.f32 %v2171_v12  ;;  %v2172_v13 = vadd.f32 1e-05, %v2140_v53 }
 0x721   :  { %4392 = vrsqrt.f32 %v2172_v13 }
 0x722   :  { %v2100_v36 = vpop.xlane.xlu0 %2099 }
 0x723   :  { %v2141_v38 = vmul.f32 0.0078125, %v2100_v36 }
 0x724   :  { %v2102_v32 = vpop.xlane.xlu1 %2101 }
 0x725   :  { %v2173_v20 = vadd.f32 1e-05, %v2141_v38  ;;  %v2142_v11 = vmul.f32 0.0078125, %v2102_v32 }
 0x727   :  { %4394 = vrsqrt.f32 %v2173_v20  ;;  %v2174_v41 = vadd.f32 1e-05, %v2142_v11 }
 0x729   :  { %v4391_v22 = vpop.eup %4390  ;;  %4396 = vrsqrt.f32 %v2174_v41 }
 0x72a   :  { %v2235_v8 = vmul.f32 %v4391_v22, %v5474_v5 }
 0x72b   :  { %v2104_v26 = vpop.xlane.xlu0 %2103  ;;  %v4393_v49 = vpop.eup %4392 }
 0x72c   :  { %v2143_v15 = vmul.f32 0.0078125, %v2104_v26  ;;  %v2236_v56 = vmul.f32 %v4393_v49, %v5477_v46  ;;  %v2273_v16 = vmul.f32 %v5486_v62, %v2235_v8 }
 0x72d   :  { %v2106_v55 = vpop.xlane.xlu1 %2105 }
 0x72e   :  { %v2175_v31 = vadd.f32 1e-05, %v2143_v15  ;;  %v2144_v17 = vmul.f32 0.0078125, %v2106_v55  ;;  %v2274_v19 = vmul.f32 %v5486_v62, %v2236_v56  ;;  %v5678_v47 = vadd.f32 %v5504_v60, %v2273_v16 }
 0x730   :  { %4398 = vrsqrt.f32 %v2175_v31  ;;  %v2176_v61 = vadd.f32 1e-05, %v2144_v17  ;;  %v5681_v43 = vadd.f32 %v5504_v60, %v2274_v19 }
 0x731   :  { %v4395_v5 = vpop.eup %4394 }
 0x732   :  { %4400 = vrsqrt.f32 %v2176_v61  ;;  %v2333_v46 = vpack.c.bf16 %v5681_v43, %v5678_v47  ;;  %v2237_v24 = vmul.f32 %v4395_v5, %v5489_v27 }
 0x733   :  { %v2108_v2 = vpop.xlane.xlu0 %2107  ;;  %v4397_v54 = vpop.eup %4396 }
 0x734   :  { %v2145_v4 = vmul.f32 0.0078125, %v2108_v2  ;;  %2580 = vmatmul.mubr.bf16.gmra.mrb[136].mxu1 %v2333_v46  ;;  %v2238_v63 = vmul.f32 %v4397_v54, %v5493_v6  ;;  %v2275_v12 = vmul.f32 %v5486_v62, %v2237_v24 }
 0x735   :  { %v2110_v44 = vpop.xlane.xlu1 %2109  ;;  %2589 = vmatprep.mubr.bf16.mxu1 %v4653_v0 }
 0x736   :  { %v2177_v53 = vadd.f32 1e-05, %v2145_v4  ;;  %v2146_v13 = vmul.f32 0.0078125, %v2110_v44  ;;  %v2276_v36 = vmul.f32 %v5486_v62, %v2238_v63  ;;  %v5691_v32 = vadd.f32 %v5504_v60, %v2275_v12 }
 0x738   :  { %4402 = vrsqrt.f32 %v2177_v53  ;;  %v2178_v38 = vadd.f32 1e-05, %v2146_v13  ;;  %v5694_v27 = vadd.f32 %v5504_v60, %v2276_v36 }
 0x73a   :  { %v4399_v20 = vpop.eup %4398  ;;  %4404 = vrsqrt.f32 %v2178_v38  ;;  %v2334_v6 = vpack.c.bf16 %v5694_v27, %v5691_v32 }
 0x73b   :  { %v2239_v11 = vmul.f32 %v4399_v20, %v5514_v7  ;;  %v2112_v22 = vpop.xlane.xlu0 %2111 }
 0x73c   :  { %v4401_v41 = vpop.eup %4400  ;;  %v2147_v26 = vmul.f32 0.0078125, %v2112_v22  ;;  %2590 = vmatmul.mubr.bf16.gmra.mrb[140].mxu1 %v2334_v6 }
 0x73d   :  { %v2240_v8 = vmul.f32 %v4401_v41, %v5520_v30  ;;  %v2277_v49 = vmul.f32 %v5486_v62, %v2239_v11  ;;  %v2114_v15 = vpop.xlane.xlu1 %2113  ;;  %2599 = vmatprep.mubr.bf16.mxu1 %v4653_v0 }
 0x73e   :  { %v2179_v55 = vadd.f32 1e-05, %v2147_v26  ;;  %v2148_v56 = vmul.f32 0.0078125, %v2114_v15 }
 0x73f   :  { %v2278_v16 = vmul.f32 %v5486_v62, %v2240_v8  ;;  %v5704_v17 = vadd.f32 %v5504_v60, %v2277_v49 }
 0x740   :  { %4406 = vrsqrt.f32 %v2179_v55  ;;  %v2180_v31 = vadd.f32 1e-05, %v2148_v56 }
 0x741   :  { %v5707_v7 = vadd.f32 %v5504_v60, %v2278_v16 }
 0x742   :  { %v4403_v19 = vpop.eup %4402  ;;  %4408 = vrsqrt.f32 %v2180_v31 }
 0x743   :  { %v2335_v30 = vpack.c.bf16 %v5707_v7, %v5704_v17  ;;  %v2241_v61 = vmul.f32 %v4403_v19, %v5537_v35  ;;  %v2116_v2 = vpop.xlane.xlu0 %2115 }
 0x744   :  { %v4405_v5 = vpop.eup %4404  ;;  %v2149_v46 = vmul.f32 0.0078125, %v2116_v2 }
 0x745   :  { %2600 = vmatmul.mubr.bf16.gmra.mrb[144].mxu1 %v2335_v30  ;;  %v2242_v24 = vmul.f32 %v4405_v5, %v5543_v40  ;;  %v2279_v54 = vmul.f32 %v5486_v62, %v2241_v61  ;;  %v2118_v4 = vpop.xlane.xlu1 %2117 }
 0x746   :  { %2609 = vmatprep.mubr.bf16.mxu1 %v4653_v0  ;;  %v2181_v44 = vadd.f32 1e-05, %v2149_v46  ;;  %v2150_v63 = vmul.f32 0.0078125, %v2118_v4 }
 0x747   :  { %v2280_v12 = vmul.f32 %v5486_v62, %v2242_v24  ;;  %v5717_v13 = vadd.f32 %v5504_v60, %v2279_v54 }
 0x748   :  { %4410 = vrsqrt.f32 %v2181_v44  ;;  %v2182_v53 = vadd.f32 1e-05, %v2150_v63 }
 0x749   :  { %v5720_v35 = vadd.f32 %v5504_v60, %v2280_v12 }
 0x74a   :  { %v4407_v36 = vpop.eup %4406  ;;  %4412 = vrsqrt.f32 %v2182_v53 }
 0x74b   :  { %v2336_v40 = vpack.c.bf16 %v5720_v35, %v5717_v13  ;;  %v2243_v38 = vmul.f32 %v4407_v36, %v5560_v50 }
 0x74c   :  { %v4409_v20 = vpop.eup %4408 }
 0x74d   :  { %2610 = vmatmul.mubr.bf16.gmra.mrb[148].mxu1 %v2336_v40  ;;  %v2244_v6 = vmul.f32 %v4409_v20, %v5566_v29  ;;  %v2281_v11 = vmul.f32 %v5486_v62, %v2243_v38 }
 0x74e   :  { %2619 = vmatprep.mubr.bf16.mxu1 %v4653_v0 }
 0x74f   :  { %v2282_v41 = vmul.f32 %v5486_v62, %v2244_v6  ;;  %v5730_v22 = vadd.f32 %v5504_v60, %v2281_v11 }
 0x751   :  { %v5733_v26 = vadd.f32 %v5504_v60, %v2282_v41 }
 0x752   :  { %v4411_v8 = vpop.eup %4410 }
 0x753   :  { %v2337_v50 = vpack.c.bf16 %v5733_v26, %v5730_v22  ;;  %v2245_v49 = vmul.f32 %v4411_v8, %v5583_v1  ;;  %v2357_v1 = vlaneseq }
 0x754   :  { %v4413_v15 = vpop.eup %4412 }
 0x755   :  { %2620 = vmatmul.mubr.bf16.gmra.mrb[152].mxu1 %v2337_v50  ;;  %v2246_v29 = vmul.f32 %v4413_v15, %v5589_v23  ;;  %v2283_v55 = vmul.f32 %v5486_v62, %v2245_v49  ;;  %v2358_v30 = vshrl.u32 %v2357_v1, 7  ;;  %v2355_v23 = vld [vmem:[%s6288_s6] sm:$0x3] }
 0x756   :  { %2629 = vmatprep.mubr.bf16.mxu1 %v4653_v0 }
 0x757   :  { %v2284_v56 = vmul.f32 %v5486_v62, %v2246_v29  ;;  %v5743_v16 = vadd.f32 %v5504_v60, %v2283_v55  ;;  %v2359_v61 = vsub.s32 0, %v2358_v30  ;;  %v2363_v0 = vsub.s32 1, %v2358_v30 }
 0x759   :  { %v5746_v31 = vadd.f32 %v5504_v60, %v2284_v56  ;;  %v5753_v5 = vrot.slane %v2355_v23, %v2359_v61  ;;  %v5755_v62 = vrot.slane %v2355_v23, %v2363_v0 }
 0x75b   :  { %v2338_v19 = vpack.c.bf16 %v5746_v31, %v5743_v16 }
 0x75d   :  { %2630 = vmatmul.mubr.bf16.gmra.mrb[156].mxu1 %v2338_v19 }
 0x76f   :  { %v2481_v2 = vpop.f32.mrb[96].mxu1 }
 0x770   :  { %v2482_v60 = vadd.f32 %v2481_v2, %v5753_v5  ;;  %v2483_v46 = vpop.f32.mrb[97].mxu1 }
 0x771   :  { %v2484_v24 = vadd.f32 %v2483_v46, %v5755_v62  ;;  %v2485_v54 = vpop.f32.mrb[98].mxu1 }
 0x772   :  { %v2486_v4 = vadd.f32 %v2485_v54, %v5753_v5  ;;  %v2487_v44 = vpop.f32.mrb[99].mxu1  ;;  %v2640_v12 = vmax.f32 %v2482_v60, 0.0 }
 0x773   :  { %v2488_v63 = vadd.f32 %v2487_v44, %v5755_v62  ;;  %v2641_v36 = vmax.f32 %v2484_v24, 0.0 }
 0x774   :  { %v2642_v53 = vmax.f32 %v2486_v4, 0.0 }
 0x775   :  { %v2643_v40 = vmax.f32 %v2488_v63, 0.0 }
 0x776   :  { %v2704_v38 = vpack.c.bf16 %v2642_v53, %v2640_v12 }
 0x777   :  { %v2705_v20 = vpack.c.bf16 %v2643_v40, %v2641_v36  ;;  %v2491_v6 = vpop.f32.mrb[100].mxu1 }
 0x778   :  { %v2492_v11 = vadd.f32 %v2491_v6, %v5753_v5  ;;  %v2493_v41 = vpop.f32.mrb[101].mxu1 }
 0x779   :  { %v2494_v8 = vadd.f32 %v2493_v41, %v5755_v62  ;;  %v2495_v50 = vpop.f32.mrb[102].mxu1  ;;  %2903 = vmatprep.mubr.bf16.mxu0 %v2705_v20 }
 0x77a   :  { %v2496_v49 = vadd.f32 %v2495_v50, %v5753_v5  ;;  %v2497_v15 = vpop.f32.mrb[103].mxu1  ;;  %2904 = vmatmul.mubr.bf16.vlgmr.msra.gmra.mrb[96].mxu0 %v2704_v38  ;;  %v2644_v55 = vmax.f32 %v2492_v11, 0.0 }
 0x77b   :  { %v2498_v29 = vadd.f32 %v2497_v15, %v5755_v62  ;;  %v2645_v19 = vmax.f32 %v2494_v8, 0.0 }
 0x77c   :  { %v2646_v56 = vmax.f32 %v2496_v49, 0.0 }
 0x77d   :  { %v2647_v1 = vmax.f32 %v2498_v29, 0.0 }
 0x77e   :  { %v2706_v30 = vpack.c.bf16 %v2646_v56, %v2644_v55 }
 0x77f   :  { %v2707_v61 = vpack.c.bf16 %v2647_v1, %v2645_v19 }
 0x780   :  { %v2501_v23 = vpop.f32.mrb[104].mxu1 }
 0x781   :  { %v2502_v0 = vadd.f32 %v2501_v23, %v5753_v5  ;;  %v2503_v2 = vpop.f32.mrb[105].mxu1  ;;  %2911 = vmatprep.mubr.bf16.mxu0 %v2707_v61 }
 0x782   :  { %v2504_v60 = vadd.f32 %v2503_v2, %v5755_v62  ;;  %v2505_v46 = vpop.f32.mrb[106].mxu1  ;;  %2912 = vmatmul.mubr.bf16.gmra.mrb[100].mxu0 %v2706_v30 }
 0x783   :  { %v2506_v24 = vadd.f32 %v2505_v46, %v5753_v5  ;;  %v2507_v54 = vpop.f32.mrb[107].mxu1  ;;  %v2648_v44 = vmax.f32 %v2502_v0, 0.0 }
 0x784   :  { %v2508_v4 = vadd.f32 %v2507_v54, %v5755_v62  ;;  %v2649_v12 = vmax.f32 %v2504_v60, 0.0 }
 0x785   :  { %v2650_v63 = vmax.f32 %v2506_v24, 0.0 }
 0x786   :  { %v2651_v53 = vmax.f32 %v2508_v4, 0.0 }
 0x787   :  { %v2708_v36 = vpack.c.bf16 %v2650_v63, %v2648_v44 }
 0x788   :  { %v2709_v40 = vpack.c.bf16 %v2651_v53, %v2649_v12  ;;  %v2511_v38 = vpop.f32.mrb[108].mxu1 }
 0x789   :  { %v2512_v20 = vadd.f32 %v2511_v38, %v5753_v5  ;;  %v2513_v6 = vpop.f32.mrb[109].mxu1 }
 0x78a   :  { %v2514_v11 = vadd.f32 %v2513_v6, %v5755_v62  ;;  %v2515_v41 = vpop.f32.mrb[110].mxu1  ;;  %2919 = vmatprep.mubr.bf16.mxu0 %v2709_v40 }
 0x78b   :  { %v2516_v8 = vadd.f32 %v2515_v41, %v5753_v5  ;;  %v2517_v50 = vpop.f32.mrb[111].mxu1  ;;  %2920 = vmatmul.mubr.bf16.gmra.mrb[104].mxu0 %v2708_v36  ;;  %v2652_v15 = vmax.f32 %v2512_v20, 0.0 }
 0x78c   :  { %v2518_v49 = vadd.f32 %v2517_v50, %v5755_v62  ;;  %v2653_v55 = vmax.f32 %v2514_v11, 0.0 }
 0x78d   :  { %v2654_v29 = vmax.f32 %v2516_v8, 0.0 }
 0x78e   :  { %v2655_v56 = vmax.f32 %v2518_v49, 0.0 }
 0x78f   :  { %v2710_v19 = vpack.c.bf16 %v2654_v29, %v2652_v15 }
 0x790   :  { %v2711_v1 = vpack.c.bf16 %v2655_v56, %v2653_v55  ;;  %v2521_v30 = vpop.f32.mrb[112].mxu1 }
 0x791   :  { %v2522_v61 = vadd.f32 %v2521_v30, %v5753_v5  ;;  %v2523_v23 = vpop.f32.mrb[113].mxu1 }
 0x792   :  { %2927 = vmatprep.mubr.bf16.mxu0 %v2711_v1  ;;  %v2524_v0 = vadd.f32 %v2523_v23, %v5755_v62  ;;  %v2525_v2 = vpop.f32.mrb[114].mxu1 }
 0x793   :  { %2928 = vmatmul.mubr.bf16.gmra.mrb[108].mxu0 %v2710_v19  ;;  %v2526_v60 = vadd.f32 %v2525_v2, %v5753_v5  ;;  %v2527_v46 = vpop.f32.mrb[115].mxu1  ;;  %v2656_v54 = vmax.f32 %v2522_v61, 0.0 }
 0x794   :  { %v2528_v24 = vadd.f32 %v2527_v46, %v5755_v62  ;;  %v2657_v44 = vmax.f32 %v2524_v0, 0.0 }
 0x795   :  { %v2658_v4 = vmax.f32 %v2526_v60, 0.0 }
 0x796   :  { %v2659_v63 = vmax.f32 %v2528_v24, 0.0 }
 0x797   :  { %v2712_v12 = vpack.c.bf16 %v2658_v4, %v2656_v54 }
 0x798   :  { %v2713_v53 = vpack.c.bf16 %v2659_v63, %v2657_v44  ;;  %v2531_v36 = vpop.f32.mrb[116].mxu1 }
 0x799   :  { %v2532_v40 = vadd.f32 %v2531_v36, %v5753_v5  ;;  %v2533_v38 = vpop.f32.mrb[117].mxu1 }
 0x79a   :  { %v2534_v20 = vadd.f32 %v2533_v38, %v5755_v62  ;;  %v2535_v6 = vpop.f32.mrb[118].mxu1  ;;  %2935 = vmatprep.mubr.bf16.mxu0 %v2713_v53 }
 0x79b   :  { %v2536_v11 = vadd.f32 %v2535_v6, %v5753_v5  ;;  %v2537_v41 = vpop.f32.mrb[119].mxu1  ;;  %2936 = vmatmul.mubr.bf16.gmra.mrb[112].mxu0 %v2712_v12  ;;  %v2660_v50 = vmax.f32 %v2532_v40, 0.0 }
 0x79c   :  { %v2538_v8 = vadd.f32 %v2537_v41, %v5755_v62  ;;  %v2661_v15 = vmax.f32 %v2534_v20, 0.0 }
 0x79d   :  { %v2662_v49 = vmax.f32 %v2536_v11, 0.0 }
 0x79e   :  { %v2663_v29 = vmax.f32 %v2538_v8, 0.0 }
 0x79f   :  { %v2714_v55 = vpack.c.bf16 %v2662_v49, %v2660_v50 }
 0x7a0   :  { %v2715_v56 = vpack.c.bf16 %v2663_v29, %v2661_v15  ;;  %v2541_v19 = vpop.f32.mrb[120].mxu1 }
 0x7a1   :  { %v2542_v1 = vadd.f32 %v2541_v19, %v5753_v5  ;;  %v2543_v30 = vpop.f32.mrb[121].mxu1 }
 0x7a2   :  { %v2544_v61 = vadd.f32 %v2543_v30, %v5755_v62  ;;  %v2545_v23 = vpop.f32.mrb[122].mxu1  ;;  %2943 = vmatprep.mubr.bf16.mxu0 %v2715_v56 }
 0x7a3   :  { %v2546_v0 = vadd.f32 %v2545_v23, %v5753_v5  ;;  %v2547_v2 = vpop.f32.mrb[123].mxu1  ;;  %2944 = vmatmul.mubr.bf16.gmra.mrb[116].mxu0 %v2714_v55  ;;  %v2664_v46 = vmax.f32 %v2542_v1, 0.0 }
 0x7a4   :  { %v2548_v60 = vadd.f32 %v2547_v2, %v5755_v62  ;;  %v2665_v54 = vmax.f32 %v2544_v61, 0.0 }
 0x7a5   :  { %v2666_v24 = vmax.f32 %v2546_v0, 0.0 }
 0x7a6   :  { %v2667_v4 = vmax.f32 %v2548_v60, 0.0 }
 0x7a7   :  { %v2716_v44 = vpack.c.bf16 %v2666_v24, %v2664_v46 }
 0x7a8   :  { %v2717_v63 = vpack.c.bf16 %v2667_v4, %v2665_v54  ;;  %v2551_v12 = vpop.f32.mrb[124].mxu1 }
 0x7a9   :  { %v2552_v53 = vadd.f32 %v2551_v12, %v5753_v5  ;;  %v2553_v36 = vpop.f32.mrb[125].mxu1 }
 0x7aa   :  { %v2554_v40 = vadd.f32 %v2553_v36, %v5755_v62  ;;  %v2555_v38 = vpop.f32.mrb[126].mxu1  ;;  %2951 = vmatprep.mubr.bf16.mxu0 %v2717_v63 }
 0x7ab   :  { %v2556_v20 = vadd.f32 %v2555_v38, %v5753_v5  ;;  %v2557_v6 = vpop.f32.mrb[127].mxu1  ;;  %2952 = vmatmul.mubr.bf16.gmra.mrb[120].mxu0 %v2716_v44  ;;  %v2668_v41 = vmax.f32 %v2552_v53, 0.0 }
 0x7ac   :  { %v2558_v11 = vadd.f32 %v2557_v6, %v5755_v62  ;;  %v2669_v50 = vmax.f32 %v2554_v40, 0.0 }
 0x7ad   :  { %v2670_v8 = vmax.f32 %v2556_v20, 0.0 }
 0x7ae   :  { %v2671_v49 = vmax.f32 %v2558_v11, 0.0 }
 0x7af   :  { %v2718_v15 = vpack.c.bf16 %v2670_v8, %v2668_v41 }
 0x7b0   :  { %v2719_v29 = vpack.c.bf16 %v2671_v49, %v2669_v50  ;;  %v2561_v55 = vpop.f32.mrb[128].mxu1 }
 0x7b1   :  { %v2562_v56 = vadd.f32 %v2561_v55, %v5753_v5  ;;  %v2563_v19 = vpop.f32.mrb[129].mxu1 }
 0x7b2   :  { %v2564_v1 = vadd.f32 %v2563_v19, %v5755_v62  ;;  %v2565_v30 = vpop.f32.mrb[130].mxu1  ;;  %2959 = vmatprep.mubr.bf16.mxu0 %v2719_v29 }
 0x7b3   :  { %v2566_v61 = vadd.f32 %v2565_v30, %v5753_v5  ;;  %v2567_v23 = vpop.f32.mrb[131].mxu1  ;;  %2960 = vmatmul.mubr.bf16.gmra.mrb[124].mxu0 %v2718_v15  ;;  %v2672_v2 = vmax.f32 %v2562_v56, 0.0 }
 0x7b4   :  { %v2568_v0 = vadd.f32 %v2567_v23, %v5755_v62  ;;  %v2673_v46 = vmax.f32 %v2564_v1, 0.0 }
 0x7b5   :  { %v2674_v60 = vmax.f32 %v2566_v61, 0.0 }
 0x7b6   :  { %v2675_v24 = vmax.f32 %v2568_v0, 0.0 }
 0x7b7   :  { %v2720_v54 = vpack.c.bf16 %v2674_v60, %v2672_v2 }
 0x7b8   :  { %v2721_v4 = vpack.c.bf16 %v2675_v24, %v2673_v46  ;;  %v2571_v44 = vpop.f32.mrb[132].mxu1 }
 0x7b9   :  { %v2572_v63 = vadd.f32 %v2571_v44, %v5753_v5  ;;  %v2573_v12 = vpop.f32.mrb[133].mxu1 }
 0x7ba   :  { %v2574_v53 = vadd.f32 %v2573_v12, %v5755_v62  ;;  %v2575_v36 = vpop.f32.mrb[134].mxu1  ;;  %2967 = vmatprep.mubr.bf16.mxu0 %v2721_v4 }
 0x7bb   :  { %v2576_v40 = vadd.f32 %v2575_v36, %v5753_v5  ;;  %v2577_v38 = vpop.f32.mrb[135].mxu1  ;;  %2968 = vmatmul.mubr.bf16.gmra.mrb[128].mxu0 %v2720_v54  ;;  %v2676_v6 = vmax.f32 %v2572_v63, 0.0 }
 0x7bc   :  { %v2578_v20 = vadd.f32 %v2577_v38, %v5755_v62  ;;  %v2677_v41 = vmax.f32 %v2574_v53, 0.0 }
 0x7bd   :  { %v2678_v11 = vmax.f32 %v2576_v40, 0.0 }
 0x7be   :  { %v2679_v8 = vmax.f32 %v2578_v20, 0.0 }
 0x7bf   :  { %v2722_v50 = vpack.c.bf16 %v2678_v11, %v2676_v6 }
 0x7c0   :  { %v2723_v49 = vpack.c.bf16 %v2679_v8, %v2677_v41 }
 0x7c2   :  { %2975 = vmatprep.mubr.bf16.mxu0 %v2723_v49 }
 0x7c3   :  { %2976 = vmatmul.mubr.bf16.gmra.mrb[132].mxu0 %v2722_v50 }
 0x807   :  { %v2581_v15 = vpop.f32.mrb[136].mxu1 }
 0x808   :  { %v2582_v29 = vadd.f32 %v2581_v15, %v5753_v5  ;;  %v2583_v55 = vpop.f32.mrb[137].mxu1 }
 0x809   :  { %v2584_v56 = vadd.f32 %v2583_v55, %v5755_v62  ;;  %v2585_v19 = vpop.f32.mrb[138].mxu1 }
 0x80a   :  { %v2586_v1 = vadd.f32 %v2585_v19, %v5753_v5  ;;  %v2587_v30 = vpop.f32.mrb[139].mxu1  ;;  %v2680_v23 = vmax.f32 %v2582_v29, 0.0 }
 0x80b   :  { %v2588_v61 = vadd.f32 %v2587_v30, %v5755_v62  ;;  %v2681_v2 = vmax.f32 %v2584_v56, 0.0 }
 0x80c   :  { %v2682_v0 = vmax.f32 %v2586_v1, 0.0 }
 0x80d   :  { %v2683_v60 = vmax.f32 %v2588_v61, 0.0 }
 0x80e   :  { %v2724_v46 = vpack.c.bf16 %v2682_v0, %v2680_v23 }
 0x80f   :  { %v2725_v24 = vpack.c.bf16 %v2683_v60, %v2681_v2  ;;  %v2591_v54 = vpop.f32.mrb[140].mxu1 }
 0x810   :  { %v2592_v4 = vadd.f32 %v2591_v54, %v5753_v5  ;;  %v2593_v44 = vpop.f32.mrb[141].mxu1 }
 0x811   :  { %v2594_v63 = vadd.f32 %v2593_v44, %v5755_v62  ;;  %v2595_v12 = vpop.f32.mrb[142].mxu1  ;;  %2983 = vmatprep.mubr.bf16.mxu0 %v2725_v24 }
 0x812   :  { %v2596_v53 = vadd.f32 %v2595_v12, %v5753_v5  ;;  %v2597_v36 = vpop.f32.mrb[143].mxu1  ;;  %2984 = vmatmul.mubr.bf16.gmra.mrb[136].mxu0 %v2724_v46  ;;  %v2684_v38 = vmax.f32 %v2592_v4, 0.0 }
 0x813   :  { %v2598_v40 = vadd.f32 %v2597_v36, %v5755_v62  ;;  %v2685_v6 = vmax.f32 %v2594_v63, 0.0 }
 0x814   :  { %v2686_v20 = vmax.f32 %v2596_v53, 0.0 }
 0x815   :  { %v2687_v11 = vmax.f32 %v2598_v40, 0.0 }
 0x816   :  { %v2726_v41 = vpack.c.bf16 %v2686_v20, %v2684_v38 }
 0x817   :  { %v2727_v8 = vpack.c.bf16 %v2687_v11, %v2685_v6 }
 0x818   :  { %v2601_v50 = vpop.f32.mrb[144].mxu1 }
 0x819   :  { %v2602_v49 = vadd.f32 %v2601_v50, %v5753_v5  ;;  %v2603_v15 = vpop.f32.mrb[145].mxu1  ;;  %2991 = vmatprep.mubr.bf16.mxu0 %v2727_v8 }
 0x81a   :  { %v2604_v29 = vadd.f32 %v2603_v15, %v5755_v62  ;;  %v2605_v55 = vpop.f32.mrb[146].mxu1  ;;  %2992 = vmatmul.mubr.bf16.gmra.mrb[140].mxu0 %v2726_v41 }
 0x81b   :  { %v2606_v56 = vadd.f32 %v2605_v55, %v5753_v5  ;;  %v2607_v19 = vpop.f32.mrb[147].mxu1  ;;  %v2688_v30 = vmax.f32 %v2602_v49, 0.0 }
 0x81c   :  { %v2608_v1 = vadd.f32 %v2607_v19, %v5755_v62  ;;  %v2689_v23 = vmax.f32 %v2604_v29, 0.0 }
 0x81d   :  { %v2690_v61 = vmax.f32 %v2606_v56, 0.0 }
 0x81e   :  { %v2691_v0 = vmax.f32 %v2608_v1, 0.0 }
 0x81f   :  { %v2728_v2 = vpack.c.bf16 %v2690_v61, %v2688_v30 }
 0x820   :  { %v2729_v60 = vpack.c.bf16 %v2691_v0, %v2689_v23  ;;  %v2611_v46 = vpop.f32.mrb[148].mxu1 }
 0x821   :  { %v2612_v24 = vadd.f32 %v2611_v46, %v5753_v5  ;;  %v2613_v54 = vpop.f32.mrb[149].mxu1 }
 0x822   :  { %v2614_v4 = vadd.f32 %v2613_v54, %v5755_v62  ;;  %v2615_v44 = vpop.f32.mrb[150].mxu1  ;;  %2999 = vmatprep.mubr.bf16.mxu0 %v2729_v60 }
 0x823   :  { %v2616_v63 = vadd.f32 %v2615_v44, %v5753_v5  ;;  %v2617_v12 = vpop.f32.mrb[151].mxu1  ;;  %3000 = vmatmul.mubr.bf16.gmra.mrb[144].mxu0 %v2728_v2  ;;  %v2692_v36 = vmax.f32 %v2612_v24, 0.0 }
 0x824   :  { %v2618_v53 = vadd.f32 %v2617_v12, %v5755_v62  ;;  %v2693_v38 = vmax.f32 %v2614_v4, 0.0 }
 0x825   :  { %v2694_v40 = vmax.f32 %v2616_v63, 0.0 }
 0x826   :  { %v2695_v20 = vmax.f32 %v2618_v53, 0.0 }
 0x827   :  { %v2730_v6 = vpack.c.bf16 %v2694_v40, %v2692_v36 }
 0x828   :  { %v2731_v11 = vpack.c.bf16 %v2695_v20, %v2693_v38  ;;  %v2621_v41 = vpop.f32.mrb[152].mxu1 }
 0x829   :  { %v2622_v8 = vadd.f32 %v2621_v41, %v5753_v5  ;;  %v2623_v50 = vpop.f32.mrb[153].mxu1 }
 0x82a   :  { %3007 = vmatprep.mubr.bf16.mxu0 %v2731_v11  ;;  %v2624_v49 = vadd.f32 %v2623_v50, %v5755_v62  ;;  %v2625_v15 = vpop.f32.mrb[154].mxu1  ;;  %v5824_v11 = vld [vmem:[%s6290_s8] ss:$0 sm:$0xff] }
 0x82b   :  { %3008 = vmatmul.mubr.bf16.gmra.mrb[148].mxu0 %v2730_v6  ;;  %v2626_v29 = vadd.f32 %v2625_v15, %v5753_v5  ;;  %v2627_v55 = vpop.f32.mrb[155].mxu1  ;;  %v2696_v19 = vmax.f32 %v2622_v8, 0.0 }
 0x82c   :  { %v2628_v56 = vadd.f32 %v2627_v55, %v5755_v62  ;;  %v2697_v30 = vmax.f32 %v2624_v49, 0.0 }
 0x82d   :  { %v2698_v1 = vmax.f32 %v2626_v29, 0.0 }
 0x82e   :  { %v2699_v61 = vmax.f32 %v2628_v56, 0.0 }
 0x82f   :  { %v2732_v23 = vpack.c.bf16 %v2698_v1, %v2696_v19 }
 0x830   :  { %v2733_v0 = vpack.c.bf16 %v2699_v61, %v2697_v30  ;;  %v2631_v2 = vpop.f32.mrb[156].mxu1 }
 0x831   :  { %v2632_v60 = vadd.f32 %v2631_v2, %v5753_v5  ;;  %v2633_v46 = vpop.f32.mrb[157].mxu1 }
 0x832   :  { %v2634_v24 = vadd.f32 %v2633_v46, %v5755_v62  ;;  %v2635_v54 = vpop.f32.mrb[158].mxu1  ;;  %3015 = vmatprep.mubr.bf16.mxu0 %v2733_v0 }
 0x833   :  { %v2636_v4 = vadd.f32 %v2635_v54, %v5753_v5  ;;  %v2637_v44 = vpop.f32.mrb[159].mxu1  ;;  %3016 = vmatmul.mubr.bf16.gmra.mrb[152].mxu0 %v2732_v23  ;;  %v2700_v12 = vmax.f32 %v2632_v60, 0.0 }
 0x834   :  { %v2638_v63 = vadd.f32 %v2637_v44, %v5755_v62  ;;  %v2701_v36 = vmax.f32 %v2634_v24, 0.0 }
 0x835   :  { %v2702_v53 = vmax.f32 %v2636_v4, 0.0 }
 0x836   :  { %v2703_v40 = vmax.f32 %v2638_v63, 0.0 }
 0x837   :  { %v2734_v38 = vpack.c.bf16 %v2702_v53, %v2700_v12 }
 0x838   :  { %v2735_v20 = vpack.c.bf16 %v2703_v40, %v2701_v36 }
 0x83a   :  { %3023 = vmatprep.mubr.bf16.mxu0 %v2735_v20 }
 0x83b   :  { %3024 = vmatmul.mubr.bf16.gmra.mrb[156].mxu0 %v2734_v38 }
 0x84d   :  { %v3792_v6 = vpop.f32.mrb[96].mxu0 }
 0x84e   :  { %v3793_v41 = vpop.f32.mrb[97].mxu0 }
 0x84f   :  { %v3794_v5 = vadd.f32 %v3793_v41, %v3792_v6  ;;  %v3795_v8 = vpop.f32.mrb[98].mxu0 }
 0x850   :  { %v3796_v50 = vpop.f32.mrb[99].mxu0 }
 0x851   :  { %v2906_v62 = vadd.f32 %v3794_v5, %v5824_v11  ;;  %v3797_v49 = vadd.f32 %v3796_v50, %v3795_v8 }
 0x853   :  { %v2909_v15 = vadd.f32 %v3797_v49, %v5824_v11  ;;  %v5829_v29 = vadd.f32 %v2906_v62, %v5508_v14 }
 0x855   :  { %3066 = vadd.xlane.f32.xlu0 %v5829_v29  ;;  %v3798_v55 = vpop.f32.mrb[100].mxu0  ;;  %v5833_v56 = vadd.f32 %v2909_v15, %v5511_v48 }
 0x856   :  { %v3799_v19 = vpop.f32.mrb[101].mxu0 }
 0x857   :  { %v3800_v1 = vadd.f32 %v3799_v19, %v3798_v55  ;;  %v3801_v30 = vpop.f32.mrb[102].mxu0  ;;  %3068 = vadd.xlane.f32.xlu1 %v5833_v56 }
 0x858   :  { %v3802_v61 = vpop.f32.mrb[103].mxu0 }
 0x859   :  { %v2914_v23 = vadd.f32 %v3800_v1, %v5824_v11  ;;  %v3803_v0 = vadd.f32 %v3802_v61, %v3801_v30 }
 0x85b   :  { %v2917_v2 = vadd.f32 %v3803_v0, %v5824_v11  ;;  %v5839_v14 = vadd.f32 %v2914_v23, %v5531_v51 }
 0x85d   :  { %3070 = vadd.xlane.f32.xlu0 %v5839_v14  ;;  %v5843_v48 = vadd.f32 %v2917_v2, %v5534_v57 }
 0x85e   :  { %v3804_v60 = vpop.f32.mrb[104].mxu0 }
 0x85f   :  { %v3805_v46 = vpop.f32.mrb[105].mxu0  ;;  %3072 = vadd.xlane.f32.xlu1 %v5843_v48 }
 0x860   :  { %v3806_v24 = vadd.f32 %v3805_v46, %v3804_v60  ;;  %v3807_v54 = vpop.f32.mrb[106].mxu0 }
 0x861   :  { %v3808_v4 = vpop.f32.mrb[107].mxu0 }
 0x862   :  { %v2922_v44 = vadd.f32 %v3806_v24, %v5824_v11  ;;  %v3809_v63 = vadd.f32 %v3808_v4, %v3807_v54 }
 0x864   :  { %v2925_v12 = vadd.f32 %v3809_v63, %v5824_v11  ;;  %v5849_v51 = vadd.f32 %v2922_v44, %v5554_v21 }
 0x866   :  { %3074 = vadd.xlane.f32.xlu0 %v5849_v51  ;;  %v3810_v53 = vpop.f32.mrb[108].mxu0  ;;  %v5853_v57 = vadd.f32 %v2925_v12, %v5557_v42 }
 0x867   :  { %v3811_v36 = vpop.f32.mrb[109].mxu0 }
 0x868   :  { %v3812_v40 = vadd.f32 %v3811_v36, %v3810_v53  ;;  %v3813_v38 = vpop.f32.mrb[110].mxu0  ;;  %3076 = vadd.xlane.f32.xlu1 %v5853_v57 }
 0x869   :  { %v3814_v20 = vpop.f32.mrb[111].mxu0 }
 0x86a   :  { %v2930_v6 = vadd.f32 %v3812_v40, %v5824_v11  ;;  %v3815_v41 = vadd.f32 %v3814_v20, %v3813_v38 }
 0x86c   :  { %v2933_v5 = vadd.f32 %v3815_v41, %v5824_v11  ;;  %v5859_v21 = vadd.f32 %v2930_v6, %v5577_v10 }
 0x86e   :  { %3078 = vadd.xlane.f32.xlu0 %v5859_v21  ;;  %v5863_v8 = vadd.f32 %v2933_v5, %v5580_v58  ;;  %v3816_v42 = vpop.f32.mrb[112].mxu0 }
 0x86f   :  { %v3817_v50 = vpop.f32.mrb[113].mxu0 }
 0x870   :  { %3080 = vadd.xlane.f32.xlu1 %v5863_v8  ;;  %v3818_v62 = vadd.f32 %v3817_v50, %v3816_v42  ;;  %v3819_v49 = vpop.f32.mrb[114].mxu0 }
 0x871   :  { %v3820_v15 = vpop.f32.mrb[115].mxu0 }
 0x872   :  { %v2938_v55 = vadd.f32 %v3818_v62, %v5824_v11  ;;  %v3821_v19 = vadd.f32 %v3820_v15, %v3819_v49 }
 0x874   :  { %v2941_v1 = vadd.f32 %v3821_v19, %v5824_v11  ;;  %v5869_v10 = vadd.f32 %v2938_v55, %v5600_v18 }
 0x876   :  { %3082 = vadd.xlane.f32.xlu0 %v5869_v10  ;;  %v3822_v30 = vpop.f32.mrb[116].mxu0  ;;  %v5873_v58 = vadd.f32 %v2941_v1, %v5603_v34 }
 0x877   :  { %v3823_v61 = vpop.f32.mrb[117].mxu0 }
 0x878   :  { %v3824_v23 = vadd.f32 %v3823_v61, %v3822_v30  ;;  %v3825_v0 = vpop.f32.mrb[118].mxu0  ;;  %3084 = vadd.xlane.f32.xlu1 %v5873_v58 }
 0x879   :  { %v3826_v2 = vpop.f32.mrb[119].mxu0 }
 0x87a   :  { %v2946_v60 = vadd.f32 %v3824_v23, %v5824_v11  ;;  %v3827_v46 = vadd.f32 %v3826_v2, %v3825_v0 }
 0x87c   :  { %v2949_v24 = vadd.f32 %v3827_v46, %v5824_v11  ;;  %v5879_v18 = vadd.f32 %v2946_v60, %v5613_v25 }
 0x87e   :  { %3086 = vadd.xlane.f32.xlu0 %v5879_v18  ;;  %v3828_v54 = vpop.f32.mrb[120].mxu0  ;;  %v5883_v34 = vadd.f32 %v2949_v24, %v5616_v45 }
 0x87f   :  { %v3829_v4 = vpop.f32.mrb[121].mxu0 }
 0x880   :  { %v3830_v44 = vadd.f32 %v3829_v4, %v3828_v54  ;;  %3088 = vadd.xlane.f32.xlu1 %v5883_v34  ;;  %v3831_v63 = vpop.f32.mrb[122].mxu0 }
 0x881   :  { %v3832_v12 = vpop.f32.mrb[123].mxu0 }
 0x882   :  { %v2954_v53 = vadd.f32 %v3830_v44, %v5824_v11  ;;  %v3833_v36 = vadd.f32 %v3832_v12, %v3831_v63 }
 0x884   :  { %v2957_v40 = vadd.f32 %v3833_v36, %v5824_v11  ;;  %v5889_v25 = vadd.f32 %v2954_v53, %v5626_v52 }
 0x886   :  { %3090 = vadd.xlane.f32.xlu0 %v5889_v25  ;;  %v3834_v38 = vpop.f32.mrb[124].mxu0  ;;  %v5893_v45 = vadd.f32 %v2957_v40, %v5629_v28 }
 0x887   :  { %v3835_v20 = vpop.f32.mrb[125].mxu0 }
 0x888   :  { %v3836_v6 = vadd.f32 %v3835_v20, %v3834_v38  ;;  %3092 = vadd.xlane.f32.xlu1 %v5893_v45  ;;  %v3837_v41 = vpop.f32.mrb[126].mxu0 }
 0x889   :  { %v3838_v5 = vpop.f32.mrb[127].mxu0 }
 0x88a   :  { %v2962_v42 = vadd.f32 %v3836_v6, %v5824_v11  ;;  %v3839_v50 = vadd.f32 %v3838_v5, %v3837_v41 }
 0x88c   :  { %v2965_v62 = vadd.f32 %v3839_v50, %v5824_v11  ;;  %v5899_v52 = vadd.f32 %v2962_v42, %v5642_v59 }
 0x88e   :  { %3094 = vadd.xlane.f32.xlu0 %v5899_v52  ;;  %v3840_v49 = vpop.f32.mrb[128].mxu0  ;;  %v5903_v28 = vadd.f32 %v2965_v62, %v5639_v37 }
 0x88f   :  { %v3841_v15 = vpop.f32.mrb[129].mxu0 }
 0x890   :  { %v3842_v55 = vadd.f32 %v3841_v15, %v3840_v49  ;;  %3096 = vadd.xlane.f32.xlu1 %v5903_v28  ;;  %v3843_v19 = vpop.f32.mrb[130].mxu0 }
 0x891   :  { %v3844_v1 = vpop.f32.mrb[131].mxu0 }
 0x892   :  { %v2970_v30 = vadd.f32 %v3842_v55, %v5824_v11  ;;  %v3845_v61 = vadd.f32 %v3844_v1, %v3843_v19 }
 0x894   :  { %v2973_v23 = vadd.f32 %v3845_v61, %v5824_v11  ;;  %v5909_v59 = vadd.f32 %v2970_v30, %v5656_v33 }
 0x896   :  { %3098 = vadd.xlane.f32.xlu0 %v5909_v59  ;;  %v3846_v0 = vpop.f32.mrb[132].mxu0  ;;  %v5913_v37 = vadd.f32 %v2973_v23, %v5652_v3 }
 0x897   :  { %v3847_v2 = vpop.f32.mrb[133].mxu0 }
 0x898   :  { %v3848_v60 = vadd.f32 %v3847_v2, %v3846_v0  ;;  %3100 = vadd.xlane.f32.xlu1 %v5913_v37  ;;  %v3849_v46 = vpop.f32.mrb[134].mxu0 }
 0x899   :  { %v3850_v24 = vpop.f32.mrb[135].mxu0 }
 0x89a   :  { %v2978_v54 = vadd.f32 %v3848_v60, %v5824_v11  ;;  %v3851_v4 = vadd.f32 %v3850_v24, %v3849_v46 }
 0x89c   :  { %v2981_v44 = vadd.f32 %v3851_v4, %v5824_v11  ;;  %v5919_v33 = vadd.f32 %v2978_v54, %v5668_v9 }
 0x89e   :  { %3102 = vadd.xlane.f32.xlu0 %v5919_v33  ;;  %v5923_v63 = vadd.f32 %v2981_v44, %v5665_v39 }
 0x8a0   :  { %3104 = vadd.xlane.f32.xlu1 %v5923_v63 }
 0x8e5   :  { %v3852_v3 = vpop.f32.mrb[136].mxu0 }
 0x8e6   :  { %v3853_v12 = vpop.f32.mrb[137].mxu0 }
 0x8e7   :  { %v3854_v53 = vadd.f32 %v3853_v12, %v3852_v3  ;;  %v3855_v36 = vpop.f32.mrb[138].mxu0 }
 0x8e8   :  { %v3856_v40 = vpop.f32.mrb[139].mxu0 }
 0x8e9   :  { %v2986_v38 = vadd.f32 %v3854_v53, %v5824_v11  ;;  %v3857_v20 = vadd.f32 %v3856_v40, %v3855_v36 }
 0x8eb   :  { %v2989_v6 = vadd.f32 %v3857_v20, %v5824_v11  ;;  %v5929_v9 = vadd.f32 %v2986_v38, %v5678_v47 }
 0x8ed   :  { %3106 = vadd.xlane.f32.xlu0 %v5929_v9  ;;  %v3858_v41 = vpop.f32.mrb[140].mxu0  ;;  %v5933_v39 = vadd.f32 %v2989_v6, %v5681_v43 }
 0x8ee   :  { %v3859_v5 = vpop.f32.mrb[141].mxu0 }
 0x8ef   :  { %v3860_v42 = vadd.f32 %v3859_v5, %v3858_v41  ;;  %3108 = vadd.xlane.f32.xlu1 %v5933_v39  ;;  %v3861_v50 = vpop.f32.mrb[142].mxu0 }
 0x8f0   :  { %v3862_v62 = vpop.f32.mrb[143].mxu0 }
 0x8f1   :  { %v2994_v49 = vadd.f32 %v3860_v42, %v5824_v11  ;;  %v3863_v15 = vadd.f32 %v3862_v62, %v3861_v50  ;;  %v3067_v50 = vpop.xlane.xlu0 %3066 }
 0x8f3   :  { %v2997_v55 = vadd.f32 %v3863_v15, %v5824_v11  ;;  %v5939_v47 = vadd.f32 %v2994_v49, %v5691_v32  ;;  %v3069_v49 = vpop.xlane.xlu1 %3068 }
 0x8f5   :  { %3110 = vadd.xlane.f32.xlu0 %v5939_v47  ;;  %v5943_v43 = vadd.f32 %v2997_v55, %v5694_v27  ;;  %v3130_v55 = vmul.f32 0.0078125, %v3067_v50 }
 0x8f6   :  { %v3864_v19 = vpop.f32.mrb[144].mxu0 }
 0x8f7   :  { %v3865_v1 = vpop.f32.mrb[145].mxu0  ;;  %3112 = vadd.xlane.f32.xlu1 %v5943_v43 }
 0x8f8   :  { %v3866_v30 = vadd.f32 %v3865_v1, %v3864_v19  ;;  %v3867_v61 = vpop.f32.mrb[146].mxu0 }
 0x8f9   :  { %v3868_v23 = vpop.f32.mrb[147].mxu0 }
 0x8fa   :  { %v3002_v0 = vadd.f32 %v3866_v30, %v5824_v11  ;;  %v3869_v2 = vadd.f32 %v3868_v23, %v3867_v61  ;;  %v3071_v30 = vpop.xlane.xlu0 %3070  ;;  %v3131_v23 = vmul.f32 0.0078125, %v3069_v49 }
 0x8fc   :  { %v3005_v60 = vadd.f32 %v3869_v2, %v5824_v11  ;;  %v5949_v32 = vadd.f32 %v3002_v0, %v5704_v17  ;;  %v3073_v2 = vpop.xlane.xlu1 %3072 }
 0x8fe   :  { %3114 = vadd.xlane.f32.xlu0 %v5949_v32  ;;  %v3870_v46 = vpop.f32.mrb[148].mxu0  ;;  %v5953_v27 = vadd.f32 %v3005_v60, %v5707_v7  ;;  %v5978_v60 = vsub.f32 %v5829_v29, %v3130_v55 }
 0x8ff   :  { %v3871_v24 = vpop.f32.mrb[149].mxu0 }
 0x900   :  { %v3872_v54 = vadd.f32 %v3871_v24, %v3870_v46  ;;  %3116 = vadd.xlane.f32.xlu1 %v5953_v27  ;;  %v3873_v4 = vpop.f32.mrb[150].mxu0  ;;  %v3132_v46 = vmul.f32 0.0078125, %v3071_v30 }
 0x901   :  { %v3874_v44 = vpop.f32.mrb[151].mxu0 }
 0x902   :  { %v3010_v3 = vadd.f32 %v3872_v54, %v5824_v11  ;;  %v3875_v12 = vadd.f32 %v3874_v44, %v3873_v4  ;;  %v3075_v54 = vpop.xlane.xlu0 %3074  ;;  %v5985_v4 = vsub.f32 %v5833_v56, %v3131_v23  ;;  %v3133_v44 = vmul.f32 0.0078125, %v3073_v2 }
 0x903   :  { %v5992_v29 = vsub.f32 %v5839_v14, %v3132_v46 }
 0x904   :  { %v3013_v53 = vadd.f32 %v3875_v12, %v5824_v11  ;;  %v5959_v17 = vadd.f32 %v3010_v3, %v5717_v13  ;;  %v3077_v12 = vpop.xlane.xlu1 %3076  ;;  %v5998_v56 = vsub.f32 %v5843_v48, %v3133_v44 }
 0x906   :  { %3118 = vadd.xlane.f32.xlu0 %v5959_v17  ;;  %v5963_v36 = vadd.f32 %v3013_v53, %v5720_v35  ;;  %v3876_v7 = vpop.f32.mrb[152].mxu0  ;;  %v3134_v53 = vmul.f32 0.0078125, %v3075_v54 }
 0x907   :  { %v3877_v40 = vpop.f32.mrb[153].mxu0 }
 0x908   :  { %3120 = vadd.xlane.f32.xlu1 %v5963_v36  ;;  %v3878_v38 = vadd.f32 %v3877_v40, %v3876_v7  ;;  %v3879_v20 = vpop.f32.mrb[154].mxu0  ;;  %v3135_v7 = vmul.f32 0.0078125, %v3077_v12  ;;  %v3081_v40 = vpop.xlane.xlu1 %3080 }
 0x909   :  { %v3880_v6 = vpop.f32.mrb[155].mxu0  ;;  %v3137_v48 = vmul.f32 0.0078125, %v3081_v40 }
 0x90a   :  { %v3018_v41 = vadd.f32 %v3878_v38, %v5824_v11  ;;  %v3881_v5 = vadd.f32 %v3880_v6, %v3879_v20  ;;  %v6003_v38 = vsub.f32 %v5849_v51, %v3134_v53  ;;  %v3196_v20 = vmul.f32 %v5992_v29, %v5992_v29 }
 0x90c   :  { %v3021_v42 = vadd.f32 %v3881_v5, %v5824_v11  ;;  %v5969_v13 = vadd.f32 %v3018_v41, %v5730_v22  ;;  %v6008_v41 = vsub.f32 %v5853_v57, %v3135_v7  ;;  %v3197_v5 = vmul.f32 %v5998_v56, %v5998_v56 }
 0x90e   :  { %3122 = vadd.xlane.f32.xlu0 %v5969_v13  ;;  %v3882_v35 = vpop.f32.mrb[156].mxu0  ;;  %v5973_v62 = vadd.f32 %v3021_v42, %v5733_v26  ;;  %v3085_v42 = vpop.xlane.xlu1 %3084  ;;  %v3199_v55 = vmul.f32 %v6008_v41, %v6008_v41 }
 0x90f   :  { %v3883_v15 = vpop.f32.mrb[157].mxu0  ;;  %v3139_v57 = vmul.f32 0.0078125, %v3085_v42 }
 0x910   :  { %v3884_v19 = vadd.f32 %v3883_v15, %v3882_v35  ;;  %3124 = vadd.xlane.f32.xlu1 %v5973_v62  ;;  %v3885_v1 = vpop.f32.mrb[158].mxu0  ;;  %v3198_v35 = vmul.f32 %v6003_v38, %v6003_v38  ;;  %v6018_v15 = vsub.f32 %v5863_v8, %v3137_v48 }
 0x911   :  { %v3886_v61 = vpop.f32.mrb[159].mxu0  ;;  %v6028_v23 = vsub.f32 %v5873_v58, %v3139_v57 }
 0x912   :  { %v3026_v22 = vadd.f32 %v3884_v19, %v5824_v11  ;;  %v3887_v0 = vadd.f32 %v3886_v61, %v3885_v1  ;;  %v3089_v19 = vpop.xlane.xlu1 %3088 }
 0x913   :  { %v3141_v8 = vmul.f32 0.0078125, %v3089_v19  ;;  %v3203_v44 = vmul.f32 %v6028_v23, %v6028_v23 }
 0x914   :  { %v3029_v26 = vadd.f32 %v3887_v0, %v5824_v11  ;;  %v5982_v24 = vadd.f32 %v3026_v22, %v5743_v16  ;;  %v3194_v16 = vmul.f32 %v5978_v60, %v5978_v60  ;;  %v3079_v11 = vpop.xlane.xlu0 %3078  ;;  %v3201_v22 = vmul.f32 %v6018_v15, %v6018_v15 }
 0x915   :  { %v3136_v14 = vmul.f32 0.0078125, %v3079_v11  ;;  %v6038_v54 = vsub.f32 %v5883_v34, %v3141_v8 }
 0x916   :  { %3126 = vadd.xlane.f32.xlu0 %v5982_v24  ;;  %v5989_v3 = vadd.f32 %v3029_v26, %v5746_v31  ;;  %v3195_v31 = vmul.f32 %v5985_v4, %v5985_v4  ;;  %v3093_v0 = vpop.xlane.xlu1 %3092 }
 0x917   :  { %v6013_v50 = vsub.f32 %v5859_v21, %v3136_v14  ;;  %v3143_v58 = vmul.f32 0.0078125, %v3093_v0 }
 0x918   :  { %3128 = vadd.xlane.f32.xlu1 %v5989_v3  ;;  %v3083_v6 = vpop.xlane.xlu0 %3082 }
 0x919   :  { %v3138_v51 = vmul.f32 0.0078125, %v3083_v6  ;;  %v3200_v30 = vmul.f32 %v6013_v50, %v6013_v50  ;;  %v6048_v7 = vsub.f32 %v5893_v45, %v3143_v58 }
 0x91a   :  { %3226 = vadd.xlane.f32.xlu0 %v3194_v16 }
 0x91b   :  { %v6023_v1 = vsub.f32 %v5869_v10, %v3138_v51 }
 0x91c   :  { %3228 = vadd.xlane.f32.xlu1 %v3195_v31  ;;  %v3087_v49 = vpop.xlane.xlu0 %3086  ;;  %v3205_v31 = vmul.f32 %v6038_v54, %v6038_v54 }
 0x91d   :  { %v3140_v21 = vmul.f32 0.0078125, %v3087_v49  ;;  %v3202_v46 = vmul.f32 %v6023_v1, %v6023_v1  ;;  %v3097_v12 = vpop.xlane.xlu1 %3096 }
 0x91e   :  { %3230 = vadd.xlane.f32.xlu0 %v3196_v20  ;;  %v3145_v34 = vmul.f32 0.0078125, %v3097_v12 }
 0x91f   :  { %v6033_v2 = vsub.f32 %v5879_v18, %v3140_v21 }
 0x920   :  { %3232 = vadd.xlane.f32.xlu1 %v3197_v5  ;;  %v3091_v61 = vpop.xlane.xlu0 %3090  ;;  %v6058_v48 = vsub.f32 %v5903_v28, %v3145_v34  ;;  %v3207_v5 = vmul.f32 %v6048_v7, %v6048_v7 }
 0x921   :  { %v3142_v10 = vmul.f32 0.0078125, %v3091_v61  ;;  %v3204_v16 = vmul.f32 %v6033_v2, %v6033_v2 }
 0x922   :  { %3234 = vadd.xlane.f32.xlu0 %v3198_v35  ;;  %v3209_v28 = vmul.f32 %v6058_v48, %v6058_v48 }
 0x923   :  { %v6043_v53 = vsub.f32 %v5889_v25, %v3142_v10 }
 0x924   :  { %3236 = vadd.xlane.f32.xlu1 %v3199_v55  ;;  %v3095_v26 = vpop.xlane.xlu0 %3094 }
 0x925   :  { %v3144_v18 = vmul.f32 0.0078125, %v3095_v26  ;;  %v3101_v40 = vpop.xlane.xlu1 %3100  ;;  %v3206_v20 = vmul.f32 %v6043_v53, %v6043_v53 }
 0x926   :  { %3238 = vadd.xlane.f32.xlu0 %v3200_v30  ;;  %v3147_v45 = vmul.f32 0.0078125, %v3101_v40 }
 0x927   :  { %v6053_v14 = vsub.f32 %v5899_v52, %v3144_v18 }
 0x928   :  { %3240 = vadd.xlane.f32.xlu1 %v3201_v22  ;;  %v3099_v11 = vpop.xlane.xlu0 %3098  ;;  %v6068_v49 = vsub.f32 %v5913_v37, %v3147_v45 }
 0x929   :  { %v3146_v25 = vmul.f32 0.0078125, %v3099_v11  ;;  %v3208_v35 = vmul.f32 %v6053_v14, %v6053_v14 }
 0x92a   :  { %3242 = vadd.xlane.f32.xlu0 %v3202_v46  ;;  %v3211_v37 = vmul.f32 %v6068_v49, %v6068_v49 }
 0x92b   :  { %v6063_v51 = vsub.f32 %v5909_v59, %v3146_v25 }
 0x92c   :  { %3244 = vadd.xlane.f32.xlu1 %v3203_v44  ;;  %v3103_v6 = vpop.xlane.xlu0 %3102 }
 0x92d   :  { %v3105_v42 = vpop.xlane.xlu1 %3104  ;;  %v3148_v52 = vmul.f32 0.0078125, %v3103_v6  ;;  %v3210_v59 = vmul.f32 %v6063_v51, %v6063_v51 }
 0x92e   :  { %3246 = vadd.xlane.f32.xlu0 %v3204_v16  ;;  %v3149_v57 = vmul.f32 0.0078125, %v3105_v42 }
 0x92f   :  { %v6073_v55 = vsub.f32 %v5919_v33, %v3148_v52 }
 0x930   :  { %3248 = vadd.xlane.f32.xlu1 %v3205_v31  ;;  %v6078_v19 = vsub.f32 %v5923_v63, %v3149_v57 }
 0x931   :  { %v3212_v21 = vmul.f32 %v6073_v55, %v6073_v55 }
 0x932   :  { %3250 = vadd.xlane.f32.xlu0 %v3206_v20  ;;  %v3213_v33 = vmul.f32 %v6078_v19, %v6078_v19 }
 0x934   :  { %3252 = vadd.xlane.f32.xlu1 %v3207_v5 }
 0x936   :  { %3254 = vadd.xlane.f32.xlu0 %v3208_v35 }
 0x938   :  { %3256 = vadd.xlane.f32.xlu1 %v3209_v28 }
 0x93a   :  { %3258 = vadd.xlane.f32.xlu0 %v3210_v59 }
 0x93c   :  { %3260 = vadd.xlane.f32.xlu1 %v3211_v37 }
 0x93e   :  { %3262 = vadd.xlane.f32.xlu0 %v3212_v21 }
 0x940   :  { %3264 = vadd.xlane.f32.xlu1 %v3213_v33 }
 0x97a   :  { %v3107_v30 = vpop.xlane.xlu0 %3106 }
 0x97b   :  { %v3150_v61 = vmul.f32 0.0078125, %v3107_v30 }
 0x97c   :  { %v3109_v8 = vpop.xlane.xlu1 %3108 }
 0x97d   :  { %v6087_v22 = vsub.f32 %v5929_v9, %v3150_v61  ;;  %v3151_v63 = vmul.f32 0.0078125, %v3109_v8 }
 0x97f   :  { %v6090_v0 = vsub.f32 %v5933_v39, %v3151_v63  ;;  %v3214_v10 = vmul.f32 %v6087_v22, %v6087_v22 }
 0x981   :  { %3266 = vadd.xlane.f32.xlu0 %v3214_v10  ;;  %v3215_v46 = vmul.f32 %v6090_v0, %v6090_v0 }
 0x982   :  { %v3111_v26 = vpop.xlane.xlu0 %3110 }
 0x983   :  { %v3152_v58 = vmul.f32 0.0078125, %v3111_v26  ;;  %3268 = vadd.xlane.f32.xlu1 %v3215_v46 }
 0x984   :  { %v3113_v44 = vpop.xlane.xlu1 %3112 }
 0x985   :  { %v6097_v12 = vsub.f32 %v5939_v47, %v3152_v58  ;;  %v3153_v9 = vmul.f32 0.0078125, %v3113_v44 }
 0x987   :  { %v6100_v18 = vsub.f32 %v5943_v43, %v3153_v9  ;;  %v3216_v39 = vmul.f32 %v6097_v12, %v6097_v12 }
 0x989   :  { %3270 = vadd.xlane.f32.xlu0 %v3216_v39  ;;  %v3217_v16 = vmul.f32 %v6100_v18, %v6100_v18 }
 0x98b   :  { %v3115_v11 = vpop.xlane.xlu0 %3114  ;;  %3272 = vadd.xlane.f32.xlu1 %v3217_v16 }
 0x98c   :  { %v3154_v34 = vmul.f32 0.0078125, %v3115_v11 }
 0x98d   :  { %v3117_v31 = vpop.xlane.xlu1 %3116 }
 0x98e   :  { %v6107_v40 = vsub.f32 %v5949_v32, %v3154_v34  ;;  %v3155_v47 = vmul.f32 0.0078125, %v3117_v31 }
 0x990   :  { %v6110_v25 = vsub.f32 %v5953_v27, %v3155_v47  ;;  %v3218_v43 = vmul.f32 %v6107_v40, %v6107_v40 }
 0x992   :  { %3274 = vadd.xlane.f32.xlu0 %v3218_v43  ;;  %v3219_v20 = vmul.f32 %v6110_v25, %v6110_v25 }
 0x993   :  { %v3119_v6 = vpop.xlane.xlu0 %3118 }
 0x994   :  { %v3156_v45 = vmul.f32 0.0078125, %v3119_v6  ;;  %3276 = vadd.xlane.f32.xlu1 %v3219_v20 }
 0x995   :  { %v3121_v5 = vpop.xlane.xlu1 %3120 }
 0x996   :  { %v6117_v42 = vsub.f32 %v5959_v17, %v3156_v45  ;;  %v3157_v32 = vmul.f32 0.0078125, %v3121_v5 }
 0x998   :  { %v6120_v52 = vsub.f32 %v5963_v36, %v3157_v32  ;;  %v3220_v27 = vmul.f32 %v6117_v42, %v6117_v42 }
 0x99a   :  { %3278 = vadd.xlane.f32.xlu0 %v3220_v27  ;;  %v3221_v35 = vmul.f32 %v6120_v52, %v6120_v52 }
 0x99b   :  { %v3123_v57 = vpop.xlane.xlu0 %3122 }
 0x99c   :  { %3280 = vadd.xlane.f32.xlu1 %v3221_v35  ;;  %v3158_v28 = vmul.f32 0.0078125, %v3123_v57 }
 0x99d   :  { %v3125_v59 = vpop.xlane.xlu1 %3124 }
 0x99e   :  { %v6127_v37 = vsub.f32 %v5969_v13, %v3158_v28  ;;  %v3159_v17 = vmul.f32 0.0078125, %v3125_v59  ;;  %v6149_v59 = vld [vmem:[%s6291_s9] ss:$0 sm:$0xff]  ;;  %s4654_s9 = smov [#allocation13]  }
 0x9a0   :  { %v6130_v21 = vsub.f32 %v5973_v62, %v3159_v17  ;;  %v3222_v36 = vmul.f32 %v6127_v37, %v6127_v37 }
 0x9a2   :  { %3282 = vadd.xlane.f32.xlu0 %v3222_v36  ;;  %v3223_v33 = vmul.f32 %v6130_v21, %v6130_v21 }
 0x9a3   :  { %v3127_v30 = vpop.xlane.xlu0 %3126 }
 0x9a4   :  { %v3160_v61 = vmul.f32 0.0078125, %v3127_v30  ;;  %3284 = vadd.xlane.f32.xlu1 %v3223_v33 }
 0x9a5   :  { %v3129_v8 = vpop.xlane.xlu1 %3128 }
 0x9a6   :  { %v6137_v63 = vsub.f32 %v5982_v24, %v3160_v61  ;;  %v3161_v13 = vmul.f32 0.0078125, %v3129_v8  ;;  %v6155_v8 = vld [vmem:[%s6292_s10] ss:$0 sm:$0xff]  ;;  %s3575_s10 = sshll.u32 %s4654_s9, 4  ;;  %s3576_s10 = int_to_ptr.vmem [resolvable:$true] %s3575_s10 }
 0x9a7   :  { %v3227_v10 = vpop.xlane.xlu0 %3226  ;;  %s4588_s19 = scalar_lea.vmem %s3576_s10, 4096  ;;  %p4593_p13 = scmp.lt.s32.totalorder %s3576_s10, %s3576_s10 }
 0x9a8   :  { %v6140_v46 = vsub.f32 %v5989_v3, %v3161_v13  ;;  %v3290_v62 = vmul.f32 0.0078125, %v3227_v10  ;;  %v3224_v26 = vmul.f32 %v6137_v63, %v6137_v63  ;;  %p4589_p12 = scmp.ne.s32.totalorder %s3576_s10, %s4588_s19  ;;  %p4594_p0 = scmp.lt.s32.totalorder %s4588_s19, %s4588_s19 }
 0x9a9   :  { %v3229_v58 = vpop.xlane.xlu1 %3228 }
 0x9aa   :  { %v3322_v44 = vadd.f32 1e-05, %v3290_v62  ;;  %v3291_v9 = vmul.f32 0.0078125, %v3229_v58  ;;  %3286 = vadd.xlane.f32.xlu0 %v3224_v26  ;;  %v3225_v39 = vmul.f32 %v6140_v46, %v6140_v46  ;;  %p4595_p1 = por %p4594_p0, %p4593_p13 }
 0x9ab   :  { %v3231_v16 = vpop.xlane.xlu0 %3230 }
 0x9ac   :  { %4414 = vrsqrt.f32 %v3322_v44  ;;  %v3323_v24 = vadd.f32 1e-05, %v3291_v9  ;;  %v3292_v11 = vmul.f32 0.0078125, %v3231_v16  ;;  %3288 = vadd.xlane.f32.xlu1 %v3225_v39  ;;  %p4596_p2 = pnand %p4595_p1, %p4589_p12 }
 0x9ad   :  { %v3233_v34 = vpop.xlane.xlu1 %3232 }
 0x9ae   :  { %4416 = vrsqrt.f32 %v3323_v24  ;;  %v3324_v3 = vadd.f32 1e-05, %v3292_v11  ;;  %v3293_v31 = vmul.f32 0.0078125, %v3233_v34 }
 0x9af   :  { %v3235_v47 = vpop.xlane.xlu0 %3234 }
 0x9b0   :  { %4418 = vrsqrt.f32 %v3324_v3  ;;  %v3325_v43 = vadd.f32 1e-05, %v3293_v31  ;;  %v3294_v20 = vmul.f32 0.0078125, %v3235_v47 }
 0x9b1   :  { %v3237_v6 = vpop.xlane.xlu1 %3236 }
 0x9b2   :  { %4420 = vrsqrt.f32 %v3325_v43  ;;  %v3326_v45 = vadd.f32 1e-05, %v3294_v20  ;;  %v3295_v5 = vmul.f32 0.0078125, %v3237_v6 }
 0x9b3   :  { %v3239_v32 = vpop.xlane.xlu0 %3238 }
 0x9b4   :  { %4422 = vrsqrt.f32 %v3326_v45  ;;  %v3327_v27 = vadd.f32 1e-05, %v3295_v5  ;;  %v3296_v35 = vmul.f32 0.0078125, %v3239_v32 }
 0x9b5   :  { %v3241_v57 = vpop.xlane.xlu1 %3240 }
 0x9b6   :  { %v4415_v28 = vpop.eup %4414  ;;  %4424 = vrsqrt.f32 %v3327_v27  ;;  %v3328_v17 = vadd.f32 1e-05, %v3296_v35  ;;  %v3297_v36 = vmul.f32 0.0078125, %v3241_v57 }
 0x9b7   :  { %v3386_v33 = vmul.f32 %v4415_v28, %v5978_v60  ;;  %v3243_v30 = vpop.xlane.xlu0 %3242 }
 0x9b8   :  { %v4417_v61 = vpop.eup %4416  ;;  %4426 = vrsqrt.f32 %v3328_v17  ;;  %v3329_v13 = vadd.f32 1e-05, %v3297_v36  ;;  %v3298_v10 = vmul.f32 0.0078125, %v3243_v30 }
 0x9b9   :  { %v3424_v62 = vmul.f32 %v6149_v59, %v3386_v33  ;;  %v3387_v26 = vmul.f32 %v4417_v61, %v5985_v4  ;;  %v3245_v58 = vpop.xlane.xlu1 %3244 }
 0x9ba   :  { %v4419_v44 = vpop.eup %4418  ;;  %4428 = vrsqrt.f32 %v3329_v13  ;;  %v3330_v9 = vadd.f32 1e-05, %v3298_v10  ;;  %v3299_v39 = vmul.f32 0.0078125, %v3245_v58 }
 0x9bb   :  { %v3462_v60 = vadd.f32 %v6155_v8, %v3424_v62  ;;  %v3425_v16 = vmul.f32 %v6149_v59, %v3387_v26  ;;  %v3388_v24 = vmul.f32 %v4419_v44, %v5992_v29  ;;  %v3247_v11 = vpop.xlane.xlu0 %3246 }
 0x9bc   :  { %v4421_v34 = vpop.eup %4420  ;;  %4430 = vrsqrt.f32 %v3330_v9  ;;  %v3331_v3 = vadd.f32 1e-05, %v3299_v39  ;;  %v3300_v31 = vmul.f32 0.0078125, %v3247_v11 }
 0x9bd   :  { %3494 = vst [vmem:[#allocation12] sm:$0xff] %v3462_v60  ;;  %v3463_v47 = vadd.f32 %v6155_v8, %v3425_v16  ;;  %v3426_v4 = vmul.f32 %v6149_v59, %v3388_v24  ;;  %v3389_v43 = vmul.f32 %v4421_v34, %v5998_v56  ;;  %v3249_v20 = vpop.xlane.xlu1 %3248 }
 0x9be   :  { %v4423_v6 = vpop.eup %4422  ;;  %4432 = vrsqrt.f32 %v3331_v3  ;;  %v3332_v45 = vadd.f32 1e-05, %v3300_v31  ;;  %v3301_v5 = vmul.f32 0.0078125, %v3249_v20 }
 0x9bf   :  { %3495 = vst [vmem:[#allocation12 + $0x8] sm:$0xff] %v3463_v47  ;;  %v3464_v29 = vadd.f32 %v6155_v8, %v3426_v4  ;;  %v3427_v32 = vmul.f32 %v6149_v59, %v3389_v43  ;;  %v3390_v27 = vmul.f32 %v4423_v6, %v6003_v38  ;;  %v3251_v35 = vpop.xlane.xlu0 %3250 }
 0x9c0   :  { %v4425_v57 = vpop.eup %4424  ;;  %4434 = vrsqrt.f32 %v3332_v45  ;;  %v3333_v28 = vadd.f32 1e-05, %v3301_v5  ;;  %v3302_v17 = vmul.f32 0.0078125, %v3251_v35 }
 0x9c1   :  { %3496 = vst [vmem:[#allocation12 + $0x10] sm:$0xff] %v3464_v29  ;;  %v3465_v56 = vadd.f32 %v6155_v8, %v3427_v32  ;;  %v3428_v36 = vmul.f32 %v6149_v59, %v3390_v27  ;;  %v3391_v33 = vmul.f32 %v4425_v57, %v6008_v41  ;;  %v3253_v30 = vpop.xlane.xlu1 %3252 }
 0x9c2   :  { %v4427_v61 = vpop.eup %4426  ;;  %4436 = vrsqrt.f32 %v3333_v28  ;;  %v3334_v13 = vadd.f32 1e-05, %v3302_v17  ;;  %v3303_v10 = vmul.f32 0.0078125, %v3253_v30 }
 0x9c3   :  { %3497 = vst [vmem:[#allocation12 + $0x18] sm:$0xff] %v3465_v56  ;;  %v3466_v38 = vadd.f32 %v6155_v8, %v3428_v36  ;;  %v3429_v62 = vmul.f32 %v6149_v59, %v3391_v33  ;;  %v3392_v26 = vmul.f32 %v4427_v61, %v6013_v50  ;;  %v3255_v58 = vpop.xlane.xlu0 %3254 }
 0x9c4   :  { %v4429_v44 = vpop.eup %4428  ;;  %4438 = vrsqrt.f32 %v3334_v13  ;;  %v3335_v9 = vadd.f32 1e-05, %v3303_v10  ;;  %v3304_v39 = vmul.f32 0.0078125, %v3255_v58 }
 0x9c5   :  { %3498 = vst [vmem:[#allocation12 + $0x20] sm:$0xff] %v3466_v38  ;;  %v3467_v41 = vadd.f32 %v6155_v8, %v3429_v62  ;;  %v3430_v60 = vmul.f32 %v6149_v59, %v3392_v26  ;;  %v3393_v16 = vmul.f32 %v4429_v44, %v6018_v15  ;;  %v3257_v24 = vpop.xlane.xlu1 %3256 }
 0x9c6   :  { %v4431_v11 = vpop.eup %4430  ;;  %4440 = vrsqrt.f32 %v3335_v9  ;;  %v3336_v34 = vadd.f32 1e-05, %v3304_v39  ;;  %v3305_v3 = vmul.f32 0.0078125, %v3257_v24 }
 0x9c7   :  { %3499 = vst [vmem:[#allocation12 + $0x28] sm:$0xff] %v3467_v41  ;;  %v3468_v50 = vadd.f32 %v6155_v8, %v3430_v60  ;;  %v3431_v31 = vmul.f32 %v6149_v59, %v3393_v16  ;;  %v3394_v47 = vmul.f32 %v4431_v11, %v6023_v1  ;;  %v3259_v4 = vpop.xlane.xlu0 %3258 }
 0x9c8   :  { %v4433_v43 = vpop.eup %4432  ;;  %4442 = vrsqrt.f32 %v3336_v34  ;;  %v3337_v20 = vadd.f32 1e-05, %v3305_v3  ;;  %v3306_v6 = vmul.f32 0.0078125, %v3259_v4 }
 0x9c9   :  { %3500 = vst [vmem:[#allocation12 + $0x30] sm:$0xff] %v3468_v50  ;;  %v3469_v15 = vadd.f32 %v6155_v8, %v3431_v31  ;;  %v3432_v45 = vmul.f32 %v6149_v59, %v3394_v47  ;;  %v3395_v5 = vmul.f32 %v4433_v43, %v6028_v23  ;;  %v3261_v29 = vpop.xlane.xlu1 %3260 }
 0x9ca   :  { %v4435_v32 = vpop.eup %4434  ;;  %4444 = vrsqrt.f32 %v3337_v20  ;;  %v3338_v27 = vadd.f32 1e-05, %v3306_v6  ;;  %v3307_v35 = vmul.f32 0.0078125, %v3261_v29 }
 0x9cb   :  { %3501 = vst [vmem:[#allocation12 + $0x38] sm:$0xff] %v3469_v15  ;;  %v3470_v1 = vadd.f32 %v6155_v8, %v3432_v45  ;;  %v3433_v57 = vmul.f32 %v6149_v59, %v3395_v5  ;;  %v3396_v28 = vmul.f32 %v4435_v32, %v6033_v2  ;;  %v3263_v17 = vpop.xlane.xlu0 %3262 }
 0x9cc   :  { %v4437_v56 = vpop.eup %4436  ;;  %4446 = vrsqrt.f32 %v3338_v27  ;;  %v3339_v36 = vadd.f32 1e-05, %v3307_v35  ;;  %v3308_v33 = vmul.f32 0.0078125, %v3263_v17 }
 0x9cd   :  { %3502 = vst [vmem:[#allocation12 + $0x40] sm:$0xff] %v3470_v1  ;;  %v3471_v23 = vadd.f32 %v6155_v8, %v3433_v57  ;;  %v3434_v30 = vmul.f32 %v6149_v59, %v3396_v28  ;;  %v3397_v61 = vmul.f32 %v4437_v56, %v6038_v54  ;;  %v3265_v13 = vpop.xlane.xlu1 %3264 }
 0x9ce   :  { %v4439_v10 = vpop.eup %4438  ;;  %4448 = vrsqrt.f32 %v3339_v36  ;;  %v3340_v38 = vadd.f32 1e-05, %v3308_v33  ;;  %v3309_v62 = vmul.f32 0.0078125, %v3265_v13 }
 0x9cf   :  { %3503 = vst [vmem:[#allocation12 + $0x48] sm:$0xff] %v3471_v23  ;;  %v3472_v2 = vadd.f32 %v6155_v8, %v3434_v30  ;;  %v3435_v26 = vmul.f32 %v6149_v59, %v3397_v61  ;;  %v3398_v58 = vmul.f32 %v4439_v10, %v6043_v53 }
 0x9d0   :  { %v4441_v44 = vpop.eup %4440  ;;  %4450 = vrsqrt.f32 %v3340_v38  ;;  %v3341_v9 = vadd.f32 1e-05, %v3309_v62 }
 0x9d1   :  { %3504 = vst [vmem:[#allocation12 + $0x50] sm:$0xff] %v3472_v2  ;;  %v3473_v54 = vadd.f32 %v6155_v8, %v3435_v26  ;;  %v3436_v39 = vmul.f32 %v6149_v59, %v3398_v58  ;;  %v3399_v41 = vmul.f32 %v4441_v44, %v6048_v7 }
 0x9d2   :  { %4599 = shalt.err (!%p4596_p2)
}
 0x9d3   :  { %s4600_s24 = scalar_lea.hbm %s6294_s12, 4096 }
 0x9d4   :  { %p4601_p3 = scmp.ne.s32.totalorder %s6294_s12, %s4600_s24  ;;  %p4604_p4 = scmp.lt.u32.totalorder %s4600_s24, %s6294_s12 }
 0x9d6   :  { %p4606_p5 = pnand %p4604_p4, %p4601_p3 }
 0x9d8   :  { %4609 = shalt.err (!%p4606_p5)
}
 0x9d9   :  { %3581 = dma.vmem_to_hbm [thread:$0]  %s3576_s10, 4096, %s6294_s12, [#allocation14], %s4647_s22, %s4647_s22, %s4648_s29   ;;  %v4443_v53 = vpop.eup %4442  ;;  %4452 = vrsqrt.f32 %v3341_v9  ;;  %3505 = vst [vmem:[#allocation12 + $0x58] sm:$0xff] %v3473_v54  ;;  %v3474_v7 = vadd.f32 %v6155_v8, %v3436_v39  ;;  %v3437_v60 = vmul.f32 %v6149_v59, %v3399_v41 }
 0x9da   :  { %v3400_v16 = vmul.f32 %v4443_v53, %v6053_v14  ;;  %v4445_v24 = vpop.eup %4444  ;;  %s4655_s12 = smov [#allocation12]  }
 0x9db   :  { %3506 = vst [vmem:[#allocation12 + $0x60] sm:$0xff] %v3474_v7  ;;  %v3475_v11 = vadd.f32 %v6155_v8, %v3437_v60  ;;  %v3401_v3 = vmul.f32 %v4445_v24, %v6058_v48  ;;  %v4447_v50 = vpop.eup %4446  ;;  %s3563_s30 = sshll.u32 %s4655_s12, 4  ;;  %s3564_s30 = int_to_ptr.vmem [resolvable:$true] %s3563_s30 }
 0x9dc   :  { %v3438_v34 = vmul.f32 %v6149_v59, %v3400_v16  ;;  %v3402_v4 = vmul.f32 %v4447_v50, %v6063_v51  ;;  %v4449_v43 = vpop.eup %4448  ;;  %s4610_s2 = scalar_lea.vmem %s3564_s30, 4096  ;;  %p4615_p7 = scmp.lt.s32.totalorder %s3564_s30, %s3564_s30 }
 0x9dd   :  { %3507 = vst [vmem:[#allocation12 + $0x68] sm:$0xff] %v3475_v11  ;;  %v3439_v47 = vmul.f32 %v6149_v59, %v3401_v3  ;;  %v3403_v6 = vmul.f32 %v4449_v43, %v6068_v49  ;;  %v4451_v15 = vpop.eup %4450  ;;  %p4611_p6 = scmp.ne.s32.totalorder %s3564_s30, %s4610_s2  ;;  %p4616_p8 = scmp.lt.s32.totalorder %s4610_s2, %s4610_s2 }
 0x9de   :  { %v3476_v31 = vadd.f32 %v6155_v8, %v3438_v34  ;;  %v3440_v20 = vmul.f32 %v6149_v59, %v3402_v4  ;;  %v3404_v5 = vmul.f32 %v4451_v15, %v6073_v55 }
 0x9df   :  { %v3477_v14 = vadd.f32 %v6155_v8, %v3439_v47  ;;  %v3441_v45 = vmul.f32 %v6149_v59, %v3403_v6  ;;  %p4617_p9 = por %p4616_p8, %p4615_p7 }
 0x9e0   :  { %3508 = vst [vmem:[#allocation12 + $0x70] sm:$0xff] %v3476_v31  ;;  %v3478_v48 = vadd.f32 %v6155_v8, %v3440_v20  ;;  %v3442_v32 = vmul.f32 %v6149_v59, %v3404_v5 }
 0x9e1   :  { %3509 = vst [vmem:[#allocation12 + $0x78] sm:$0xff] %v3477_v14  ;;  %v3479_v51 = vadd.f32 %v6155_v8, %v3441_v45  ;;  %p4618_p10 = pnand %p4617_p9, %p4611_p6 }
 0x9e2   :  { %3510 = vst [vmem:[#allocation12 + $0x80] sm:$0xff] %v3478_v48  ;;  %v3480_v35 = vadd.f32 %v6155_v8, %v3442_v32 }
 0x9e3   :  { %v4453_v29 = vpop.eup %4452  ;;  %3511 = vst [vmem:[#allocation12 + $0x88] sm:$0xff] %v3479_v51 }
 0x9e4   :  { %v3405_v27 = vmul.f32 %v4453_v29, %v6078_v19  ;;  %3512 = vst [vmem:[#allocation12 + $0x90] sm:$0xff] %v3480_v35 }
 0x9e6   :  { %v3443_v49 = vmul.f32 %v6149_v59, %v3405_v27 }
 0x9e8   :  { %v3481_v1 = vadd.f32 %v6155_v8, %v3443_v49 }
 0x9ea   :  { %3513 = vst [vmem:[#allocation12 + $0x98] sm:$0xff] %v3481_v1 }
 0xa0e   :  { %v3267_v57 = vpop.xlane.xlu0 %3266 }
 0xa0f   :  { %v3310_v28 = vmul.f32 0.0078125, %v3267_v57 }
 0xa10   :  { %v3269_v55 = vpop.xlane.xlu1 %3268 }
 0xa11   :  { %v3342_v17 = vadd.f32 1e-05, %v3310_v28  ;;  %v3311_v56 = vmul.f32 0.0078125, %v3269_v55 }
 0xa13   :  { %4454 = vrsqrt.f32 %v3342_v17  ;;  %v3343_v36 = vadd.f32 1e-05, %v3311_v56 }
 0xa15   :  { %4456 = vrsqrt.f32 %v3343_v36 }
 0xa16   :  { %v3271_v33 = vpop.xlane.xlu0 %3270 }
 0xa17   :  { %v3312_v23 = vmul.f32 0.0078125, %v3271_v33 }
 0xa18   :  { %v3273_v19 = vpop.xlane.xlu1 %3272 }
 0xa19   :  { %v3344_v30 = vadd.f32 1e-05, %v3312_v23  ;;  %v3313_v61 = vmul.f32 0.0078125, %v3273_v19 }
 0xa1b   :  { %4458 = vrsqrt.f32 %v3344_v30  ;;  %v3345_v13 = vadd.f32 1e-05, %v3313_v61 }
 0xa1d   :  { %v4455_v10 = vpop.eup %4454  ;;  %4460 = vrsqrt.f32 %v3345_v13 }
 0xa1e   :  { %v3406_v38 = vmul.f32 %v4455_v10, %v6087_v22 }
 0xa1f   :  { %v3275_v62 = vpop.xlane.xlu0 %3274  ;;  %v4457_v2 = vpop.eup %4456 }
 0xa20   :  { %v3314_v26 = vmul.f32 0.0078125, %v3275_v62  ;;  %v3444_v58 = vmul.f32 %v6149_v59, %v3406_v38  ;;  %v3407_v44 = vmul.f32 %v4457_v2, %v6090_v0 }
 0xa21   :  { %v3277_v9 = vpop.xlane.xlu1 %3276 }
 0xa22   :  { %v3346_v54 = vadd.f32 1e-05, %v3314_v26  ;;  %v3315_v39 = vmul.f32 0.0078125, %v3277_v9  ;;  %v3482_v41 = vadd.f32 %v6155_v8, %v3444_v58  ;;  %v3445_v53 = vmul.f32 %v6149_v59, %v3407_v44 }
 0xa24   :  { %4462 = vrsqrt.f32 %v3346_v54  ;;  %v3347_v7 = vadd.f32 1e-05, %v3315_v39  ;;  %3514 = vst [vmem:[#allocation12 + $0xa0] sm:$0xff] %v3482_v41  ;;  %v3483_v60 = vadd.f32 %v6155_v8, %v3445_v53 }
 0xa25   :  { %v4459_v22 = vpop.eup %4458 }
 0xa26   :  { %4464 = vrsqrt.f32 %v3347_v7  ;;  %3515 = vst [vmem:[#allocation12 + $0xa8] sm:$0xff] %v3483_v60  ;;  %v3408_v16 = vmul.f32 %v4459_v22, %v6097_v12 }
 0xa27   :  { %v3279_v24 = vpop.xlane.xlu0 %3278  ;;  %v4461_v11 = vpop.eup %4460 }
 0xa28   :  { %v3316_v0 = vmul.f32 0.0078125, %v3279_v24  ;;  %v3446_v34 = vmul.f32 %v6149_v59, %v3408_v16  ;;  %v3409_v3 = vmul.f32 %v4461_v11, %v6100_v18 }
 0xa29   :  { %v3281_v50 = vpop.xlane.xlu1 %3280 }
 0xa2a   :  { %v3348_v31 = vadd.f32 1e-05, %v3316_v0  ;;  %v3317_v47 = vmul.f32 0.0078125, %v3281_v50  ;;  %v3484_v4 = vadd.f32 %v6155_v8, %v3446_v34  ;;  %v3447_v43 = vmul.f32 %v6149_v59, %v3409_v3 }
 0xa2c   :  { %4466 = vrsqrt.f32 %v3348_v31  ;;  %v3349_v14 = vadd.f32 1e-05, %v3317_v47  ;;  %3516 = vst [vmem:[#allocation12 + $0xb0] sm:$0xff] %v3484_v4  ;;  %v3485_v20 = vadd.f32 %v6155_v8, %v3447_v43 }
 0xa2e   :  { %v4463_v12 = vpop.eup %4462  ;;  %4468 = vrsqrt.f32 %v3349_v14  ;;  %3517 = vst [vmem:[#allocation12 + $0xb8] sm:$0xff] %v3485_v20 }
 0xa2f   :  { %v3410_v6 = vmul.f32 %v4463_v12, %v6107_v40  ;;  %v3283_v48 = vpop.xlane.xlu0 %3282 }
 0xa30   :  { %v4465_v15 = vpop.eup %4464  ;;  %v3318_v5 = vmul.f32 0.0078125, %v3283_v48 }
 0xa31   :  { %v3448_v18 = vmul.f32 %v6149_v59, %v3410_v6  ;;  %v3411_v45 = vmul.f32 %v4465_v15, %v6110_v25  ;;  %v3285_v29 = vpop.xlane.xlu1 %3284 }
 0xa32   :  { %v3350_v27 = vadd.f32 1e-05, %v3318_v5  ;;  %v3319_v35 = vmul.f32 0.0078125, %v3285_v29 }
 0xa33   :  { %v3486_v51 = vadd.f32 %v6155_v8, %v3448_v18  ;;  %v3449_v32 = vmul.f32 %v6149_v59, %v3411_v45 }
 0xa34   :  { %4470 = vrsqrt.f32 %v3350_v27  ;;  %v3351_v1 = vadd.f32 1e-05, %v3319_v35 }
 0xa35   :  { %3518 = vst [vmem:[#allocation12 + $0xc0] sm:$0xff] %v3486_v51  ;;  %v3487_v49 = vadd.f32 %v6155_v8, %v3449_v32 }
 0xa36   :  { %v4467_v40 = vpop.eup %4466  ;;  %4472 = vrsqrt.f32 %v3351_v1 }
 0xa37   :  { %3519 = vst [vmem:[#allocation12 + $0xc8] sm:$0xff] %v3487_v49  ;;  %v3412_v57 = vmul.f32 %v4467_v40, %v6117_v42  ;;  %v3287_v25 = vpop.xlane.xlu0 %3286 }
 0xa38   :  { %v4469_v28 = vpop.eup %4468  ;;  %v3320_v56 = vmul.f32 0.0078125, %v3287_v25 }
 0xa39   :  { %v3450_v55 = vmul.f32 %v6149_v59, %v3412_v57  ;;  %v3413_v17 = vmul.f32 %v4469_v28, %v6120_v52  ;;  %v3289_v36 = vpop.xlane.xlu1 %3288 }
 0xa3a   :  { %v3352_v19 = vadd.f32 1e-05, %v3320_v56  ;;  %v3321_v30 = vmul.f32 0.0078125, %v3289_v36 }
 0xa3b   :  { %v3488_v33 = vadd.f32 %v6155_v8, %v3450_v55  ;;  %v3451_v23 = vmul.f32 %v6149_v59, %v3413_v17 }
 0xa3c   :  { %4474 = vrsqrt.f32 %v3352_v19  ;;  %v3353_v42 = vadd.f32 1e-05, %v3321_v30 }
 0xa3d   :  { %3520 = vst [vmem:[#allocation12 + $0xd0] sm:$0xff] %v3488_v33  ;;  %v3489_v61 = vadd.f32 %v6155_v8, %v3451_v23 }
 0xa3e   :  { %v4471_v13 = vpop.eup %4470  ;;  %4476 = vrsqrt.f32 %v3353_v42 }
 0xa3f   :  { %3521 = vst [vmem:[#allocation12 + $0xd8] sm:$0xff] %v3489_v61  ;;  %v3414_v10 = vmul.f32 %v4471_v13, %v6127_v37 }
 0xa40   :  { %v4473_v38 = vpop.eup %4472 }
 0xa41   :  { %v3452_v52 = vmul.f32 %v6149_v59, %v3414_v10  ;;  %v3415_v62 = vmul.f32 %v4473_v38, %v6130_v21 }
 0xa43   :  { %v3490_v2 = vadd.f32 %v6155_v8, %v3452_v52  ;;  %v3453_v26 = vmul.f32 %v6149_v59, %v3415_v62 }
 0xa45   :  { %3522 = vst [vmem:[#allocation12 + $0xe0] sm:$0xff] %v3490_v2  ;;  %v3491_v58 = vadd.f32 %v6155_v8, %v3453_v26 }
 0xa46   :  { %v4475_v44 = vpop.eup %4474 }
 0xa47   :  { %3523 = vst [vmem:[#allocation12 + $0xe8] sm:$0xff] %v3491_v58  ;;  %v3416_v9 = vmul.f32 %v4475_v44, %v6137_v63 }
 0xa48   :  { %v4477_v54 = vpop.eup %4476 }
 0xa49   :  { %v3454_v39 = vmul.f32 %v6149_v59, %v3416_v9  ;;  %v3417_v37 = vmul.f32 %v4477_v54, %v6140_v46 }
 0xa4b   :  { %v3492_v21 = vadd.f32 %v6155_v8, %v3454_v39  ;;  %v3455_v41 = vmul.f32 %v6149_v59, %v3417_v37 }
 0xa4d   :  { %3524 = vst [vmem:[#allocation12 + $0xf0] sm:$0xff] %v3492_v21  ;;  %v3493_v53 = vadd.f32 %v6155_v8, %v3455_v41 }
 0xa4f   :  { %3525 = vst [vmem:[#allocation12 + $0xf8] sm:$0xff] %v3493_v53 }
 0xa50   :  { %4621 = shalt.err (!%p4618_p10)
}
 0xa51   :  { %s4622_s13 = scalar_lea.hbm %s6293_s11, 4096 }
 0xa52   :  { %p4623_p11 = scmp.ne.s32.totalorder %s6293_s11, %s4622_s13  ;;  %p4626_p12 = scmp.lt.u32.totalorder %s4622_s13, %s6293_s11 }
 0xa54   :  { %p4628_p13 = pnand %p4626_p12, %p4623_p11 }
 0xa56   :  { %4631 = shalt.err (!%p4628_p13)
}
 0xa57   :  { %3569 = dma.vmem_to_hbm [thread:$0]  %s3564_s30, 4096, %s6293_s11, [#allocation5], %s4647_s22, %s4647_s22, %s4648_s29  }
 0xa58   :  { %4638 = dma.done.wait [#allocation5], 4096  }
 0xa59   :  { %4639 = vsyncadd [#allocation5], 4294963200 }
 0xa5a   :  { %4640 = dma.done.wait [#allocation14], 4096  }
 0xa5b   :  { %4641 = vsyncadd [#allocation14], 4294963200 }
 0xa5c   :  { %3588 = vsyncpa [#allocation4], 1 }
 0xa5d   :  { %3589 = vsyncpa [#allocation7], 1 }
 0xa5e   :  { %3590 = vsyncpa [#allocation10], 1 }
 0xa5f   :  { %3591 = vsyncpa [#allocation5], 1 }
 0xa60   :  { %3592 = vsyncpa [#allocation14], 1 }

</bundles_post_ra>
